<compile_context>
chip_gen: v5e
topology: v5e:2x2
jax: 0.10.0
libtpu: 0.0.40
codegen_flags: <defaults>
</compile_context>

<pallas_src>
import math
from functools import partial

import jax
import jax.numpy as jnp
from jax import lax
from jax.experimental import pallas as pl
from jax.experimental.pallas import tpu as pltpu


def _round_up(x, m):
    return (x + m - 1) // m * m


def _feedback_kernel(x0_ref, w0_ref, w1_ref, b0_ref, b1_ref, mask_ref,
                     out_ref, xpad_s, done_sm, slot_sm,
                     *, Cin, Cout, Wp, START, INT_OFF, LANES, max_iter):
    """Whole FeedbackBlock forward, single program, everything VMEM-resident.

    xpad_s[slot] is a (C_pad, PLEN) zero-haloed buffer (channel-major, the
    batch is stacked vertically in padded space on the lane axis):
      rows [0, Cout)        : fed-back x      (rewritten every iteration)
      rows [Cout, Cout+Cin) : padded x0       (written once)
      rows [Cout+Cin, ...)  : zero padding    (sublane alignment)
    The H*W valid pixels of every image (plus masked junk columns/rows) live
    at lanes [INT_OFF, INT_OFF+LANES); tap (dy,dx) is the contiguous lane
    slice starting at START + dy*Wp + dx.
    """
    mask = mask_ref[...]                     # (1, LANES), 1.0 on valid pixels
    b0 = b0_ref[...]                         # (Cout, 1)
    b1 = b1_ref[...]                         # (Cout, 1)
    tap_offs = [START + dy * Wp + dx for dy in range(3) for dx in range(3)]

    def conv_apply(src, w, b):
        # im2col on sublanes: 9 lane-shifted views stacked -> ONE MXU matmul
        # (K = 9*C_pad); cross-tap accumulation happens inside the MXU.
        rhs = jnp.concatenate(
            [xpad_s[src, :, off:off + LANES] for off in tap_offs], axis=0)
        acc = jnp.dot(w, rhs, preferred_element_type=jnp.float32)
        return (acc + b) * mask              # junk lanes forced to zero

    # ------------------------------ init ------------------------------
    xpad_s[...] = jnp.zeros_like(xpad_s)     # zero halos / pad rows, once
    x0b = x0_ref[...]
    xpad_s[0, Cout:Cout + Cin, :] = x0b      # x0 channels, buffer 0
    xpad_s[1, Cout:Cout + Cin, :] = x0b      # x0 channels, buffer 1
    done_sm[0] = jnp.int32(0)
    slot_sm[0] = jnp.int32(0)

    # x = conv0(x0): feedback rows of buffer 0 are still zero, so the same
    # stacked-tap matmul computes it (w0 has zero weight on those rows).
    x_init = conv_apply(0, w0_ref[...], b0)
    xpad_s[0, 0:Cout, INT_OFF:INT_OFF + LANES] = x_init

    # -------------------------- feedback loop -------------------------
    def fb_step(src, dst):
        x_new = conv_apply(src, w1_ref[...], b1)                   # (Cout, LANES)
        x_old = xpad_s[src, 0:Cout, INT_OFF:INT_OFF + LANES]
        diff = jnp.sum(jnp.abs(x_new - x_old))                     # whole batch
        # ping-pong: write the masked result straight into the interior of
        # the other padded buffer (no separate x_cur buffer, no repad copy).
        xpad_s[dst, 0:Cout, INT_OFF:INT_OFF + LANES] = x_new
        slot_sm[0] = jnp.int32(dst)
        done_sm[0] = (diff < jnp.float32(1.0)).astype(jnp.int32)   # torch break

    def body(it, carry):
        active = done_sm[0] == 0
        even = (it % 2) == 0

        @pl.when(jnp.logical_and(active, even))
        def _():
            fb_step(0, 1)

        @pl.when(jnp.logical_and(active, jnp.logical_not(even)))
        def _():
            fb_step(1, 0)

        return carry

    lax.fori_loop(0, max_iter, body, jnp.int32(0))

    # --------------------- finalize: ReLU, lane-dense -----------------
    @pl.when(slot_sm[0] == 0)
    def _():
        out_ref[...] = jnp.maximum(
            xpad_s[0, 0:Cout, INT_OFF:INT_OFF + LANES], 0.0)

    @pl.when(slot_sm[0] == 1)
    def _():
        out_ref[...] = jnp.maximum(
            xpad_s[1, 0:Cout, INT_OFF:INT_OFF + LANES], 0.0)


class FeedbackBlockPallas:
    def __init__(self, in_channels, out_channels, maxIter=10, key=None):
        self.in_channels = int(in_channels)
        self.out_channels = int(out_channels)
        self.maxIter = int(maxIter)

        if key is None:
            key = jax.random.PRNGKey(0)
        k0w, k0b, k1w, k1b = jax.random.split(key, 4)

        # PyTorch Conv2d default init: bound = 1/sqrt(fan_in) for both w and b.
        def uni(k, shape, fan_in):
            bound = 1.0 / math.sqrt(fan_in)
            return jax.random.uniform(k, shape, jnp.float32, -bound, bound)

        Cin, Cout = self.in_channels, self.out_channels
        fan0 = Cin * 9
        fan1 = (Cin + Cout) * 9

        w0 = uni(k0w, (Cout, Cin, 3, 3), fan0)                 # conv0.weight (OIHW)
        w1 = uni(k1w, (Cout, Cin + Cout, 3, 3), fan1)          # conv.weight  (OIHW)
        b0 = uni(k0b, (Cout,), fan0)
        b1 = uni(k1b, (Cout,), fan1)

        # Keep OIHW copies for the pure-JAX reference check.
        self.w0_oihw, self.w1_oihw = w0, w1
        self.b0_v, self.b1_v = b0, b1

        # Buffer channel order: [feedback x (Cout), x0 (Cin), zero pad to 8k].
        C_all = Cin + Cout
        C_pad = _round_up(C_all, 8)
        self.C_pad = C_pad

        def stack_taps(w_perm):  # (Cout, C_pad, 3, 3) -> (Cout, 9*C_pad), tap-major
            a = jnp.transpose(w_perm, (2, 3, 0, 1)).reshape(9, Cout, C_pad)
            return jnp.transpose(a, (1, 0, 2)).reshape(Cout, 9 * C_pad)

        # conv (feedback): reorder input channels to [x (Cin..), x0 (0..Cin)].
        w1_perm = jnp.concatenate([w1[:, Cin:], w1[:, :Cin]], axis=1)
        w1_perm = jnp.pad(w1_perm, ((0, 0), (0, C_pad - C_all), (0, 0), (0, 0)))
        # conv0: only x0 rows carry weight; feedback/pad rows are zero.
        w0_perm = jnp.concatenate(
            [jnp.zeros((Cout, Cout, 3, 3), jnp.float32), w0], axis=1)
        w0_perm = jnp.pad(w0_perm, ((0, 0), (0, C_pad - C_all), (0, 0), (0, 0)))

        self.w0_stk = stack_taps(w0_perm)         # (Cout, 9*C_pad)
        self.w1_stk = stack_taps(w1_perm)         # (Cout, 9*C_pad)
        self.b0_c = b0.reshape(Cout, 1)
        self.b1_c = b1.reshape(Cout, 1)

    def __call__(self, x_nchw):
        x = x_nchw.astype(jnp.float32)
        N, Cin, H, W = x.shape
        assert Cin == self.in_channels
        Cout = self.out_channels
        C_pad = self.C_pad

        Hp, Wp = H + 2, W + 2
        LEN = N * Hp * Wp                          # batch stacked vertically (padded)
        LANES = _round_up(LEN, 128)                # lane-dense interior / output
        INT_OFF = _round_up(Wp + 1, 128)           # lane-aligned interior start
        START = INT_OFF - (Wp + 1)                 # buffer idx of image0 padded (0,0)
        PLEN = _round_up(START + 2 * Wp + 2 + LANES, 128)

        # x0 in padded, channel-major, batch-on-lanes layout (built once, XLA side).
        xp = jnp.pad(x, ((0, 0), (0, 0), (1, 1), (1, 1)))          # (N, Cin, Hp, Wp)
        xp = jnp.transpose(xp, (1, 0, 2, 3)).reshape(Cin, LEN)
        x0buf = jnp.zeros((Cin, PLEN), jnp.float32).at[:, START:START + LEN].set(xp)

        # Valid-pixel mask over the interior flat layout.
        o = jnp.arange(LANES, dtype=jnp.int32)
        r = o % (Hp * Wp)
        valid = (o < LEN) & ((r // Wp) < H) & ((r % Wp) < W)
        mask = valid.astype(jnp.float32).reshape(1, LANES)

        kernel = partial(_feedback_kernel, Cin=Cin, Cout=Cout, Wp=Wp,
                         START=START, INT_OFF=INT_OFF, LANES=LANES,
                         max_iter=self.maxIter)

        # Rough resident VMEM footprint (ping-pong state + im2col temp + I/O).
        footprint = 4 * (2 * C_pad * PLEN + Cin * PLEN + 2 * Cout * 9 * C_pad
                         + (2 * 9 * C_pad + 2 * Cout + 1) * LANES)
        # TODO(synk): chunk the batch (per-chunk convergence) if this ever nears
        # the v7x 64 MiB VMEM ceiling; whole-batch convergence coupling forbids
        # a transparent split.
        assert footprint < 24 * 1024 * 1024, "problem too large for fused kernel"

        out_flat = pl.pallas_call(
            kernel,
            out_shape=jax.ShapeDtypeStruct((Cout, LANES), jnp.float32),
            scratch_shapes=[
                pltpu.VMEM((2, C_pad, PLEN), jnp.float32),   # ping-pong padded state
                pltpu.SMEM((1,), jnp.int32),                 # done flag
                pltpu.SMEM((1,), jnp.int32),                 # last-written slot
            ],
            compiler_params=pltpu.CompilerParams(
                vmem_limit_bytes=32 * 1024 * 1024),
        )(x0buf, self.w0_stk, self.w1_stk, self.b0_c, self.b1_c, mask)

        # (Cout, LANES) -> NCHW (drop junk columns / rows / tail lanes).
        y = out_flat[:, :LEN].reshape(Cout, N, Hp, Wp)[:, :, :H, :W]
        return jnp.transpose(y, (1, 0, 2, 3))


def _reference_forward(block, x):
    """Pure-JAX re-implementation of the PyTorch forward (eager, with break)."""
    def conv(inp, w, b):
        out = lax.conv_general_dilated(
            inp, w, window_strides=(1, 1), padding=((1, 1), (1, 1)),
            dimension_numbers=("NCHW", "OIHW", "NCHW"),
            precision=lax.Precision.HIGHEST)
        return out + b.reshape(1, -1, 1, 1)

    x0 = x
    xc = conv(x0, block.w0_oihw, block.b0_v)
    for _ in range(block.maxIter):
        x_pre = xc
        xc = conv(jnp.concatenate([x0, xc], axis=1), block.w1_oihw, block.b1_v)
        if float(jnp.sum(jnp.abs(xc - x_pre))) < 1.0:
            break
    return jnp.maximum(xc, 0.0)


if __name__ == "__main__":
    key = jax.random.PRNGKey(0)
    kx, kp = jax.random.split(key)

    N, Cin, H, W = 2, 4, 16, 16
    Cout = 8

    x = jax.random.normal(kx, (N, Cin, H, W), jnp.float32)

    block = FeedbackBlockPallas(Cin, Cout, maxIter=10, key=kp)
    fwd = jax.jit(block.__call__)

    y = jax.block_until_ready(fwd(x))

    assert y.shape == (N, Cout, H, W), y.shape
    assert y.dtype == jnp.float32
    assert bool(jnp.all(jnp.isfinite(y)))
    assert bool(jnp.all(y >= 0.0))          # ReLU output

    y_ref = _reference_forward(block, x)
    assert bool(jnp.allclose(y, y_ref, atol=2e-2, rtol=2e-2)), (
        float(jnp.max(jnp.abs(y - y_ref))))

    print("KERNEL_OK")
</pallas_src>

<mosaic_0001>
module attributes {stable_mosaic.version = 11 : i64} {
  func.func @_feedback_kernel(%arg0: memref<4x1024xf32, #tpu.memory_space<vmem>>, %arg1: memref<8x144xf32, #tpu.memory_space<vmem>>, %arg2: memref<8x144xf32, #tpu.memory_space<vmem>>, %arg3: memref<8x1xf32, #tpu.memory_space<vmem>>, %arg4: memref<8x1xf32, #tpu.memory_space<vmem>>, %arg5: memref<1x768xf32, #tpu.memory_space<vmem>>, %arg6: memref<8x768xf32, #tpu.memory_space<vmem>>, %arg7: memref<2x16x1024xf32, #tpu.memory_space<vmem>>, %arg8: memref<1xi32, #tpu.memory_space<smem>>, %arg9: memref<1xi32, #tpu.memory_space<smem>>) attributes {dimension_semantics = [], scalar_prefetch = 0 : i64, scratch_operands = 3 : i64, tpu.core_type = #tpu.core_type<tc>} {
    %c0 = arith.constant 0 : index
    %c0_0 = arith.constant 0 : index
    %0 = vector.load %arg5[%c0, %c0_0] : memref<1x768xf32, #tpu.memory_space<vmem>>, vector<1x768xf32>
    %c0_1 = arith.constant 0 : index
    %c0_2 = arith.constant 0 : index
    %1 = vector.load %arg3[%c0_1, %c0_2] : memref<8x1xf32, #tpu.memory_space<vmem>>, vector<8x1xf32>
    %c0_3 = arith.constant 0 : index
    %c0_4 = arith.constant 0 : index
    %2 = vector.load %arg4[%c0_3, %c0_4] : memref<8x1xf32, #tpu.memory_space<vmem>>, vector<8x1xf32>
    %cst = arith.constant 0.000000e+00 : f32
    %3 = vector.broadcast %cst : f32 to vector<2x16x1024xf32>
    %c0_5 = arith.constant 0 : index
    %c0_6 = arith.constant 0 : index
    %c0_7 = arith.constant 0 : index
    %4 = vector.load %arg7[%c0_5, %c0_6, %c0_7] : memref<2x16x1024xf32, #tpu.memory_space<vmem>>, vector<2x16x1024xf32>
    tpu.vector_store %arg7[%c0_5, %c0_6, %c0_7], %3 {strides = array<i32>} : memref<2x16x1024xf32, #tpu.memory_space<vmem>>, vector<2x16x1024xf32>,
    %c0_8 = arith.constant 0 : index
    %c0_9 = arith.constant 0 : index
    %5 = vector.load %arg0[%c0_8, %c0_9] : memref<4x1024xf32, #tpu.memory_space<vmem>>, vector<4x1024xf32>
    %c0_10 = arith.constant 0 : index
    %c8 = arith.constant 8 : index
    %c0_11 = arith.constant 0 : index
    %6 = vector.load %arg7[%c0_10, %c8, %c0_11] : memref<2x16x1024xf32, #tpu.memory_space<vmem>>, vector<1x4x1024xf32>
    %7 = vector.shape_cast %6 : vector<1x4x1024xf32> to vector<4x1024xf32>
    %8 = vector.shape_cast %5 : vector<4x1024xf32> to vector<1x4x1024xf32>
    tpu.vector_store %arg7[%c0_10, %c8, %c0_11], %8 {strides = array<i32>} : memref<2x16x1024xf32, #tpu.memory_space<vmem>>, vector<1x4x1024xf32>,
    %c1 = arith.constant 1 : index
    %c8_12 = arith.constant 8 : index
    %c0_13 = arith.constant 0 : index
    %9 = vector.load %arg7[%c1, %c8_12, %c0_13] : memref<2x16x1024xf32, #tpu.memory_space<vmem>>, vector<1x4x1024xf32>
    %10 = vector.shape_cast %9 : vector<1x4x1024xf32> to vector<4x1024xf32>
    %11 = vector.shape_cast %5 : vector<4x1024xf32> to vector<1x4x1024xf32>
    tpu.vector_store %arg7[%c1, %c8_12, %c0_13], %11 {strides = array<i32>} : memref<2x16x1024xf32, #tpu.memory_space<vmem>>, vector<1x4x1024xf32>,
    %c0_i32 = arith.constant 0 : i32
    %c0_14 = arith.constant 0 : index
    %12 = memref.load %arg8[%c0_14] : memref<1xi32, #tpu.memory_space<smem>>
    memref.store %c0_i32, %arg8[%c0_14] : memref<1xi32, #tpu.memory_space<smem>>
    %c0_i32_15 = arith.constant 0 : i32
    %c0_16 = arith.constant 0 : index
    %13 = memref.load %arg9[%c0_16] : memref<1xi32, #tpu.memory_space<smem>>
    memref.store %c0_i32_15, %arg9[%c0_16] : memref<1xi32, #tpu.memory_space<smem>>
    %c0_17 = arith.constant 0 : index
    %c0_18 = arith.constant 0 : index
    %14 = vector.load %arg1[%c0_17, %c0_18] : memref<8x144xf32, #tpu.memory_space<vmem>>, vector<8x144xf32>
    %c0_19 = arith.constant 0 : index
    %c0_20 = arith.constant 0 : index
    %c109 = arith.constant 109 : index
    %15 = vector.load %arg7[%c0_19, %c0_20, %c109] : memref<2x16x1024xf32, #tpu.memory_space<vmem>>, vector<1x16x768xf32>
    %16 = vector.shape_cast %15 : vector<1x16x768xf32> to vector<16x768xf32>
    %c0_21 = arith.constant 0 : index
    %c0_22 = arith.constant 0 : index
    %c110 = arith.constant 110 : index
    %17 = vector.load %arg7[%c0_21, %c0_22, %c110] : memref<2x16x1024xf32, #tpu.memory_space<vmem>>, vector<1x16x768xf32>
    %18 = vector.shape_cast %17 : vector<1x16x768xf32> to vector<16x768xf32>
    %c0_23 = arith.constant 0 : index
    %c0_24 = arith.constant 0 : index
    %c111 = arith.constant 111 : index
    %19 = vector.load %arg7[%c0_23, %c0_24, %c111] : memref<2x16x1024xf32, #tpu.memory_space<vmem>>, vector<1x16x768xf32>
    %20 = vector.shape_cast %19 : vector<1x16x768xf32> to vector<16x768xf32>
    %c0_25 = arith.constant 0 : index
    %c0_26 = arith.constant 0 : index
    %c127 = arith.constant 127 : index
    %21 = vector.load %arg7[%c0_25, %c0_26, %c127] : memref<2x16x1024xf32, #tpu.memory_space<vmem>>, vector<1x16x768xf32>
    %22 = vector.shape_cast %21 : vector<1x16x768xf32> to vector<16x768xf32>
    %c0_27 = arith.constant 0 : index
    %c0_28 = arith.constant 0 : index
    %c128 = arith.constant 128 : index
    %23 = vector.load %arg7[%c0_27, %c0_28, %c128] : memref<2x16x1024xf32, #tpu.memory_space<vmem>>, vector<1x16x768xf32>
    %24 = vector.shape_cast %23 : vector<1x16x768xf32> to vector<16x768xf32>
    %c0_29 = arith.constant 0 : index
    %c0_30 = arith.constant 0 : index
    %c129 = arith.constant 129 : index
    %25 = vector.load %arg7[%c0_29, %c0_30, %c129] : memref<2x16x1024xf32, #tpu.memory_space<vmem>>, vector<1x16x768xf32>
    %26 = vector.shape_cast %25 : vector<1x16x768xf32> to vector<16x768xf32>
    %c0_31 = arith.constant 0 : index
    %c0_32 = arith.constant 0 : index
    %c145 = arith.constant 145 : index
    %27 = vector.load %arg7[%c0_31, %c0_32, %c145] : memref<2x16x1024xf32, #tpu.memory_space<vmem>>, vector<1x16x768xf32>
    %28 = vector.shape_cast %27 : vector<1x16x768xf32> to vector<16x768xf32>
    %c0_33 = arith.constant 0 : index
    %c0_34 = arith.constant 0 : index
    %c146 = arith.constant 146 : index
    %29 = vector.load %arg7[%c0_33, %c0_34, %c146] : memref<2x16x1024xf32, #tpu.memory_space<vmem>>, vector<1x16x768xf32>
    %30 = vector.shape_cast %29 : vector<1x16x768xf32> to vector<16x768xf32>
    %c0_35 = arith.constant 0 : index
    %c0_36 = arith.constant 0 : index
    %c147 = arith.constant 147 : index
    %31 = vector.load %arg7[%c0_35, %c0_36, %c147] : memref<2x16x1024xf32, #tpu.memory_space<vmem>>, vector<1x16x768xf32>
    %32 = vector.shape_cast %31 : vector<1x16x768xf32> to vector<16x768xf32>
    %33 = tpu.concatenate %16, %18, %20, %22, %24, %26, %28, %30, %32 in 0 : vector<16x768xf32>, vector<16x768xf32>, vector<16x768xf32>, vector<16x768xf32>, vector<16x768xf32>, vector<16x768xf32>, vector<16x768xf32>, vector<16x768xf32>, vector<16x768xf32> -> vector<144x768xf32>
    %cst_37 = arith.constant dense<0.000000e+00> : vector<8x768xf32>
    %34 = tpu.matmul %14, %33, %cst_37 {dimension_numbers = #tpu.dot_dimension_numbers<[1], [0], [0], [1], [0, 0, 1, 1], [], []>} : vector<8x144xf32>, vector<144x768xf32>, vector<8x768xf32> -> vector<8x768xf32>
    %35 = vector.broadcast %1 : vector<8x1xf32> to vector<8x768xf32>
    %36 = arith.addf %34, %35 : vector<8x768xf32>
    %37 = vector.broadcast %0 : vector<1x768xf32> to vector<8x768xf32>
    %38 = arith.mulf %36, %37 : vector<8x768xf32>
    %c0_38 = arith.constant 0 : index
    %c0_39 = arith.constant 0 : index
    %c128_40 = arith.constant 128 : index
    %39 = vector.load %arg7[%c0_38, %c0_39, %c128_40] : memref<2x16x1024xf32, #tpu.memory_space<vmem>>, vector<1x8x768xf32>
    %40 = vector.shape_cast %39 : vector<1x8x768xf32> to vector<8x768xf32>
    %41 = vector.shape_cast %38 : vector<8x768xf32> to vector<1x8x768xf32>
    tpu.vector_store %arg7[%c0_38, %c0_39, %c128_40], %41 {strides = array<i32>} : memref<2x16x1024xf32, #tpu.memory_space<vmem>>, vector<1x8x768xf32>,
    %c0_i32_41 = arith.constant 0 : i32
    %c10_i32 = arith.constant 10 : i32
    %42 = arith.addi %c0_i32_41, %c10_i32 : i32
    %c1_i32 = arith.constant 1 : i32
    scf.for %arg10 = %c0_i32_41 to %42 step %c1_i32  : i32 {
      %c0_49 = arith.constant 0 : index
      %51 = memref.load %arg8[%c0_49] : memref<1xi32, #tpu.memory_space<smem>>
      %c0_i32_50 = arith.constant 0 : i32
      %52 = arith.cmpi eq, %51, %c0_i32_50 : i32
      %c2_i32 = arith.constant 2 : i32
      %c0_i32_51 = arith.constant 0 : i32
      %53 = arith.cmpi eq, %c2_i32, %c0_i32_51 : i32
      %c1_i32_52 = arith.constant 1 : i32
      %54 = arith.select %53, %c1_i32_52, %c2_i32 : i32
      %55 = arith.remsi %arg10, %54 : i32
      %c0_i32_53 = arith.constant 0 : i32
      %56 = arith.cmpi ne, %55, %c0_i32_53 : i32
      %c0_i32_54 = arith.constant 0 : i32
      %57 = arith.cmpi slt, %55, %c0_i32_54 : i32
      %c0_i32_55 = arith.constant 0 : i32
      %58 = arith.cmpi slt, %54, %c0_i32_55 : i32
      %59 = arith.xori %57, %58 : i1
      %60 = arith.andi %59, %56 : i1
      %61 = arith.addi %55, %54 : i32
      %62 = arith.select %60, %61, %55 : i32
      %c0_i32_56 = arith.constant 0 : i32
      %63 = arith.cmpi eq, %62, %c0_i32_56 : i32
      %64 = arith.andi %52, %63 : i1
      %65 = arith.extui %64 : i1 to i32
      %c0_i32_57 = arith.constant 0 : i32
      %66 = arith.cmpi ne, %65, %c0_i32_57 : i32
      scf.if %66 {
        %c0_59 = arith.constant 0 : index
        %c0_60 = arith.constant 0 : index
        %71 = vector.load %arg2[%c0_59, %c0_60] : memref<8x144xf32, #tpu.memory_space<vmem>>, vector<8x144xf32>
        %c0_61 = arith.constant 0 : index
        %c0_62 = arith.constant 0 : index
        %c109_63 = arith.constant 109 : index
        %72 = vector.load %arg7[%c0_61, %c0_62, %c109_63] : memref<2x16x1024xf32, #tpu.memory_space<vmem>>, vector<1x16x768xf32>
        %73 = vector.shape_cast %72 : vector<1x16x768xf32> to vector<16x768xf32>
        %c0_64 = arith.constant 0 : index
        %c0_65 = arith.constant 0 : index
        %c110_66 = arith.constant 110 : index
        %74 = vector.load %arg7[%c0_64, %c0_65, %c110_66] : memref<2x16x1024xf32, #tpu.memory_space<vmem>>, vector<1x16x768xf32>
        %75 = vector.shape_cast %74 : vector<1x16x768xf32> to vector<16x768xf32>
        %c0_67 = arith.constant 0 : index
        %c0_68 = arith.constant 0 : index
        %c111_69 = arith.constant 111 : index
        %76 = vector.load %arg7[%c0_67, %c0_68, %c111_69] : memref<2x16x1024xf32, #tpu.memory_space<vmem>>, vector<1x16x768xf32>
        %77 = vector.shape_cast %76 : vector<1x16x768xf32> to vector<16x768xf32>
        %c0_70 = arith.constant 0 : index
        %c0_71 = arith.constant 0 : index
        %c127_72 = arith.constant 127 : index
        %78 = vector.load %arg7[%c0_70, %c0_71, %c127_72] : memref<2x16x1024xf32, #tpu.memory_space<vmem>>, vector<1x16x768xf32>
        %79 = vector.shape_cast %78 : vector<1x16x768xf32> to vector<16x768xf32>
        %c0_73 = arith.constant 0 : index
        %c0_74 = arith.constant 0 : index
        %c128_75 = arith.constant 128 : index
        %80 = vector.load %arg7[%c0_73, %c0_74, %c128_75] : memref<2x16x1024xf32, #tpu.memory_space<vmem>>, vector<1x16x768xf32>
        %81 = vector.shape_cast %80 : vector<1x16x768xf32> to vector<16x768xf32>
        %c0_76 = arith.constant 0 : index
        %c0_77 = arith.constant 0 : index
        %c129_78 = arith.constant 129 : index
        %82 = vector.load %arg7[%c0_76, %c0_77, %c129_78] : memref<2x16x1024xf32, #tpu.memory_space<vmem>>, vector<1x16x768xf32>
        %83 = vector.shape_cast %82 : vector<1x16x768xf32> to vector<16x768xf32>
        %c0_79 = arith.constant 0 : index
        %c0_80 = arith.constant 0 : index
        %c145_81 = arith.constant 145 : index
        %84 = vector.load %arg7[%c0_79, %c0_80, %c145_81] : memref<2x16x1024xf32, #tpu.memory_space<vmem>>, vector<1x16x768xf32>
        %85 = vector.shape_cast %84 : vector<1x16x768xf32> to vector<16x768xf32>
        %c0_82 = arith.constant 0 : index
        %c0_83 = arith.constant 0 : index
        %c146_84 = arith.constant 146 : index
        %86 = vector.load %arg7[%c0_82, %c0_83, %c146_84] : memref<2x16x1024xf32, #tpu.memory_space<vmem>>, vector<1x16x768xf32>
        %87 = vector.shape_cast %86 : vector<1x16x768xf32> to vector<16x768xf32>
        %c0_85 = arith.constant 0 : index
        %c0_86 = arith.constant 0 : index
        %c147_87 = arith.constant 147 : index
        %88 = vector.load %arg7[%c0_85, %c0_86, %c147_87] : memref<2x16x1024xf32, #tpu.memory_space<vmem>>, vector<1x16x768xf32>
        %89 = vector.shape_cast %88 : vector<1x16x768xf32> to vector<16x768xf32>
        %90 = tpu.concatenate %73, %75, %77, %79, %81, %83, %85, %87, %89 in 0 : vector<16x768xf32>, vector<16x768xf32>, vector<16x768xf32>, vector<16x768xf32>, vector<16x768xf32>, vector<16x768xf32>, vector<16x768xf32>, vector<16x768xf32>, vector<16x768xf32> -> vector<144x768xf32>
        %cst_88 = arith.constant dense<0.000000e+00> : vector<8x768xf32>
        %91 = tpu.matmul %71, %90, %cst_88 {dimension_numbers = #tpu.dot_dimension_numbers<[1], [0], [0], [1], [0, 0, 1, 1], [], []>} : vector<8x144xf32>, vector<144x768xf32>, vector<8x768xf32> -> vector<8x768xf32>
        %92 = vector.broadcast %2 : vector<8x1xf32> to vector<8x768xf32>
        %93 = arith.addf %91, %92 : vector<8x768xf32>
        %94 = vector.broadcast %0 : vector<1x768xf32> to vector<8x768xf32>
        %95 = arith.mulf %93, %94 : vector<8x768xf32>
        %c0_89 = arith.constant 0 : index
        %c0_90 = arith.constant 0 : index
        %c128_91 = arith.constant 128 : index
        %96 = vector.load %arg7[%c0_89, %c0_90, %c128_91] : memref<2x16x1024xf32, #tpu.memory_space<vmem>>, vector<1x8x768xf32>
        %97 = vector.shape_cast %96 : vector<1x8x768xf32> to vector<8x768xf32>
        %98 = arith.subf %95, %97 : vector<8x768xf32>
        %99 = math.absf %98 : vector<8x768xf32>
        %100 = vector.shape_cast %99 : vector<8x768xf32> to vector<1x8x768xf32>
        %cst_92 = arith.constant dense<0.000000e+00> : vector<1xf32>
        %101 = vector.multi_reduction <add>, %100, %cst_92 [1, 2] : vector<1x8x768xf32> to vector<1xf32>
        %102 = vector.shape_cast %101 : vector<1xf32> to vector<1x1x1xf32>
        %103 = vector.extract %102[0, 0, 0] : f32 from vector<1x1x1xf32>
        %c1_93 = arith.constant 1 : index
        %c0_94 = arith.constant 0 : index
        %c128_95 = arith.constant 128 : index
        %104 = vector.load %arg7[%c1_93, %c0_94, %c128_95] : memref<2x16x1024xf32, #tpu.memory_space<vmem>>, vector<1x8x768xf32>
        %105 = vector.shape_cast %104 : vector<1x8x768xf32> to vector<8x768xf32>
        %106 = vector.shape_cast %95 : vector<8x768xf32> to vector<1x8x768xf32>
        tpu.vector_store %arg7[%c1_93, %c0_94, %c128_95], %106 {strides = array<i32>} : memref<2x16x1024xf32, #tpu.memory_space<vmem>>, vector<1x8x768xf32>,
        %c1_i32_96 = arith.constant 1 : i32
        %c0_97 = arith.constant 0 : index
        %107 = memref.load %arg9[%c0_97] : memref<1xi32, #tpu.memory_space<smem>>
        memref.store %c1_i32_96, %arg9[%c0_97] : memref<1xi32, #tpu.memory_space<smem>>
        %cst_98 = arith.constant 1.000000e+00 : f32
        %108 = arith.cmpf olt, %103, %cst_98 : f32
        %109 = arith.extui %108 : i1 to i32
        %c0_99 = arith.constant 0 : index
        %110 = memref.load %arg8[%c0_99] : memref<1xi32, #tpu.memory_space<smem>>
        memref.store %109, %arg8[%c0_99] : memref<1xi32, #tpu.memory_space<smem>>
      } else {
      }
      %true = arith.constant true
      %67 = arith.xori %63, %true : i1
      %68 = arith.andi %52, %67 : i1
      %69 = arith.extui %68 : i1 to i32
      %c0_i32_58 = arith.constant 0 : i32
      %70 = arith.cmpi ne, %69, %c0_i32_58 : i32
      scf.if %70 {
        %c0_59 = arith.constant 0 : index
        %c0_60 = arith.constant 0 : index
        %71 = vector.load %arg2[%c0_59, %c0_60] : memref<8x144xf32, #tpu.memory_space<vmem>>, vector<8x144xf32>
        %c1_61 = arith.constant 1 : index
        %c0_62 = arith.constant 0 : index
        %c109_63 = arith.constant 109 : index
        %72 = vector.load %arg7[%c1_61, %c0_62, %c109_63] : memref<2x16x1024xf32, #tpu.memory_space<vmem>>, vector<1x16x768xf32>
        %73 = vector.shape_cast %72 : vector<1x16x768xf32> to vector<16x768xf32>
        %c1_64 = arith.constant 1 : index
        %c0_65 = arith.constant 0 : index
        %c110_66 = arith.constant 110 : index
        %74 = vector.load %arg7[%c1_64, %c0_65, %c110_66] : memref<2x16x1024xf32, #tpu.memory_space<vmem>>, vector<1x16x768xf32>
        %75 = vector.shape_cast %74 : vector<1x16x768xf32> to vector<16x768xf32>
        %c1_67 = arith.constant 1 : index
        %c0_68 = arith.constant 0 : index
        %c111_69 = arith.constant 111 : index
        %76 = vector.load %arg7[%c1_67, %c0_68, %c111_69] : memref<2x16x1024xf32, #tpu.memory_space<vmem>>, vector<1x16x768xf32>
        %77 = vector.shape_cast %76 : vector<1x16x768xf32> to vector<16x768xf32>
        %c1_70 = arith.constant 1 : index
        %c0_71 = arith.constant 0 : index
        %c127_72 = arith.constant 127 : index
        %78 = vector.load %arg7[%c1_70, %c0_71, %c127_72] : memref<2x16x1024xf32, #tpu.memory_space<vmem>>, vector<1x16x768xf32>
        %79 = vector.shape_cast %78 : vector<1x16x768xf32> to vector<16x768xf32>
        %c1_73 = arith.constant 1 : index
        %c0_74 = arith.constant 0 : index
        %c128_75 = arith.constant 128 : index
        %80 = vector.load %arg7[%c1_73, %c0_74, %c128_75] : memref<2x16x1024xf32, #tpu.memory_space<vmem>>, vector<1x16x768xf32>
        %81 = vector.shape_cast %80 : vector<1x16x768xf32> to vector<16x768xf32>
        %c1_76 = arith.constant 1 : index
        %c0_77 = arith.constant 0 : index
        %c129_78 = arith.constant 129 : index
        %82 = vector.load %arg7[%c1_76, %c0_77, %c129_78] : memref<2x16x1024xf32, #tpu.memory_space<vmem>>, vector<1x16x768xf32>
        %83 = vector.shape_cast %82 : vector<1x16x768xf32> to vector<16x768xf32>
        %c1_79 = arith.constant 1 : index
        %c0_80 = arith.constant 0 : index
        %c145_81 = arith.constant 145 : index
        %84 = vector.load %arg7[%c1_79, %c0_80, %c145_81] : memref<2x16x1024xf32, #tpu.memory_space<vmem>>, vector<1x16x768xf32>
        %85 = vector.shape_cast %84 : vector<1x16x768xf32> to vector<16x768xf32>
        %c1_82 = arith.constant 1 : index
        %c0_83 = arith.constant 0 : index
        %c146_84 = arith.constant 146 : index
        %86 = vector.load %arg7[%c1_82, %c0_83, %c146_84] : memref<2x16x1024xf32, #tpu.memory_space<vmem>>, vector<1x16x768xf32>
        %87 = vector.shape_cast %86 : vector<1x16x768xf32> to vector<16x768xf32>
        %c1_85 = arith.constant 1 : index
        %c0_86 = arith.constant 0 : index
        %c147_87 = arith.constant 147 : index
        %88 = vector.load %arg7[%c1_85, %c0_86, %c147_87] : memref<2x16x1024xf32, #tpu.memory_space<vmem>>, vector<1x16x768xf32>
        %89 = vector.shape_cast %88 : vector<1x16x768xf32> to vector<16x768xf32>
        %90 = tpu.concatenate %73, %75, %77, %79, %81, %83, %85, %87, %89 in 0 : vector<16x768xf32>, vector<16x768xf32>, vector<16x768xf32>, vector<16x768xf32>, vector<16x768xf32>, vector<16x768xf32>, vector<16x768xf32>, vector<16x768xf32>, vector<16x768xf32> -> vector<144x768xf32>
        %cst_88 = arith.constant dense<0.000000e+00> : vector<8x768xf32>
        %91 = tpu.matmul %71, %90, %cst_88 {dimension_numbers = #tpu.dot_dimension_numbers<[1], [0], [0], [1], [0, 0, 1, 1], [], []>} : vector<8x144xf32>, vector<144x768xf32>, vector<8x768xf32> -> vector<8x768xf32>
        %92 = vector.broadcast %2 : vector<8x1xf32> to vector<8x768xf32>
        %93 = arith.addf %91, %92 : vector<8x768xf32>
        %94 = vector.broadcast %0 : vector<1x768xf32> to vector<8x768xf32>
        %95 = arith.mulf %93, %94 : vector<8x768xf32>
        %c1_89 = arith.constant 1 : index
        %c0_90 = arith.constant 0 : index
        %c128_91 = arith.constant 128 : index
        %96 = vector.load %arg7[%c1_89, %c0_90, %c128_91] : memref<2x16x1024xf32, #tpu.memory_space<vmem>>, vector<1x8x768xf32>
        %97 = vector.shape_cast %96 : vector<1x8x768xf32> to vector<8x768xf32>
        %98 = arith.subf %95, %97 : vector<8x768xf32>
        %99 = math.absf %98 : vector<8x768xf32>
        %100 = vector.shape_cast %99 : vector<8x768xf32> to vector<1x8x768xf32>
        %cst_92 = arith.constant dense<0.000000e+00> : vector<1xf32>
        %101 = vector.multi_reduction <add>, %100, %cst_92 [1, 2] : vector<1x8x768xf32> to vector<1xf32>
        %102 = vector.shape_cast %101 : vector<1xf32> to vector<1x1x1xf32>
        %103 = vector.extract %102[0, 0, 0] : f32 from vector<1x1x1xf32>
        %c0_93 = arith.constant 0 : index
        %c0_94 = arith.constant 0 : index
        %c128_95 = arith.constant 128 : index
        %104 = vector.load %arg7[%c0_93, %c0_94, %c128_95] : memref<2x16x1024xf32, #tpu.memory_space<vmem>>, vector<1x8x768xf32>
        %105 = vector.shape_cast %104 : vector<1x8x768xf32> to vector<8x768xf32>
        %106 = vector.shape_cast %95 : vector<8x768xf32> to vector<1x8x768xf32>
        tpu.vector_store %arg7[%c0_93, %c0_94, %c128_95], %106 {strides = array<i32>} : memref<2x16x1024xf32, #tpu.memory_space<vmem>>, vector<1x8x768xf32>,
        %c0_i32_96 = arith.constant 0 : i32
        %c0_97 = arith.constant 0 : index
        %107 = memref.load %arg9[%c0_97] : memref<1xi32, #tpu.memory_space<smem>>
        memref.store %c0_i32_96, %arg9[%c0_97] : memref<1xi32, #tpu.memory_space<smem>>
        %cst_98 = arith.constant 1.000000e+00 : f32
        %108 = arith.cmpf olt, %103, %cst_98 : f32
        %109 = arith.extui %108 : i1 to i32
        %c0_99 = arith.constant 0 : index
        %110 = memref.load %arg8[%c0_99] : memref<1xi32, #tpu.memory_space<smem>>
        memref.store %109, %arg8[%c0_99] : memref<1xi32, #tpu.memory_space<smem>>
      } else {
      }
    }
    %c10_i32_42 = arith.constant 10 : i32
    %c0_43 = arith.constant 0 : index
    %43 = memref.load %arg9[%c0_43] : memref<1xi32, #tpu.memory_space<smem>>
    %c0_i32_44 = arith.constant 0 : i32
    %44 = arith.cmpi eq, %43, %c0_i32_44 : i32
    %45 = arith.extui %44 : i1 to i32
    %c0_i32_45 = arith.constant 0 : i32
    %46 = arith.cmpi ne, %45, %c0_i32_45 : i32
    scf.if %46 {
      %c0_49 = arith.constant 0 : index
      %c0_50 = arith.constant 0 : index
      %c128_51 = arith.constant 128 : index
      %51 = vector.load %arg7[%c0_49, %c0_50, %c128_51] : memref<2x16x1024xf32, #tpu.memory_space<vmem>>, vector<1x8x768xf32>
      %52 = vector.shape_cast %51 : vector<1x8x768xf32> to vector<8x768xf32>
      %cst_52 = arith.constant 0.000000e+00 : f32
      %53 = vector.broadcast %cst_52 : f32 to vector<8x768xf32>
      %54 = arith.maximumf %52, %53 : vector<8x768xf32>
      %c0_53 = arith.constant 0 : index
      %c0_54 = arith.constant 0 : index
      %55 = vector.load %arg6[%c0_53, %c0_54] : memref<8x768xf32, #tpu.memory_space<vmem>>, vector<8x768xf32>
      tpu.vector_store %arg6[%c0_53, %c0_54], %54 {strides = array<i32>} : memref<8x768xf32, #tpu.memory_space<vmem>>, vector<8x768xf32>,
    } else {
    }
    %c0_46 = arith.constant 0 : index
    %47 = memref.load %arg9[%c0_46] : memref<1xi32, #tpu.memory_space<smem>>
    %c1_i32_47 = arith.constant 1 : i32
    %48 = arith.cmpi eq, %47, %c1_i32_47 : i32
    %49 = arith.extui %48 : i1 to i32
    %c0_i32_48 = arith.constant 0 : i32
    %50 = arith.cmpi ne, %49, %c0_i32_48 : i32
    scf.if %50 {
      %c1_49 = arith.constant 1 : index
      %c0_50 = arith.constant 0 : index
      %c128_51 = arith.constant 128 : index
      %51 = vector.load %arg7[%c1_49, %c0_50, %c128_51] : memref<2x16x1024xf32, #tpu.memory_space<vmem>>, vector<1x8x768xf32>
      %52 = vector.shape_cast %51 : vector<1x8x768xf32> to vector<8x768xf32>
      %cst_52 = arith.constant 0.000000e+00 : f32
      %53 = vector.broadcast %cst_52 : f32 to vector<8x768xf32>
      %54 = arith.maximumf %52, %53 : vector<8x768xf32>
      %c0_53 = arith.constant 0 : index
      %c0_54 = arith.constant 0 : index
      %55 = vector.load %arg6[%c0_53, %c0_54] : memref<8x768xf32, #tpu.memory_space<vmem>>, vector<8x768xf32>
      tpu.vector_store %arg6[%c0_53, %c0_54], %54 {strides = array<i32>} : memref<8x768xf32, #tpu.memory_space<vmem>>, vector<8x768xf32>,
    } else {
    }
    return
  }
}

</mosaic_0001>

<bundles_post_ra>
// kernel: a_call__.1
= control target key start
LH: loop header
LB: loop body
LE: loop exit
PB: predicated region body
PF: predicated region fallthrough
CT: control target
= control target key end

     0   :  { %v5394_v0 = vmov 0.0   ;;  %s5395_s21 = smov 127   ;;  %s5396_s22 = smov 126   ;;  %v5402_v42 = vmov 0   ;;  %vm193_vm0 = vcmask 1039360   ;;  %vm275_vm1 = vcmask 900096   ;;  %s9857_s0 = inlined_call_operand.vmem [shape: f32[4,1024], index: 0, kind: input, shape index: {}]   ;;  %s9858_s3 = inlined_call_operand.vmem [shape: f32[8,1], index: 3, kind: input, shape index: {}]   ;;  %s9859_s2 = inlined_call_operand.vmem [shape: f32[8,144], index: 2, kind: input, shape index: {}]   ;;  %s9860_s6 = inlined_call_operand.vmem [shape: f32[8,768], index: 6, kind: output, shape index: {}]   ;;  %s9861_s4 = inlined_call_operand.vmem [shape: f32[8,1], index: 4, kind: input, shape index: {}]   ;;  %s9862_s1 = inlined_call_operand.vmem [shape: f32[8,144], index: 1, kind: input, shape index: {}]   ;;  %s9863_s5 = inlined_call_operand.vmem [shape: f32[1,768], index: 5, kind: input, shape index: {}]  }
   0x1   :  { %42 = vst [vmem:[#allocation2 + $0x38] sm:$0xff] %v5394_v0  ;;  %3621 = vrot.lane.b32.xlu1 %v5394_v0, %s5395_s21  ;;  %3611 = vrot.lane.b32.xlu0 %v5394_v0, %s5395_s21  ;;  %v58_v1 = vld [vmem:[%s9857_s0] sm:$0xff]  ;;  %v59_v2 = vld [vmem:[%s9857_s0 + $0x8] sm:$0xff]  ;;  %s5398_s7 = smov 109   ;;  %s5399_s8 = smov 108   ;;  %vm312_vm2 = vcmask 891904  }
   0x2   :  { %43 = vst [vmem:[#allocation2 + $0x58] sm:$0xff] %v5394_v0  ;;  %3631 = vrot.lane.b32.xlu2 %v5394_v0, %s5396_s22  ;;  %v60_v3 = vld [vmem:[%s9857_s0 + $0x10] sm:$0xff]  ;;  %v61_v4 = vld [vmem:[%s9857_s0 + $0x18] sm:$0xff]  ;;  %s5397_s0 = smov 110   ;;  %s5400_s9 = smov 92   ;;  %3885 = vset.pattern.permute.xlu1 %v5402_v42  ;;  %v24_v52 = vld [vmem:[%s9858_s3] sm:$0xff] }
   0x3   :  { %44 = vst [vmem:[#allocation2 + $0x40] sm:$0xff] %v5394_v0  ;;  %s5401_s10 = smov 91   ;;  %4201 = vset.pattern.permute.xlu0 %v5402_v42  ;;  %s5403_s11 = smov 90   ;;  %vm234_vm3 = vcmask 1031168   ;;  %vm353_vm4 = vcmask 883712   ;;  %vm394_vm5 = vcmask 752640  }
   0x4   :  { %45 = vst [vmem:[#allocation2 + $0xc8] sm:$0xff] %v5394_v0  ;;  %s5404_s14 = smov 19   ;;  %vm435_vm6 = vcmask 744448   ;;  %vm476_vm7 = vcmask 736256   ;;  %s5405_s3 = smov 0   ;;  %vm746_vm8 = vcmask 154624  }
   0x5   :  { %46 = vst [vmem:[#allocation2 + $0xe0] sm:$0xff] %v5394_v0  ;;  %130 = sst [smem:[#allocation3]] %s5405_s3  ;;  %vm963_vm9 = vcmask 130048  }
   0x6   :  { %47 = vst [vmem:[#allocation2 + $0x90] sm:$0xff] %v5394_v0  ;;  %132 = sst [smem:[#allocation4]] %s5405_s3 }
   0x7   :  { %48 = vst [vmem:[#allocation2 + $0x70] sm:$0xff] %v5394_v0 }
   0x8   :  { %49 = vst [vmem:[#allocation2 + $0xc0] sm:$0xff] %v5394_v0 }
   0x9   :  { %26 = vst [vmem:[#allocation2 + $0xb0] sm:$0xff] %v5394_v0  ;;  %3626 = vrot.lane.b32.xlu1 %v5394_v0, %s5396_s22  ;;  %3616 = vrot.lane.b32.xlu0 %v5394_v0, %s5395_s21 }
   0xa   :  { %33 = vst [vmem:[#allocation2 + $0x48] sm:$0xff] %v5394_v0 }
   0xb   :  { %34 = vst [vmem:[#allocation2 + $0x80] sm:$0xff] %v5394_v0 }
   0xc   :  { %35 = vst [vmem:[#allocation2 + $0x88] sm:$0xff] %v5394_v0 }
   0xd   :  { %36 = vst [vmem:[#allocation2 + $0xe8] sm:$0xff] %v5394_v0 }
   0xe   :  { %37 = vst [vmem:[#allocation2 + $0xb8] sm:$0xff] %v5394_v0 }
   0xf   :  { %38 = vst [vmem:[#allocation2 + $0x60] sm:$0xff] %v5394_v0 }
  0x10   :  { %39 = vst [vmem:[#allocation2 + $0xf0] sm:$0xff] %v5394_v0 }
  0x11   :  { %40 = vst [vmem:[#allocation2 + $0x8] sm:$0xff] %v5394_v0 }
  0x12   :  { %41 = vst [vmem:[#allocation2 + $0x78] sm:$0xff] %v5394_v0 }
  0x13   :  { %50 = vst [vmem:[#allocation2 + $0xa8] sm:$0xff] %v5394_v0 }
  0x14   :  { %51 = vst [vmem:[#allocation2 + $0xd0] sm:$0xff] %v5394_v0 }
  0x15   :  { %52 = vst [vmem:[#allocation2 + $0x10] sm:$0xff] %v5394_v0 }
  0x16   :  { %53 = vst [vmem:[#allocation2 + $0x28] sm:$0xff] %v5394_v0 }
  0x17   :  { %54 = vst [vmem:[#allocation2 + $0xa0] sm:$0xff] %v5394_v0 }
  0x18   :  { %55 = vst [vmem:[#allocation2 + $0xf8] sm:$0xff] %v5394_v0 }
  0x19   :  { %56 = vst [vmem:[#allocation2 + $0x20] sm:$0xff] %v5394_v0 }
  0x1a   :  { %57 = vst [vmem:[#allocation2 + $0x98] sm:$0xff] %v5394_v0 }
  0x1b   :  { %66 = vst [vmem:[#allocation1] ss:$2 sm:$0xff] %v58_v1 }
  0x1c   :  { %68 = vst [vmem:[#allocation1 + $0x10] ss:$2 sm:$0xff] %v59_v2 }
  0x1d   :  { %70 = vst [vmem:[#allocation1 + $0x20] ss:$2 sm:$0xff] %v60_v3 }
  0x1e   :  { %72 = vst [vmem:[#allocation1 + $0x30] ss:$2 sm:$0xff] %v61_v4 }
  0x22   :  { %v74_v5 = vld.sshfl [vmem:[#allocation1 + $0x8] sm:$0xff pattern:$0x75316420]  ;;  %v73_v6 = vld.sshfl [vmem:[#allocation1] sm:$0xff pattern:$0x75316420] }
  0x23   :  { %v75_v7 = vld.sshfl [vmem:[#allocation1 + $0x10] sm:$0xff pattern:$0x75316420]  ;;  %90 = vst [vmem:[#allocation2 + $0x88] sm:$0xf] %v74_v5 }
  0x24   :  { %91 = vst [vmem:[#allocation2 + $0xe8] sm:$0xf] %v75_v7  ;;  %v78_v8 = vld.sshfl [vmem:[#allocation1 + $0x28] sm:$0xff pattern:$0x75316420] }
  0x25   :  { %v79_v9 = vld.sshfl [vmem:[#allocation1 + $0x30] sm:$0xff pattern:$0x75316420]  ;;  %94 = vst [vmem:[#allocation2 + $0xf0] sm:$0xf] %v78_v8 }
  0x26   :  { %95 = vst [vmem:[#allocation2 + $0x8] sm:$0xf] %v79_v9  ;;  %v76_v10 = vld.sshfl [vmem:[#allocation1 + $0x18] sm:$0xff pattern:$0x75316420] }
  0x27   :  { %89 = vst [vmem:[#allocation2 + $0x80] sm:$0xf] %v73_v6  ;;  %v77_v11 = vld.sshfl [vmem:[#allocation1 + $0x20] sm:$0xff pattern:$0x75316420] }
  0x28   :  { %97 = vst [vmem:[#allocation1] ss:$2 sm:$0xff] %v58_v1  ;;  %v80_v29 = vld.sshfl [vmem:[#allocation1 + $0x38] sm:$0xff pattern:$0x75316420] }
  0x29   :  { %92 = vst [vmem:[#allocation2 + $0xb8] sm:$0xf] %v76_v10 }
  0x2a   :  { %v143_v12 = vld [vmem:[#allocation2 + $0x88] sm:$0xff]  ;;  %93 = vst [vmem:[#allocation2 + $0x60] sm:$0xf] %v77_v11 }
  0x2b   :  { %v144_v13 = vld [vmem:[#allocation2 + $0xe8] sm:$0xff]  ;;  %101 = vst [vmem:[#allocation1 + $0x20] ss:$2 sm:$0xff] %v60_v3  ;;  %v3760_v32 = vpack.i.bf16 %v143_v12, %v5394_v0 }
  0x2c   :  { %v5511_v14 = vpack.i.bf16 %v144_v13, %v143_v12  ;;  %v147_v15 = vld [vmem:[#allocation2 + $0xf0] sm:$0xff]  ;;  %99 = vst [vmem:[#allocation1 + $0x10] ss:$2 sm:$0xff] %v59_v2 }
  0x2d   :  { %v148_v16 = vld [vmem:[#allocation2 + $0x8] sm:$0xff]  ;;  %96 = vst [vmem:[#allocation2 + $0x78] sm:$0xf] %v80_v29 }
  0x2e   :  { %3641 = vrot.lane.b32.xlu2 %v5511_v14, %s5395_s21  ;;  %v5515_v17 = vpack.i.bf16 %v148_v16, %v147_v15  ;;  %v142_v18 = vld [vmem:[#allocation2 + $0x80] sm:$0xff]  ;;  %103 = vst [vmem:[#allocation1 + $0x30] ss:$2 sm:$0xff] %v61_v4 }
  0x2f   :  { %v104_v19 = vld.sshfl [vmem:[#allocation1] sm:$0xff pattern:$0x75316420]  ;;  %v105_v20 = vld.sshfl [vmem:[#allocation1 + $0x8] sm:$0xff pattern:$0x75316420]  ;;  %v5518_v21 = vpack.i.bf16 %v142_v18, %v5394_v0 }
  0x30   :  { %3651 = vrot.lane.b32.xlu0 %v5515_v17, %s5395_s21  ;;  %121 = vst [vmem:[#allocation2 + $0xa8] sm:$0xf] %v104_v19  ;;  %v145_v22 = vld [vmem:[#allocation2 + $0xb8] sm:$0xff] }
  0x31   :  { %122 = vst [vmem:[#allocation2 + $0xd0] sm:$0xf] %v105_v20  ;;  %3636 = vrot.lane.b32.xlu1 %v5518_v21, %s5395_s21  ;;  %v146_v23 = vld [vmem:[#allocation2 + $0x60] sm:$0xff]  ;;  %v3765_v33 = vpack.i.bf16 %v145_v22, %v144_v13 }
  0x32   :  { %v108_v24 = vld.sshfl [vmem:[#allocation1 + $0x20] sm:$0xff pattern:$0x75316420]  ;;  %v109_v25 = vld.sshfl [vmem:[#allocation1 + $0x28] sm:$0xff pattern:$0x75316420]  ;;  %v5524_v26 = vpack.i.bf16 %v146_v23, %v145_v22  ;;  %v3770_v35 = vpack.i.bf16 %v147_v15, %v146_v23 }
  0x33   :  { %125 = vst [vmem:[#allocation2 + $0xa0] sm:$0xf] %v108_v24  ;;  %v106_v27 = vld.sshfl [vmem:[#allocation1 + $0x10] sm:$0xff pattern:$0x75316420] }
  0x34   :  { %126 = vst [vmem:[#allocation2 + $0xf8] sm:$0xf] %v109_v25  ;;  %v107_v28 = vld.sshfl [vmem:[#allocation1 + $0x18] sm:$0xff pattern:$0x75316420]  ;;  %v150_v34 = vld [vmem:[#allocation2 + $0x78] sm:$0xff] }
  0x35   :  { %123 = vst [vmem:[#allocation2 + $0x10] sm:$0xf] %v106_v27  ;;  %v110_v30 = vld.sshfl [vmem:[#allocation1 + $0x30] sm:$0xff pattern:$0x75316420]  ;;  %v3775_v36 = vpack.i.bf16 %v150_v34, %v148_v16 }
  0x36   :  { %124 = vst [vmem:[#allocation2 + $0x28] sm:$0xf] %v107_v28  ;;  %3646 = vrot.lane.b32.xlu2 %v5524_v26, %s5395_s21  ;;  %v111_v31 = vld.sshfl [vmem:[#allocation1 + $0x38] sm:$0xff pattern:$0x75316420] }
  0x37   :  { %127 = vst [vmem:[#allocation2 + $0x20] sm:$0xf] %v110_v30 }
  0x38   :  { %3656 = vrot.lane.b32.xlu0 %v5394_v0, %s5396_s22  ;;  %128 = vst [vmem:[#allocation2 + $0x98] sm:$0xf] %v111_v31 }
  0x39   :  { %3661 = vrot.lane.b32.xlu1 %v5518_v21, %s5396_s22 }
  0x3e   :  { %3666 = vrot.lane.b32.xlu2 %v5511_v14, %s5396_s22 }
  0x40   :  { %3671 = vrot.lane.b32.xlu0 %v5524_v26, %s5396_s22 }
  0x41   :  { %3676 = vrot.lane.b32.xlu1 %v5515_v17, %s5396_s22 }
  0x46   :  { %3681 = vrot.lane.b32.xlu2 %v5394_v0, %s5397_s0 }
  0x48   :  { %3686 = vrot.lane.b32.xlu0 %v5394_v0, %s5397_s0 }
  0x49   :  { %3691 = vrot.lane.b32.xlu1 %v5394_v0, %s5397_s0 }
  0x4e   :  { %3696 = vrot.lane.b32.xlu2 %v5518_v21, %s5397_s0 }
  0x50   :  { %3701 = vrot.lane.b32.xlu0 %v5511_v14, %s5397_s0 }
  0x51   :  { %3706 = vrot.lane.b32.xlu1 %v5524_v26, %s5397_s0 }
  0x56   :  { %3711 = vrot.lane.b32.xlu2 %v5515_v17, %s5397_s0 }
  0x58   :  { %3716 = vrot.lane.b32.xlu0 %v5394_v0, %s5398_s7 }
  0x59   :  { %3721 = vrot.lane.b32.xlu1 %v5394_v0, %s5398_s7 }
  0x5c   :  { %v5557_v37 = vpop.permute.xlu2 %3631 }
  0x5e   :  { %3726 = vrot.lane.b32.xlu2 %v5394_v0, %s5398_s7 }
  0x60   :  { %3731 = vrot.lane.b32.xlu0 %v5511_v14, %s5398_s7 }
  0x61   :  { %3736 = vrot.lane.b32.xlu1 %v5524_v26, %s5398_s7 }
  0x66   :  { %3741 = vrot.lane.b32.xlu2 %v5515_v17, %s5398_s7 }
  0x68   :  { %3746 = vrot.lane.b32.xlu0 %v5394_v0, %s5399_s8 }
  0x69   :  { %3751 = vrot.lane.b32.xlu1 %v5394_v0, %s5399_s8 }
  0x6e   :  { %3756 = vrot.lane.b32.xlu2 %v5394_v0, %s5399_s8 }
  0x70   :  { %3761 = vrot.lane.b32.xlu0 %v3760_v32, %s5399_s8 }
  0x71   :  { %3766 = vrot.lane.b32.xlu1 %v3765_v33, %s5399_s8 }
  0x73   :  { %v5563_v39 = vpop.permute.xlu0 %3611  ;;  %v5565_v40 = vpop.permute.xlu1 %3621 }
  0x74   :  { %v3614_v1 = vunpack.i.h.bf16 %v5563_v39  ;;  %v3613_v2 = vunpack.i.l.bf16 %v5563_v39  ;;  %v3624_v13 = vunpack.i.h.bf16 %v5565_v40 }
  0x76   :  { %3771 = vrot.lane.b32.xlu2 %v3770_v35, %s5399_s8  ;;  %v194_v12 = vsel %vm193_vm0, %v3613_v2, %v3614_v1  ;;  %v3633_v2 = vunpack.i.l.bf16 %v5557_v37 }
  0x78   :  { %3776 = vrot.lane.b32.xlu0 %v3775_v36, %s5399_s8 }
  0x79   :  { %3781 = vrot.lane.b32.xlu1 %v5394_v0, %s5400_s9 }
  0x7b   :  { %v3617_v44 = vpop.permute.xlu0 %3616  ;;  %v5573_v45 = vpop.permute.xlu1 %3626 }
  0x7c   :  { %v3618_v62 = vunpack.i.l.bf16 %v3617_v44  ;;  %v3619_v63 = vunpack.i.h.bf16 %v3617_v44 }
  0x7e   :  { %3786 = vrot.lane.b32.xlu2 %v5394_v0, %s5400_s9  ;;  %v195_v6 = vsel %vm193_vm0, %v3614_v1, %v3618_v62  ;;  %v196_v8 = vsel %vm193_vm0, %v3618_v62, %v3619_v63  ;;  %v3628_v62 = vunpack.i.l.bf16 %v5573_v45 }
  0x80   :  { %3791 = vrot.lane.b32.xlu0 %v5394_v0, %s5400_s9 }
  0x81   :  { %3796 = vrot.lane.b32.xlu1 %v3760_v32, %s5400_s9 }
  0x86   :  { %3801 = vrot.lane.b32.xlu2 %v3765_v33, %s5400_s9 }
  0x88   :  { %v5560_v38 = vpop.permute.xlu2 %3641  ;;  %3806 = vrot.lane.b32.xlu0 %v3770_v35, %s5400_s9 }
  0x89   :  { %3811 = vrot.lane.b32.xlu1 %v3775_v36, %s5400_s9  ;;  %v3643_v20 = vunpack.i.l.bf16 %v5560_v38  ;;  %v3644_v23 = vunpack.i.h.bf16 %v5560_v38 }
  0x8b   :  { %v201_v38 = vsel %vm193_vm0, %v3643_v20, %v3644_v23 }
  0x8e   :  { %3816 = vrot.lane.b32.xlu2 %v5394_v0, %s5401_s10 }
  0x90   :  { %v5567_v41 = vpop.permute.xlu2 %3646  ;;  %3821 = vrot.lane.b32.xlu0 %v5394_v0, %s5401_s10 }
  0x91   :  { %3826 = vrot.lane.b32.xlu1 %v5394_v0, %s5401_s10  ;;  %v3648_v25 = vunpack.i.l.bf16 %v5567_v41 }
  0x93   :  { %v202_v39 = vsel %vm193_vm0, %v3644_v23, %v3648_v25  ;;  %v3634_v23 = vunpack.i.h.bf16 %v5557_v37 }
  0x96   :  { %3831 = vrot.lane.b32.xlu2 %v3760_v32, %s5401_s10 }
  0x98   :  { %v5571_v43 = vpop.permute.xlu2 %3666  ;;  %3836 = vrot.lane.b32.xlu0 %v3765_v33, %s5401_s10 }
  0x99   :  { %3841 = vrot.lane.b32.xlu1 %v3770_v35, %s5401_s10 }
  0x9e   :  { %3846 = vrot.lane.b32.xlu2 %v3775_v36, %s5401_s10 }
  0xa0   :  { %v5575_v46 = vpop.permute.xlu2 %3681  ;;  %3851 = vrot.lane.b32.xlu0 %v5394_v0, %s5403_s11 }
  0xa1   :  { %3856 = vrot.lane.b32.xlu1 %v5394_v0, %s5403_s11 }
  0xa2   :  { %v5579_v47 = vpop.permute.xlu0 %3651 }
  0xa3   :  { %v5581_v48 = vpop.permute.xlu1 %3636  ;;  %v3654_v42 = vunpack.i.h.bf16 %v5579_v47  ;;  %v3653_v44 = vunpack.i.l.bf16 %v5579_v47  ;;  %v3629_v47 = vunpack.i.h.bf16 %v5573_v45 }
  0xa4   :  { %v3638_v10 = vunpack.i.l.bf16 %v5581_v48 }
  0xa6   :  { %3861 = vrot.lane.b32.xlu2 %v5394_v0, %s5403_s11 }
  0xa8   :  { %v5584_v49 = vpop.permute.xlu2 %3696  ;;  %3866 = vrot.lane.b32.xlu0 %v3760_v32, %s5403_s11 }
  0xa9   :  { %3871 = vrot.lane.b32.xlu1 %v3765_v33, %s5403_s11 }
  0xaa   :  { %v5586_v50 = vpop.permute.xlu0 %3656 }
  0xab   :  { %v5588_v51 = vpop.permute.xlu1 %3661 }
  0xae   :  { %3876 = vrot.lane.b32.xlu2 %v3770_v35, %s5403_s11 }
  0xb0   :  { %v3712_v53 = vpop.permute.xlu2 %3711  ;;  %3881 = vrot.lane.b32.xlu0 %v3775_v36, %s5403_s11 }
  0xb1   :  { %491 = vperm.xlu1 %3885, %v24_v52   ;;  %v3714_v57 = vunpack.i.h.bf16 %v3712_v53  ;;  %v3713_v4 = vunpack.i.l.bf16 %v3712_v53 }
  0xb2   :  { %v5593_v54 = vpop.permute.xlu0 %3671 }
  0xb3   :  { %v5595_v55 = vpop.permute.xlu1 %3676  ;;  %v5646_v22 = vsel %vm275_vm1, %v3713_v4, %v3714_v57 }
  0xb4   :  { %10157 = vst [vmem:[#allocation6_spill] sm:$0xff] %v5646_v22 }
  0xb6   :  { %3887 = vrot.lane.b32.xlu2 %v5394_v0, %s5404_s14 }
  0xb8   :  { %v5599_v56 = vpop.permute.xlu2 %3726  ;;  %3892 = vrot.lane.b32.xlu0 %v5394_v0, %s5404_s14 }
  0xb9   :  { %v3729_v58 = vunpack.i.h.bf16 %v5599_v56  ;;  %3897 = vrot.lane.b32.xlu1 %v5394_v0, %s5404_s14  ;;  %v3623_v0 = vunpack.i.l.bf16 %v5565_v40  ;;  %v3649_v40 = vunpack.i.h.bf16 %v5567_v41 }
  0xba   :  { %v5606_v59 = vpop.permute.xlu0 %3686 }
  0xbb   :  { %v5610_v60 = vpack.i.bf16 %v3714_v57, %v3729_v58  ;;  %v5612_v61 = vpop.permute.xlu1 %3691  ;;  %v197_v9 = vsel %vm193_vm0, %v3619_v63, %v3623_v0  ;;  %v198_v27 = vsel %vm193_vm0, %v3623_v0, %v3624_v13  ;;  %v3941_v63 = vpack.i.bf16 %v202_v39, %v201_v38 }
  0xbc   :  { %v3926_v18 = vpack.i.bf16 %v197_v9, %v196_v8  ;;  %v205_v8 = vsel %vm193_vm0, %v3653_v44, %v3654_v42 }
  0xbd   :  { %10156 = vst [vmem:[#allocation5_spill] sm:$0xff] %v5610_v60 }
  0xbe   :  { %3902 = vrot.lane.b32.xlu2 %v5518_v21, %s5404_s14  ;;  %v3639_v21 = vunpack.i.h.bf16 %v5581_v48 }
  0xc0   :  { %v5618_v3 = vpop.permute.xlu2 %3741  ;;  %3907 = vrot.lane.b32.xlu0 %v5511_v14, %s5404_s14  ;;  %v3921_v14 = vpack.i.bf16 %v195_v6, %v194_v12  ;;  %v200_v30 = vsel %vm193_vm0, %v3639_v21, %v3643_v20  ;;  %v204_v6 = vsel %vm193_vm0, %v3649_v40, %v3653_v44  ;;  %v236_v21 = vsel %vm234_vm3, %v3629_v47, %v3633_v2 }
  0xc1   :  { %3912 = vrot.lane.b32.xlu1 %v5524_v26, %s5404_s14  ;;  %v9874_v15 = vunpack.i.h.bf16 %v5618_v3  ;;  %v3743_v16 = vunpack.i.l.bf16 %v5618_v3  ;;  %v3728_v26 = vunpack.i.l.bf16 %v5599_v56  ;;  %v3936_v52 = vpack.i.bf16 %v200_v30, %v3638_v10 }
  0xc2   :  { %v5625_v5 = vpop.permute.xlu0 %3701  ;;  %v10165_v60 = vunpack.i.h.bf16 %v5618_v3 }
  0xc3   :  { %v5628_v7 = vpop.permute.xlu1 %3706  ;;  %v322_v29 = vsel %vm312_vm2, %v3743_v16, %v9874_v15 }
  0xc4   :  { %v9873_v11 = vunpack.i.h.bf16 %v5628_v7 }
  0xc6   :  { %3917 = vrot.lane.b32.xlu2 %v5515_v17, %s5404_s14  ;;  %v286_v19 = vsel %vm275_vm1, %v9873_v11, %v3713_v4  ;;  %v199_v17 = vsel %vm193_vm0, %v3624_v13, %v3638_v10  ;;  %v203_v4 = vsel %vm193_vm0, %v3648_v25, %v3649_v40  ;;  %v235_v13 = vsel %vm234_vm3, %v3628_v62, %v3629_v47 }
  0xc7   :  { %v3931_v31 = vpack.i.bf16 %v199_v17, %v198_v27  ;;  %v3951_v17 = vpack.i.bf16 %v3654_v42, %v205_v8  ;;  %v3658_v25 = vunpack.i.l.bf16 %v5586_v50  ;;  %v3669_v8 = vunpack.i.h.bf16 %v5571_v43 }
  0xc8   :  { %v5649_v24 = vpop.permute.xlu2 %3756  ;;  %3922 = vrot.lane.b32.xlu0 %v3921_v14, %s5404_s14  ;;  %v3946_v14 = vpack.i.bf16 %v204_v6, %v203_v4 }
  0xc9   :  { %3927 = vrot.lane.b32.xlu1 %v3926_v18, %s5404_s14  ;;  %v238_v39 = vsel %vm234_vm3, %v3634_v23, %v3658_v25  ;;  %v3758_v40 = vunpack.i.l.bf16 %v5649_v24 }
  0xca   :  { %v5657_v28 = vpop.permute.xlu0 %3716 }
  0xcb   :  { %v3719_v32 = vunpack.i.h.bf16 %v5657_v28  ;;  %v3718_v33 = vunpack.i.l.bf16 %v5657_v28  ;;  %v3722_v34 = vpop.permute.xlu1 %3721 }
  0xcc   :  { %v3724_v35 = vunpack.i.h.bf16 %v3722_v34  ;;  %v3723_v36 = vunpack.i.l.bf16 %v3722_v34  ;;  %v3663_v34 = vunpack.i.l.bf16 %v5588_v51 }
  0xcd   :  { %v5674_v48 = vpack.i.bf16 %v322_v29, %v3718_v33  ;;  %v3659_v29 = vunpack.i.h.bf16 %v5586_v50 }
  0xce   :  { %3932 = vrot.lane.b32.xlu2 %v3931_v31, %s5404_s14  ;;  %v316_v53 = vsel %vm312_vm2, %v3724_v35, %v3728_v26  ;;  %v5683_v57 = vsel %vm312_vm2, %v3719_v32, %v3723_v36  ;;  %v5686_v41 = vsel %vm312_vm2, %v3723_v36, %v3724_v35  ;;  %v3668_v35 = vunpack.i.l.bf16 %v5571_v43 }
  0xcf   :  { %10158 = vst [vmem:[#allocation7_spill] sm:$0xff] %v5674_v48  ;;  %v3664_v36 = vunpack.i.h.bf16 %v5588_v51  ;;  %v239_v44 = vsel %vm234_vm3, %v3658_v25, %v3659_v29  ;;  %v240_v62 = vsel %vm234_vm3, %v3659_v29, %v3663_v34  ;;  %v3679_v25 = vunpack.i.h.bf16 %v5595_v55 }
  0xd0   :  { %v5693_v0 = vpop.permute.xlu2 %3771  ;;  %3937 = vrot.lane.b32.xlu0 %v3936_v52, %s5404_s14 }
  0xd1   :  { %3942 = vrot.lane.b32.xlu1 %v3941_v63, %s5404_s14  ;;  %v241_v63 = vsel %vm234_vm3, %v3664_v36, %v3668_v35  ;;  %v242_v36 = vsel %vm234_vm3, %v3668_v35, %v3669_v8  ;;  %v3683_v35 = vunpack.i.l.bf16 %v5575_v46 }
  0xd2   :  { %v5700_v45 = vpop.permute.xlu0 %3731 }
  0xd3   :  { %v3734_v9 = vunpack.i.h.bf16 %v5700_v45  ;;  %v3733_v10 = vunpack.i.l.bf16 %v5700_v45  ;;  %v3737_v12 = vpop.permute.xlu1 %3736 }
  0xd4   :  { %v3739_v18 = vunpack.i.h.bf16 %v3737_v12  ;;  %v3738_v20 = vunpack.i.l.bf16 %v3737_v12  ;;  %v3673_v12 = vunpack.i.l.bf16 %v5593_v54 }
  0xd5   :  { %v5710_v27 = vpack.i.bf16 %v3733_v10, %v286_v19  ;;  %v3956_v19 = vpack.i.bf16 %v236_v21, %v235_v13  ;;  %v3971_v21 = vpack.i.bf16 %v241_v63, %v3663_v34 }
  0xd6   :  { %3947 = vrot.lane.b32.xlu2 %v3946_v14, %s5404_s14  ;;  %v321_v30 = vsel %vm312_vm2, %v3739_v18, %v3743_v16  ;;  %v5720_v31 = vsel %vm312_vm2, %v3734_v9, %v3738_v20  ;;  %v5723_v37 = vsel %vm312_vm2, %v3738_v20, %v3739_v18  ;;  %v237_v16 = vsel %vm234_vm3, %v3633_v2, %v3634_v23 }
  0xd7   :  { %10159 = vst [vmem:[#allocation8_spill] sm:$0xff] %v5710_v27  ;;  %v3961_v4 = vpack.i.bf16 %v238_v39, %v237_v16  ;;  %v3966_v14 = vpack.i.bf16 %v240_v62, %v239_v44  ;;  %v3678_v23 = vunpack.i.l.bf16 %v5595_v55  ;;  %v243_v34 = vsel %vm234_vm3, %v3669_v8, %v3673_v12 }
  0xd8   :  { %v5730_v38 = vpop.permute.xlu2 %3786  ;;  %3952 = vrot.lane.b32.xlu0 %v3951_v17, %s5404_s14  ;;  %v3684_v62 = vunpack.i.h.bf16 %v5575_v46 }
  0xd9   :  { %3957 = vrot.lane.b32.xlu1 %v3956_v19, %s5404_s14  ;;  %v3759_v19 = vunpack.i.h.bf16 %v5649_v24  ;;  %v246_v63 = vsel %vm234_vm3, %v3678_v23, %v3679_v25 }
  0xda   :  { %v5737_v42 = vpop.permute.xlu0 %3746 }
  0xdb   :  { %v9866_v52 = vunpack.i.h.bf16 %v5737_v42  ;;  %v9865_v51 = vunpack.i.l.bf16 %v5737_v42  ;;  %v3752_v47 = vpop.permute.xlu1 %3751 }
  0xdc   :  { %v3754_v2 = vunpack.i.h.bf16 %v3752_v47  ;;  %v3753_v6 = vunpack.i.l.bf16 %v3752_v47 }
  0xdd   :  { %v5748_v13 = vpack.i.bf16 %v9865_v51, %v316_v53  ;;  %v3674_v53 = vunpack.i.h.bf16 %v5593_v54 }
  0xde   :  { %3962 = vrot.lane.b32.xlu2 %v3961_v4, %s5404_s14  ;;  %v5754_v18 = vsel %vm353_vm4, %v3754_v2, %v3758_v40  ;;  %v5759_v20 = vsel %vm353_vm4, %v9866_v52, %v3753_v6  ;;  %v5762_v43 = vsel %vm353_vm4, %v3753_v6, %v3754_v2  ;;  %v3976_v4 = vpack.i.bf16 %v243_v34, %v242_v36 }
  0xdf   :  { %v244_v47 = vsel %vm234_vm3, %v3673_v12, %v3674_v53  ;;  %v245_v55 = vsel %vm234_vm3, %v3674_v53, %v3678_v23  ;;  %v3688_v6 = vunpack.i.l.bf16 %v5606_v59  ;;  %v3689_v12 = vunpack.i.h.bf16 %v5606_v59 }
  0xe0   :  { %v5769_v29 = vpop.permute.xlu2 %3801  ;;  %3967 = vrot.lane.b32.xlu0 %v3966_v14, %s5404_s14  ;;  %v3693_v23 = vunpack.i.l.bf16 %v5612_v61  ;;  %v3698_v36 = vunpack.i.l.bf16 %v5584_v49  ;;  %v3694_v34 = vunpack.i.h.bf16 %v5612_v61  ;;  %v9864_v59 = vunpack.i.h.bf16 %v5693_v0 }
  0xe1   :  { %3972 = vrot.lane.b32.xlu1 %v3971_v21, %s5404_s14  ;;  %v3981_v21 = vpack.i.bf16 %v245_v55, %v244_v47 }
  0xe2   :  { %v3762_v54 = vpop.permute.xlu0 %3761  ;;  %v279_v61 = vsel %vm275_vm1, %v3689_v12, %v3693_v23 }
  0xe3   :  { %v3764_v16 = vunpack.i.h.bf16 %v3762_v54  ;;  %v3763_v39 = vunpack.i.l.bf16 %v3762_v54  ;;  %v5776_v44 = vpop.permute.xlu1 %3766 }
  0xe4   :  { %v9871_v2 = vunpack.i.l.bf16 %v5776_v44 }
  0xe5   :  { %v5785_v8 = vpack.i.bf16 %v3764_v16, %v321_v30  ;;  %v5790_v14 = vsel %vm353_vm4, %v3759_v19, %v3763_v39  ;;  %v3986_v30 = vpack.i.bf16 %v3679_v25, %v246_v63  ;;  %v277_v39 = vsel %vm275_vm1, %v3684_v62, %v3688_v6 }
  0xe6   :  { %10160 = vst [vmem:[#allocation9_spill] sm:$0xff] %v5790_v14  ;;  %3977 = vrot.lane.b32.xlu2 %v3976_v4, %s5404_s14  ;;  %v5797_v53 = vsel %vm353_vm4, %v3764_v16, %v9871_v2  ;;  %v276_v16 = vsel %vm275_vm1, %v3683_v35, %v3684_v62  ;;  %v278_v25 = vsel %vm275_vm1, %v3688_v6, %v3689_v12  ;;  %v3699_v6 = vunpack.i.h.bf16 %v5584_v49 }
  0xe7   :  { %v280_v35 = vsel %vm275_vm1, %v3693_v23, %v3694_v34  ;;  %v281_v62 = vsel %vm275_vm1, %v3694_v34, %v3698_v36  ;;  %v3996_v56 = vpack.i.bf16 %v279_v61, %v278_v25  ;;  %v9872_v49 = vunpack.i.l.bf16 %v5628_v7 }
  0xe8   :  { %v5804_v54 = vpop.permute.xlu2 %3816  ;;  %3982 = vrot.lane.b32.xlu0 %v3981_v21, %s5404_s14  ;;  %v5820_v21 = vsel %vm312_vm2, %v3728_v26, %v3729_v58  ;;  %v3704_v26 = vunpack.i.h.bf16 %v5625_v5  ;;  %v4001_v23 = vpack.i.bf16 %v281_v62, %v280_v35 }
  0xe9   :  { %3987 = vrot.lane.b32.xlu1 %v3986_v30, %s5404_s14  ;;  %v3991_v30 = vpack.i.bf16 %v277_v39, %v276_v16 }
  0xea   :  { %v3777_v47 = vpop.permute.xlu0 %3776 }
  0xeb   :  { %v3779_v55 = vunpack.i.h.bf16 %v3777_v47  ;;  %v3778_v63 = vunpack.i.l.bf16 %v3777_v47  ;;  %v5812_v4 = vpop.permute.xlu1 %3781  ;;  %v3703_v47 = vunpack.i.l.bf16 %v5625_v5  ;;  %v284_v5 = vsel %vm275_vm1, %v3704_v26, %v9872_v49 }
  0xed   :  { %v5827_v46 = vsel %vm353_vm4, %v3778_v63, %v3779_v55  ;;  %v5832_v12 = vsel %vm353_vm4, %v9864_v59, %v3778_v63  ;;  %v282_v16 = vsel %vm275_vm1, %v3699_v6, %v3703_v47  ;;  %v283_v63 = vsel %vm275_vm1, %v3703_v47, %v3704_v26 }
  0xee   :  { %10161 = vst [vmem:[#allocation10_spill] sm:$0xff] %v5832_v12  ;;  %3992 = vrot.lane.b32.xlu2 %v3991_v30, %s5404_s14  ;;  %v4006_v61 = vpack.i.bf16 %v282_v16, %v3698_v36  ;;  %v4011_v35 = vpack.i.bf16 %v284_v5, %v283_v63 }
  0xf0   :  { %v5839_v34 = vpop.permute.xlu2 %3831  ;;  %3997 = vrot.lane.b32.xlu0 %v3996_v56, %s5404_s14 }
  0xf1   :  { %4002 = vrot.lane.b32.xlu1 %v4001_v23, %s5404_s14 }
  0xf2   :  { %v5844_v39 = vpop.permute.xlu0 %3791 }
  0xf3   :  { %v3794_v25 = vunpack.i.h.bf16 %v5844_v39  ;;  %v5847_v55 = vpop.permute.xlu1 %3796  ;;  %v9868_v6 = vunpack.i.l.bf16 %v5844_v39 }
  0xf4   :  { %v3798_v30 = vunpack.i.l.bf16 %v5847_v55 }
  0xf5   :  { %v5870_v63 = vsel %vm394_vm5, %v9868_v6, %v3794_v25 }
  0xf6   :  { %4007 = vrot.lane.b32.xlu2 %v4006_v61, %s5404_s14  ;;  %v5856_v62 = vsel %vm394_vm5, %v3794_v25, %v3798_v30  ;;  %v5891_v25 = vsel %vm312_vm2, %v3718_v33, %v3719_v32  ;;  %v3833_v33 = vunpack.i.l.bf16 %v5839_v34 }
  0xf8   :  { %v5859_v56 = vpop.permute.xlu2 %3846  ;;  %4012 = vrot.lane.b32.xlu0 %v4011_v35, %s5404_s14  ;;  %v5882_v35 = vsel %vm353_vm4, %v3758_v40, %v3759_v19  ;;  %v5924_v40 = vsel %vm312_vm2, %v3733_v10, %v3734_v9 }
  0xf9   :  { %v3849_v47 = vunpack.i.h.bf16 %v5859_v56  ;;  %v9867_v36 = vunpack.i.l.bf16 %v5859_v56 }
  0xfa   :  { %v5864_v26 = vpop.permute.xlu0 %3806 }
  0xfb   :  { %v9869_v23 = vunpack.i.h.bf16 %v5864_v26  ;;  %v3812_v16 = vpop.permute.xlu1 %3811  ;;  %v5875_v5 = vsel %vm435_vm6, %v9867_v36, %v3849_v47 }
  0xfc   :  { %v3814_v61 = vunpack.i.h.bf16 %v3812_v16  ;;  %v3813_v30 = vunpack.i.l.bf16 %v3812_v16 }
  0xfe   :  { %v5896_v47 = vsel %vm394_vm5, %v9869_v23, %v3813_v30  ;;  %v5899_v24 = vsel %vm394_vm5, %v3813_v30, %v3814_v61 }
 0x100   :  { %v5905_v16 = vpop.permute.xlu2 %3861 }
 0x101   :  { %v3864_v28 = vunpack.i.h.bf16 %v5905_v16  ;;  %v3863_v32 = vunpack.i.l.bf16 %v5905_v16 }
 0x102   :  { %v5910_v58 = vpop.permute.xlu0 %3821 }
 0x103   :  { %v5912_v59 = vpop.permute.xlu1 %3826  ;;  %v5915_v61 = vsel %vm476_vm7, %v3863_v32, %v3864_v28  ;;  %v9877_v52 = vunpack.i.h.bf16 %v5910_v58 }
 0x104   :  { %10162 = vst [vmem:[#allocation11_spill] sm:$0xff] %v5915_v61  ;;  %v3829_v30 = vunpack.i.h.bf16 %v5912_v59  ;;  %v9870_v19 = vunpack.i.l.bf16 %v5912_v59 }
 0x106   :  { %v5929_v16 = vsel %vm435_vm6, %v9870_v19, %v3829_v30  ;;  %v5932_v1 = vsel %vm435_vm6, %v3829_v30, %v3833_v33  ;;  %v3823_v19 = vunpack.i.l.bf16 %v5910_v58 }
 0x107   :  { %10163 = vst [vmem:[#allocation12_spill] sm:$0xff] %v5932_v1  ;;  %v3819_v1 = vunpack.i.h.bf16 %v5804_v54 }
 0x108   :  { %v5938_v36 = vpop.permute.xlu2 %3876 }
 0x10a   :  { %v3837_v45 = vpop.permute.xlu0 %3836 }
 0x10b   :  { %v3839_v6 = vunpack.i.h.bf16 %v3837_v45  ;;  %v3838_v9 = vunpack.i.l.bf16 %v3837_v45  ;;  %v5940_v10 = vpop.permute.xlu1 %3841 }
 0x10c   :  { %v3843_v50 = vunpack.i.l.bf16 %v5940_v10  ;;  %v9876_v17 = vunpack.i.h.bf16 %v5940_v10 }
 0x10d   :  { %v443_v23 = vsel %vm435_vm6, %v3838_v9, %v3839_v6 }
 0x10e   :  { %v444_v33 = vsel %vm435_vm6, %v3839_v6, %v3843_v50  ;;  %v445_v15 = vsel %vm435_vm6, %v3843_v50, %v9876_v17  ;;  %v438_v6 = vsel %vm435_vm6, %v3823_v19, %v9877_v52  ;;  %v3784_v50 = vunpack.i.h.bf16 %v5812_v4 }
 0x10f   :  { %v4026_v30 = vpack.i.bf16 %v444_v33, %v443_v23  ;;  %v3834_v17 = vunpack.i.h.bf16 %v5839_v34  ;;  %v10186_v34 = vunpack.i.l.bf16 %v5844_v39 }
 0x110   :  { %v5946_v51 = vpop.permute.xlu2 %3887 }
 0x111   :  { %4027 = vrot.lane.b32.xlu0 %v4026_v30, %s5404_s14  ;;  %v4041_v30 = vpack.i.bf16 %v445_v15, %v438_v6  ;;  %v3878_v15 = vunpack.i.l.bf16 %v5938_v36 }
 0x112   :  { %v3852_v45 = vpop.permute.xlu0 %3851 }
 0x113   :  { %v3857_v2 = vpop.permute.xlu1 %3856  ;;  %v3853_v48 = vunpack.i.l.bf16 %v3852_v45 }
 0x114   :  { %v3859_v49 = vunpack.i.h.bf16 %v3857_v2  ;;  %v3858_v11 = vunpack.i.l.bf16 %v3857_v2  ;;  %v10168_v2 = vunpack.i.l.bf16 %v5628_v7 }
 0x116   :  { %v479_v23 = vsel %vm476_vm7, %v3858_v11, %v3859_v49  ;;  %v5959_v33 = vsel %vm476_vm7, %v3859_v49, %v3863_v32  ;;  %v10169_v49 = vunpack.i.l.bf16 %v5812_v4 }
 0x117   :  { %10164 = vst [vmem:[#allocation13_spill] sm:$0xff] %v5959_v33  ;;  %v5963_v22 = vpack.i.bf16 %v10165_v60, %v479_v23  ;;  %v10167_v23 = vunpack.i.h.bf16 %v5628_v7 }
 0x118   :  { %v5969_v52 = vpop.permute.xlu2 %3902 }
 0x119   :  { %10166 = vst [vmem:[#allocation14_spill] sm:$0xff] %v5963_v22  ;;  %4042 = vrot.lane.b32.xlu0 %v4041_v30, %s5404_s14  ;;  %v285_v14 = vsel %vm275_vm1, %v10168_v2, %v10167_v23  ;;  %v395_v30 = vsel %vm394_vm5, %v10169_v49, %v3784_v50 }
 0x11a   :  { %v3867_v32 = vpop.permute.xlu0 %3866 }
 0x11b   :  { %v3869_v3 = vunpack.i.h.bf16 %v3867_v32  ;;  %v3868_v60 = vunpack.i.l.bf16 %v3867_v32  ;;  %v3872_v6 = vpop.permute.xlu1 %3871  ;;  %v10171_v32 = vunpack.i.l.bf16 %v5730_v38 }
 0x11c   :  { %v3874_v33 = vunpack.i.h.bf16 %v3872_v6  ;;  %v3873_v61 = vunpack.i.l.bf16 %v3872_v6  ;;  %v442_v6 = vsel %vm435_vm6, %v3834_v17, %v3838_v9 }
 0x11d   :  { %v5984_v22 = vpack.i.bf16 %v3869_v3, %v5856_v62  ;;  %v396_v27 = vsel %vm394_vm5, %v3784_v50, %v10171_v32  ;;  %v5990_v7 = vsel %vm476_vm7, %v3864_v28, %v3868_v60  ;;  %v3854_v50 = vunpack.i.h.bf16 %v3852_v45 }
 0x11e   :  { %v483_v2 = vsel %vm476_vm7, %v3869_v3, %v3873_v61  ;;  %v484_v23 = vsel %vm476_vm7, %v3873_v61, %v3874_v33  ;;  %v485_v49 = vsel %vm476_vm7, %v3874_v33, %v3878_v15  ;;  %v4056_v28 = vpack.i.bf16 %v396_v27, %v395_v30 }
 0x11f   :  { %10170 = vst [vmem:[#allocation15_spill] sm:$0xff] %v5984_v22  ;;  %v4016_v12 = vpack.i.bf16 %v483_v2, %v285_v14  ;;  %v4021_v62 = vpack.i.bf16 %v442_v6, %v484_v23  ;;  %v5998_v22 = vpack.i.bf16 %v485_v49, %v3853_v48  ;;  %v9883_v3 = vunpack.i.l.bf16 %v5693_v0 }
 0x120   :  { %v6001_v32 = vpop.permute.xlu2 %3917  ;;  %v3769_v60 = vunpack.i.h.bf16 %v5776_v44  ;;  %v3818_v61 = vunpack.i.l.bf16 %v5804_v54  ;;  %v477_v45 = vsel %vm476_vm7, %v3853_v48, %v3854_v50  ;;  %v478_v27 = vsel %vm476_vm7, %v3854_v50, %v3858_v11 }
 0x121   :  { %10172 = vst [vmem:[#allocation16_spill] sm:$0xff] %v6001_v32  ;;  %4017 = vrot.lane.b32.xlu1 %v4016_v12, %s5404_s14  ;;  %4022 = vrot.lane.b32.xlu2 %v4021_v62, %s5404_s14  ;;  %v437_v12 = vsel %vm435_vm6, %v3819_v1, %v3823_v19  ;;  %v3879_v6 = vunpack.i.h.bf16 %v5938_v36  ;;  %v10174_v23 = vunpack.i.l.bf16 %v5776_v44  ;;  %v4031_v50 = vpack.i.bf16 %v478_v27, %v477_v45 }
 0x122   :  { %4057 = vrot.lane.b32.xlu0 %v4056_v28, %s5404_s14  ;;  %v3882_v14 = vpop.permute.xlu0 %3881  ;;  %v436_v30 = vsel %vm435_vm6, %v3818_v61, %v3819_v1  ;;  %v362_v62 = vsel %vm353_vm4, %v3769_v60, %v9883_v3  ;;  %v3804_v1 = vunpack.i.h.bf16 %v5769_v29  ;;  %v3803_v36 = vunpack.i.l.bf16 %v5769_v29 }
 0x123   :  { %v3884_v9 = vunpack.i.h.bf16 %v3882_v14  ;;  %v3883_v33 = vunpack.i.l.bf16 %v3882_v14  ;;  %v6009_v2 = vpop.permute.xlu1 %491  ;;  %v361_v49 = vsel %vm353_vm4, %v10174_v23, %v3769_v60  ;;  %v4036_v28 = vpack.i.bf16 %v437_v12, %v436_v30 }
 0x124   :  { %10173 = vst [vmem:[#allocation17_spill] sm:$0xff] %v6009_v2  ;;  %v3799_v44 = vunpack.i.h.bf16 %v5847_v55  ;;  %v4071_v14 = vpack.i.bf16 %v362_v62, %v361_v49  ;;  %v6037_v60 = vsel %vm476_vm7, %v3878_v15, %v3879_v6  ;;  %v3808_v45 = vunpack.i.l.bf16 %v5864_v26 }
 0x125   :  { %v6025_v48 = vsel %vm476_vm7, %v3883_v33, %v3884_v9  ;;  %v6040_v9 = vsel %vm476_vm7, %v3879_v6, %v3883_v33  ;;  %v402_v15 = vsel %vm394_vm5, %v3803_v36, %v3804_v1  ;;  %v10175_v23 = vunpack.i.l.bf16 %v5912_v59 }
 0x126   :  { %v401_v12 = vsel %vm394_vm5, %v3799_v44, %v3803_v36  ;;  %v10176_v33 = vunpack.i.h.bf16 %v5910_v58  ;;  %v9887_v49 = vunpack.i.h.bf16 %v5946_v51  ;;  %v3789_v58 = vunpack.i.h.bf16 %v5730_v38 }
 0x128   :  { %v6032_v19 = vpop.permute.xlu2 %3932  ;;  %v439_v6 = vsel %vm435_vm6, %v10176_v33, %v10175_v23  ;;  %v10182_v23 = vunpack.i.h.bf16 %v5864_v26 }
 0x129   :  { %4032 = vrot.lane.b32.xlu1 %v4031_v50, %s5404_s14  ;;  %4037 = vrot.lane.b32.xlu2 %v4036_v28, %s5404_s14  ;;  %v403_v50 = vsel %vm394_vm5, %v3804_v1, %v3808_v45  ;;  %v10178_v1 = vpack.i.bf16 %v5762_v43, %v5759_v20  ;;  %v3904_v43 = vunpack.i.l.bf16 %v5969_v52  ;;  %v9895_v54 = vunpack.i.h.bf16 %v6032_v19 }
 0x12a   :  { %4072 = vrot.lane.b32.xlu0 %v4071_v14, %s5404_s14  ;;  %v3893_v29 = vpop.permute.xlu0 %3892  ;;  %v4046_v14 = vpack.i.bf16 %v402_v15, %v401_v12  ;;  %v4051_v11 = vpack.i.bf16 %v439_v6, %v403_v50  ;;  %v404_v33 = vsel %vm394_vm5, %v3808_v45, %v10182_v23  ;;  %v10187_v23 = vunpack.i.l.bf16 %v5859_v56 }
 0x12b   :  { %v6046_v30 = vpop.permute.xlu1 %3897  ;;  %v3894_v62 = vunpack.i.l.bf16 %v3893_v29  ;;  %v3895_v28 = vunpack.i.h.bf16 %v3893_v29 }
 0x12c   :  { %v9884_v27 = vunpack.i.l.bf16 %v6046_v30  ;;  %v9886_v6 = vunpack.i.h.bf16 %v6046_v30 }
 0x12d   :  { %v6067_v59 = vsel %vm746_vm8, %v9887_v49, %v3894_v62  ;;  %v6079_v12 = vsel %vm746_vm8, %v3894_v62, %v3895_v28  ;;  %v3905_v62 = vunpack.i.h.bf16 %v5969_v52 }
 0x12e   :  { %10180 = vst [vmem:[#allocation20_spill] sm:$0xff] %v6079_v12  ;;  %v6090_v20 = vsel %vm746_vm8, %v3895_v28, %v9884_v27  ;;  %v6110_v52 = vsel %vm746_vm8, %v9886_v6, %v3904_v43 }
 0x12f   :  { %10183 = vst [vmem:[#allocation21_spill] sm:$0xff] %v6090_v20 }
 0x130   :  { %v6060_v3 = vpop.permute.xlu2 %3947  ;;  %10184 = vst [vmem:[#allocation22_spill] sm:$0xff] %v6110_v52 }
 0x131   :  { %10177 = vst [vmem:[#allocation18_spill] sm:$0xff] %v6060_v3  ;;  %4047 = vrot.lane.b32.xlu1 %v4046_v14, %s5404_s14  ;;  %4052 = vrot.lane.b32.xlu2 %v4051_v11, %s5404_s14  ;;  %v10181_v11 = vunpack.i.l.bf16 %v5730_v38  ;;  %v4066_v38 = vpack.i.bf16 %v5797_v53, %v3834_v17  ;;  %v10185_v17 = vpack.i.bf16 %v5723_v37, %v5720_v31  ;;  %v9888_v31 = vunpack.i.l.bf16 %v6001_v32 }
 0x132   :  { %4087 = vrot.lane.b32.xlu0 %v10178_v1, %s5404_s14  ;;  %v6074_v36 = vpop.permute.xlu0 %3907 }
 0x133   :  { %v6076_v29 = vpop.permute.xlu1 %3912  ;;  %v397_v15 = vsel %vm394_vm5, %v10181_v11, %v3789_v58  ;;  %v9904_v50 = vunpack.i.l.bf16 %v6074_v36  ;;  %v9906_v26 = vunpack.i.h.bf16 %v6074_v36 }
 0x134   :  { %10179 = vst [vmem:[#allocation19_spill] sm:$0xff] %v6076_v29  ;;  %v9885_v45 = vunpack.i.l.bf16 %v6076_v29  ;;  %v4061_v14 = vpack.i.bf16 %v404_v33, %v397_v15  ;;  %v398_v15 = vsel %vm394_vm5, %v3789_v58, %v10186_v34  ;;  %v10188_v33 = vunpack.i.h.bf16 %v5940_v10 }
 0x135   :  { %v6129_v43 = vsel %vm746_vm8, %v3905_v62, %v9904_v50  ;;  %v9894_v10 = vunpack.i.l.bf16 %v6032_v19  ;;  %v9890_v58 = vunpack.i.h.bf16 %v6076_v29  ;;  %v10191_v34 = vunpack.i.h.bf16 %v5737_v42 }
 0x136   :  { %v6143_v56 = vsel %vm746_vm8, %v9906_v26, %v9885_v45 }
 0x137   :  { %10190 = vst [vmem:[#allocation24_spill] sm:$0xff] %v6143_v56 }
 0x138   :  { %v6101_v1 = vpop.permute.xlu2 %3962 }
 0x139   :  { %v3965_v28 = vunpack.i.h.bf16 %v6101_v1  ;;  %v3964_v11 = vunpack.i.l.bf16 %v6101_v1  ;;  %4062 = vrot.lane.b32.xlu1 %v4061_v14, %s5404_s14  ;;  %4067 = vrot.lane.b32.xlu2 %v4066_v38, %s5404_s14  ;;  %v446_v38 = vsel %vm435_vm6, %v10188_v33, %v10187_v23  ;;  %v10192_v23 = vunpack.i.l.bf16 %v5737_v42 }
 0x13a   :  { %4102 = vrot.lane.b32.xlu0 %v10185_v17, %s5404_s14  ;;  %v6116_v53 = vpop.permute.xlu0 %3922  ;;  %v6172_v42 = vsel %vm746_vm8, %v9890_v58, %v9888_v31  ;;  %v10207_v1 = vpack.i.bf16 %v5875_v5, %v5870_v63  ;;  %v10212_v5 = vld [vmem:[#allocation12_spill] sm:$0xff] }
 0x13b   :  { %v9898_v37 = vunpack.i.h.bf16 %v6116_v53  ;;  %v3928_v14 = vpop.permute.xlu1 %3927  ;;  %v6136_v39 = vsel %vm746_vm8, %v3964_v11, %v3965_v28  ;;  %v354_v33 = vsel %vm353_vm4, %v10192_v23, %v10191_v34  ;;  %v10196_v34 = vunpack.i.h.bf16 %v5693_v0 }
 0x13c   :  { %10189 = vst [vmem:[#allocation23_spill] sm:$0xff] %v6136_v39  ;;  %v3930_v62 = vunpack.i.h.bf16 %v3928_v14  ;;  %v3929_v17 = vunpack.i.l.bf16 %v3928_v14  ;;  %v4076_v14 = vpack.i.bf16 %v3818_v61, %v398_v15  ;;  %v4081_v49 = vpack.i.bf16 %v354_v33, %v446_v38 }
 0x13d   :  { %v10197_v23 = vunpack.i.l.bf16 %v5693_v0 }
 0x13e   :  { %v6155_v27 = vsel %vm746_vm8, %v9898_v37, %v3929_v17  ;;  %v6158_v45 = vsel %vm746_vm8, %v3929_v17, %v3930_v62  ;;  %v6163_v6 = vsel %vm746_vm8, %v3930_v62, %v9894_v10  ;;  %v10195_v62 = vpack.i.bf16 %v5686_v41, %v5683_v57 }
 0x13f   :  { %10193 = vst [vmem:[#allocation25_spill] sm:$0xff] %v6158_v45  ;;  %v363_v33 = vsel %vm353_vm4, %v10197_v23, %v10196_v34  ;;  %v9892_v34 = vunpack.i.h.bf16 %v6060_v3 }
 0x140   :  { %10194 = vst [vmem:[#allocation26_spill] sm:$0xff] %v6163_v6 }
 0x141   :  { %4077 = vrot.lane.b32.xlu1 %v4076_v14, %s5404_s14  ;;  %4082 = vrot.lane.b32.xlu2 %v4081_v49, %s5404_s14  ;;  %v9891_v49 = vunpack.i.l.bf16 %v6060_v3 }
 0x142   :  { %4117 = vrot.lane.b32.xlu0 %v10195_v62, %s5404_s14  ;;  %v3938_v17 = vpop.permute.xlu0 %3937 }
 0x143   :  { %v6181_v61 = vpop.permute.xlu1 %3942  ;;  %v3940_v15 = vunpack.i.h.bf16 %v3938_v17  ;;  %v3939_v38 = vunpack.i.l.bf16 %v3938_v17  ;;  %v4091_v17 = vpack.i.bf16 %v3799_v44, %v363_v33  ;;  %v6224_v44 = vpop.permute.xlu2 %3977 }
 0x144   :  { %v9909_v14 = vunpack.i.h.bf16 %v6181_v61  ;;  %v9907_v57 = vunpack.i.l.bf16 %v6181_v61 }
 0x145   :  { %v6194_v41 = vsel %vm746_vm8, %v9895_v54, %v3939_v38  ;;  %v10200_v38 = vpack.i.bf16 %v5924_v40, %v5929_v16  ;;  %v10202_v16 = vunpack.i.l.bf16 %v5812_v4 }
 0x146   :  { %10198 = vst [vmem:[#allocation27_spill] sm:$0xff] %v6194_v41  ;;  %v6199_v62 = vsel %vm746_vm8, %v3940_v15, %v9907_v57  ;;  %v6206_v0 = vsel %vm746_vm8, %v9909_v14, %v9891_v49  ;;  %v10215_v49 = vld [vmem:[#allocation8_spill] sm:$0xff] }
 0x147   :  { %10199 = vst [vmem:[#allocation28_spill] sm:$0xff] %v6206_v0  ;;  %v4106_v33 = vpack.i.bf16 %v10202_v16, %v5754_v18  ;;  %v9910_v18 = vunpack.i.l.bf16 %v6224_v44 }
 0x149   :  { %4092 = vrot.lane.b32.xlu1 %v4091_v17, %s5404_s14  ;;  %4097 = vrot.lane.b32.xlu2 %v10200_v38, %s5404_s14  ;;  %v10203_v17 = vpack.i.bf16 %v5891_v25, %v5896_v47  ;;  %v10204_v38 = vpack.i.bf16 %v5899_v24, %v5882_v35 }
 0x14a   :  { %4132 = vrot.lane.b32.xlu0 %v5748_v13, %s5404_s14  ;;  %v6217_v15 = vpop.permute.xlu0 %3952 }
 0x14b   :  { %10201 = vst [vmem:[#allocation29_spill] sm:$0xff] %v6217_v15  ;;  %v6220_v23 = vpop.permute.xlu1 %3957  ;;  %v9889_v31 = vunpack.i.l.bf16 %v6217_v15  ;;  %v6272_v24 = vpop.permute.xlu2 %3992 }
 0x14c   :  { %v9901_v55 = vunpack.i.h.bf16 %v6220_v23  ;;  %v9902_v10 = vunpack.i.h.bf16 %v6272_v24 }
 0x14d   :  { %v6231_v40 = vsel %vm746_vm8, %v9892_v34, %v9889_v31  ;;  %v10216_v34 = vld [vmem:[#allocation14_spill] sm:$0xff] }
 0x14e   :  { %v6236_v13 = vsel %vm746_vm8, %v9901_v55, %v3964_v11  ;;  %v10222_v55 = vld [vmem:[#allocation11_spill] sm:$0xff] }
 0x151   :  { %4107 = vrot.lane.b32.xlu1 %v4106_v33, %s5404_s14  ;;  %4112 = vrot.lane.b32.xlu2 %v10203_v17, %s5404_s14 }
 0x152   :  { %4147 = vrot.lane.b32.xlu0 %v10204_v38, %s5404_s14  ;;  %v6250_v31 = vpop.permute.xlu0 %3967  ;;  %v9911_v38 = vunpack.i.h.bf16 %v6224_v44 }
 0x153   :  { %v3973_v11 = vpop.permute.xlu1 %3972  ;;  %v9900_v58 = vunpack.i.h.bf16 %v6250_v31  ;;  %v9899_v4 = vunpack.i.l.bf16 %v6250_v31 }
 0x154   :  { %v3975_v16 = vunpack.i.h.bf16 %v3973_v11  ;;  %v3974_v33 = vunpack.i.l.bf16 %v3973_v11 }
 0x155   :  { %v6260_v25 = vsel %vm746_vm8, %v3965_v28, %v9899_v4  ;;  %v10208_v28 = vpack.i.bf16 %v5827_v46, %v5820_v21  ;;  %v6306_v21 = vpop.permute.xlu2 %4007 }
 0x156   :  { %10205 = vst [vmem:[#allocation30_spill] sm:$0xff] %v6260_v25  ;;  %v6265_v35 = vsel %vm746_vm8, %v3975_v16, %v9910_v18  ;;  %v6270_v47 = vsel %vm746_vm8, %v9900_v58, %v3974_v33  ;;  %v4009_v37 = vunpack.i.l.bf16 %v6306_v21  ;;  %v10221_v58 = vld [vmem:[#allocation15_spill] sm:$0xff] }
 0x157   :  { %10206 = vst [vmem:[#allocation31_spill] sm:$0xff] %v6270_v47 }
 0x159   :  { %4122 = vrot.lane.b32.xlu1 %v5785_v8, %s5404_s14  ;;  %4127 = vrot.lane.b32.xlu2 %v10207_v1, %s5404_s14  ;;  %v10213_v1 = vld [vmem:[#allocation10_spill] sm:$0xff] }
 0x15a   :  { %4162 = vrot.lane.b32.xlu0 %v10208_v28, %s5404_s14  ;;  %v6284_v17 = vpop.permute.xlu0 %3982  ;;  %v10214_v28 = vpack.i.bf16 %v10212_v5, %v10213_v1 }
 0x15b   :  { %10209 = vst [vmem:[#allocation32_spill] sm:$0xff] %v6284_v17  ;;  %v6287_v11 = vpop.permute.xlu1 %3987  ;;  %v9897_v16 = vunpack.i.h.bf16 %v6284_v17  ;;  %v9893_v8 = vunpack.i.l.bf16 %v6284_v17 }
 0x15c   :  { %10210 = vst [vmem:[#allocation33_spill] sm:$0xff] %v6287_v11  ;;  %v9896_v33 = vunpack.i.l.bf16 %v6287_v11 }
 0x15d   :  { %v6297_v63 = vsel %vm746_vm8, %v9911_v38, %v9893_v8 }
 0x15e   :  { %10211 = vst [vmem:[#allocation34_spill] sm:$0xff] %v6297_v63  ;;  %v6304_v46 = vsel %vm746_vm8, %v9897_v16, %v9896_v33 }
 0x161   :  { %4137 = vrot.lane.b32.xlu1 %v10214_v28, %s5404_s14  ;;  %4142 = vrot.lane.b32.xlu2 %v10215_v49, %s5404_s14  ;;  %v10220_v28 = vld [vmem:[#allocation7_spill] sm:$0xff] }
 0x162   :  { %4177 = vrot.lane.b32.xlu0 %v10216_v34, %s5404_s14  ;;  %v3998_v8 = vpop.permute.xlu0 %3997 }
 0x163   :  { %v6317_v54 = vpop.permute.xlu1 %4002  ;;  %v4000_v33 = vunpack.i.h.bf16 %v3998_v8  ;;  %v3999_v16 = vunpack.i.l.bf16 %v3998_v8 }
 0x164   :  { %v9905_v4 = vunpack.i.h.bf16 %v6317_v54  ;;  %v9903_v5 = vunpack.i.l.bf16 %v6317_v54 }
 0x165   :  { %v6325_v49 = vsel %vm746_vm8, %v9902_v10, %v3999_v16  ;;  %v6328_v34 = vsel %vm746_vm8, %v3999_v16, %v4000_v33  ;;  %v10223_v16 = vld [vmem:[#allocation13_spill] sm:$0xff] }
 0x166   :  { %10217 = vst [vmem:[#allocation12_spill] sm:$0xff] %v6328_v34  ;;  %v6333_v1 = vsel %vm746_vm8, %v4000_v33, %v9903_v5  ;;  %v6338_v8 = vsel %vm746_vm8, %v9905_v4, %v4009_v37  ;;  %v10224_v10 = vpack.i.bf16 %v10222_v55, %v10223_v16  ;;  %v10225_v33 = vld [vmem:[#allocation9_spill] sm:$0xff]  ;;  %v10226_v5 = vld [vmem:[#allocation6_spill] sm:$0xff]  ;;  %v6357_v37 = vld [vmem:[%s9861_s4] sm:$0xff] }
 0x167   :  { %10218 = vst [vmem:[#allocation10_spill] sm:$0xff] %v6333_v1  ;;  %v10227_v50 = vpack.i.bf16 %v10225_v33, %v10226_v5 }
 0x168   :  { %10219 = vst [vmem:[#allocation8_spill] sm:$0xff] %v6338_v8 }
 0x169   :  { %4152 = vrot.lane.b32.xlu1 %v10220_v28, %s5404_s14  ;;  %4157 = vrot.lane.b32.xlu2 %v10221_v58, %s5404_s14  ;;  %10228 = vst [vmem:[#allocation14_spill] sm:$0xff] %v6357_v37  ;;  %v10229_v58 = vld [vmem:[#allocation5_spill] sm:$0xff] }
 0x16a   :  { %4192 = vrot.lane.b32.xlu0 %v10224_v10, %s5404_s14  ;;  %v10230_v10 = vpack.i.bf16 %v6040_v9, %v6037_v60  ;;  %v6365_v55 = vpop.permute.xlu0 %4012 }
 0x16b   :  { %v10237_v1 = vunpack.i.l.bf16 %v6365_v55 }
 0x171   :  { %4167 = vrot.lane.b32.xlu1 %v5998_v22, %s5404_s14  ;;  %4172 = vrot.lane.b32.xlu2 %v10227_v50, %s5404_s14  ;;  %v10231_v50 = vpack.i.bf16 %v5990_v7, %v6025_v48 }
 0x179   :  { %4182 = vrot.lane.b32.xlu1 %v10229_v58, %s5404_s14  ;;  %4187 = vrot.lane.b32.xlu2 %v10230_v10, %s5404_s14 }
 0x17b   :  { %v6367_v22 = vpop.permute.xlu2 %4022 }
 0x17c   :  { %v4025_v5 = vunpack.i.h.bf16 %v6367_v22  ;;  %v9915_v14 = vunpack.i.l.bf16 %v6367_v22 }
 0x181   :  { %4197 = vrot.lane.b32.xlu1 %v10231_v50, %s5404_s14 }
 0x183   :  { %v6374_v28 = vpop.permute.xlu2 %4037  ;;  %v6376_v16 = vpop.permute.xlu0 %4027 }
 0x184   :  { %v4040_v33 = vunpack.i.h.bf16 %v6374_v28  ;;  %v9912_v60 = vunpack.i.l.bf16 %v6374_v28  ;;  %v9908_v9 = vunpack.i.h.bf16 %v6376_v16  ;;  %v4029_v58 = vunpack.i.l.bf16 %v6376_v16 }
 0x186   :  { %v838_v10 = vsel %vm746_vm8, %v4025_v5, %v4029_v58  ;;  %v6386_v7 = vsel %vm746_vm8, %v4029_v58, %v9908_v9  ;;  %v832_v48 = vsel %vm746_vm8, %v9912_v60, %v4040_v33  ;;  %v9918_v58 = vunpack.i.h.bf16 %v6365_v55 }
 0x187   :  { %1007 = vmatpush.msra.mxu2 %v838_v10 }
 0x189   :  { %1008 = vmatpush.msra.mxu2 %v832_v48 }
 0x18b   :  { %v6391_v50 = vpop.permute.xlu2 %4052  ;;  %v6393_v4 = vpop.permute.xlu0 %4042 }
 0x18c   :  { %v9913_v26 = vunpack.i.l.bf16 %v6393_v4 }
 0x18e   :  { %v6399_v57 = vsel %vm746_vm8, %v4040_v33, %v9913_v26 }
 0x193   :  { %v6402_v9 = vpop.permute.xlu1 %4017  ;;  %v6404_v10 = vpop.permute.xlu2 %4067 }
 0x194   :  { %10232 = vst [vmem:[#allocation7_spill] sm:$0xff] %v6402_v9  ;;  %v9916_v48 = vunpack.i.h.bf16 %v6402_v9  ;;  %v9917_v18 = vunpack.i.l.bf16 %v6402_v9  ;;  %v4069_v38 = vunpack.i.l.bf16 %v6404_v10  ;;  %v6410_v60 = vpop.permute.xlu0 %4057 }
 0x195   :  { %v4060_v32 = vunpack.i.h.bf16 %v6410_v60  ;;  %v10234_v56 = vunpack.i.l.bf16 %v6410_v60 }
 0x196   :  { %v837_v37 = vsel %vm746_vm8, %v4069_v38, %v4025_v5  ;;  %v850_v33 = vsel %vm746_vm8, %v9916_v48, %v9915_v14  ;;  %v6423_v26 = vsel %vm746_vm8, %v9918_v58, %v9917_v18  ;;  %v9929_v18 = vunpack.i.l.bf16 %v6391_v50 }
 0x197   :  { %10233 = vst [vmem:[#allocation15_spill] sm:$0xff] %v6423_v26  ;;  %967 = vmatpush.msra.mxu0 %v837_v37  ;;  %1041 = vmatpush.msra.mxu3 %v850_v33  ;;  %v820_v15 = vsel %vm746_vm8, %v10234_v56, %v4060_v32 }
 0x19b   :  { %v6425_v2 = vpop.permute.xlu1 %4032  ;;  %v6427_v52 = vpop.permute.xlu2 %4082 }
 0x19c   :  { %v9923_v38 = vunpack.i.h.bf16 %v6425_v2  ;;  %v9925_v5 = vunpack.i.l.bf16 %v6425_v2  ;;  %v6431_v41 = vpop.permute.xlu0 %4072  ;;  %v9933_v8 = vunpack.i.h.bf16 %v6427_v52 }
 0x19d   :  { %v9924_v14 = vunpack.i.h.bf16 %v6431_v41  ;;  %v4074_v48 = vunpack.i.l.bf16 %v6431_v41 }
 0x19e   :  { %v844_v37 = vsel %vm746_vm8, %v9925_v5, %v9923_v38 }
 0x19f   :  { %1042 = vmatpush.msra.mxu3 %v844_v37  ;;  %v6443_v33 = vsel %vm746_vm8, %v4074_v48, %v9924_v14 }
 0x1a3   :  { %v4048_v58 = vpop.permute.xlu1 %4047  ;;  %v6446_v20 = vpop.permute.xlu2 %4097 }
 0x1a4   :  { %v4050_v12 = vunpack.i.h.bf16 %v4048_v58  ;;  %v4049_v29 = vunpack.i.l.bf16 %v4048_v58  ;;  %v6450_v6 = vpop.permute.xlu0 %4087  ;;  %v9930_v58 = vunpack.i.h.bf16 %v6404_v10 }
 0x1a5   :  { %v9928_v37 = vunpack.i.h.bf16 %v6450_v6  ;;  %v4089_v38 = vunpack.i.l.bf16 %v6450_v6 }
 0x1a6   :  { %v826_v14 = vsel %vm746_vm8, %v4049_v29, %v4050_v12  ;;  %v6458_v5 = vsel %vm746_vm8, %v4050_v12, %v9929_v18  ;;  %v814_v12 = vsel %vm746_vm8, %v9930_v58, %v4074_v48  ;;  %v9937_v58 = vunpack.i.h.bf16 %v6446_v20 }
 0x1a7   :  { %1009 = vmatpush.msra.mxu2 %v826_v14  ;;  %v6463_v47 = vsel %vm746_vm8, %v4089_v38, %v9928_v37  ;;  %v6476_v14 = vld [vmem:[%s9862_s1 + $0x8] sm:$0xff]  ;;  %v808_v48 = vsel %vm746_vm8, %v9933_v8, %v4089_v38 }
 0x1a8   :  { %3542 = vmatmul.msk.f32.vlgmr.msra.gmra.mxu3 %vm963_vm9, %v6476_v14 }
 0x1a9   :  { %1010 = vmatpush.msra.mxu2 %v820_v15 }
 0x1ab   :  { %v6478_v37 = vpop.permute.xlu1 %4062  ;;  %v6480_v18 = vpop.permute.xlu2 %4112  ;;  %1011 = vmatpush.msra.mxu2 %v814_v12 }
 0x1ac   :  { %v9936_v56 = vunpack.i.l.bf16 %v6478_v37  ;;  %v6485_v15 = vpop.permute.xlu0 %4102 }
 0x1ad   :  { %v9938_v45 = vunpack.i.h.bf16 %v6485_v15  ;;  %v4104_v3 = vunpack.i.l.bf16 %v6485_v15  ;;  %1012 = vmatpush.msra.mxu2 %v808_v48 }
 0x1ae   :  { %v6496_v12 = vsel %vm746_vm8, %v4060_v32, %v9936_v56  ;;  %v9942_v56 = vunpack.i.h.bf16 %v6480_v18  ;;  %v10236_v32 = vunpack.i.h.bf16 %v6365_v55 }
 0x1af   :  { %v802_v25 = vsel %vm746_vm8, %v9937_v58, %v4104_v3  ;;  %v6504_v38 = vsel %vm746_vm8, %v4104_v3, %v9938_v45  ;;  %v10235_v3 = vunpack.i.l.bf16 %v6374_v28 }
 0x1b0   :  { %1013 = vmatpush.msra.mxu2 %v802_v25  ;;  %v790_v63 = vsel %vm746_vm8, %v10237_v1, %v10236_v32  ;;  %v10241_v1 = vunpack.i.l.bf16 %v6181_v61 }
 0x1b3   :  { %v6506_v8 = vpop.permute.xlu1 %4077  ;;  %v6508_v0 = vpop.permute.xlu2 %4127 }
 0x1b4   :  { %v4080_v48 = vunpack.i.h.bf16 %v6506_v8  ;;  %v6511_v11 = vpop.permute.xlu0 %4117 }
 0x1b5   :  { %v9941_v58 = vunpack.i.h.bf16 %v6511_v11  ;;  %v4119_v39 = vunpack.i.l.bf16 %v6511_v11 }
 0x1b6   :  { %v831_v25 = vsel %vm746_vm8, %v4080_v48, %v10235_v3 }
 0x1b7   :  { %968 = vmatpush.msra.mxu0 %v831_v25  ;;  %v796_v45 = vsel %vm746_vm8, %v9942_v56, %v4119_v39  ;;  %v6526_v17 = vsel %vm746_vm8, %v4119_v39, %v9941_v58  ;;  %v10238_v25 = vunpack.i.h.bf16 %v6224_v44  ;;  %v10239_v39 = vunpack.i.l.bf16 %v6224_v44 }
 0x1b8   :  { %1014 = vmatpush.msra.mxu2 %v796_v45 }
 0x1b9   :  { %v778_v45 = vsel %vm746_vm8, %v10239_v39, %v10238_v25  ;;  %v10244_v39 = vunpack.i.l.bf16 %v6410_v60  ;;  %v9945_v60 = vunpack.i.h.bf16 %v6391_v50 }
 0x1ba   :  { %1015 = vmatpush.msra.mxu2 %v790_v63  ;;  %v10240_v63 = vunpack.i.h.bf16 %v6181_v61  ;;  %v10243_v61 = vunpack.i.l.bf16 %v6074_v36 }
 0x1bb   :  { %v6533_v28 = vpop.permute.xlu1 %4092  ;;  %v6535_v48 = vpop.permute.xlu2 %4142 }
 0x1bc   :  { %v4095_v3 = vunpack.i.h.bf16 %v6533_v28  ;;  %1016 = vmatpush.msra.mxu2 %v6325_v49  ;;  %v766_v32 = vsel %vm746_vm8, %v10241_v1, %v10240_v63  ;;  %v6555_v44 = vpop.permute.xlu0 %4132  ;;  %v10245_v63 = vunpack.i.h.bf16 %v6402_v9  ;;  %v4144_v9 = vunpack.i.l.bf16 %v6535_v48 }
 0x1bd   :  { %v10253_v26 = vunpack.i.l.bf16 %v6555_v44 }
 0x1be   :  { %1017 = vmatpush.msra.mxu2 %v778_v45  ;;  %v825_v58 = vsel %vm746_vm8, %v4095_v3, %v4049_v29 }
 0x1bf   :  { %969 = vmatpush.msra.mxu0 %v825_v58  ;;  %v10242_v58 = vunpack.i.h.bf16 %v6074_v36  ;;  %v9944_v36 = vunpack.i.l.bf16 %v6446_v20 }
 0x1c0   :  { %1018 = vmatpush.msra.mxu2 %v6236_v13  ;;  %v9943_v13 = vunpack.i.l.bf16 %v6427_v52 }
 0x1c1   :  { %v754_v3 = vsel %vm746_vm8, %v10243_v61, %v10242_v58  ;;  %v9947_v58 = vunpack.i.l.bf16 %v6480_v18  ;;  %v9952_v61 = vunpack.i.l.bf16 %v6506_v8 }
 0x1c2   :  { %1019 = vmatpush.msra.mxu2 %v766_v32  ;;  %v9946_v32 = vunpack.i.h.bf16 %v6393_v4 }
 0x1c3   :  { %v6551_v49 = vpop.permute.xlu1 %4107  ;;  %v6553_v56 = vpop.permute.xlu2 %4157 }
 0x1c4   :  { %v4110_v25 = vunpack.i.h.bf16 %v6551_v49  ;;  %v4160_v29 = vunpack.i.h.bf16 %v6553_v56  ;;  %1020 = vmatpush.msra.mxu2 %v6155_v27  ;;  %v6575_v27 = vld [vmem:[%s9862_s1] sm:$0xff] }
 0x1c6   :  { %1021 = vmatpush.msra.mxu2 %v754_v3  ;;  %v819_v45 = vsel %vm746_vm8, %v4110_v25, %v10244_v39  ;;  %v849_v1 = vsel %vm746_vm8, %v4160_v29, %v10245_v63  ;;  %v9948_v25 = vunpack.i.h.bf16 %v6478_v37  ;;  %v841_v29 = vsel %vm746_vm8, %v9946_v32, %v9943_v13  ;;  %v6606_v13 = vpop.permute.xlu0 %4147 }
 0x1c7   :  { %970 = vmatpush.msra.mxu0 %v819_v45  ;;  %1001 = vmatpush.msra.mxu1 %v849_v1  ;;  %v9949_v3 = vunpack.i.l.bf16 %v6508_v0  ;;  %v4135_v45 = vunpack.i.h.bf16 %v6555_v44  ;;  %v10247_v32 = vunpack.i.h.bf16 %v6427_v52 }
 0x1c8   :  { %1022 = vmatpush.msra.mxu2 %v6067_v59  ;;  %v835_v59 = vsel %vm746_vm8, %v9945_v60, %v9944_v36  ;;  %v829_v1 = vsel %vm746_vm8, %v9948_v25, %v9947_v58  ;;  %v10246_v36 = vunpack.i.h.bf16 %v6404_v10  ;;  %v10248_v25 = vunpack.i.h.bf16 %v6446_v20 }
 0x1c9   :  { %1023 = vmatmul.f32.vlgmr.msra.gmra.mxu2 %v6575_v27  ;;  %v807_v58 = vsel %vm746_vm8, %v4135_v45, %v10247_v32 }
 0x1ca   :  { %1127 = vmatpush.msrb.mxu2 %v841_v29  ;;  %v4145_v29 = vunpack.i.h.bf16 %v6535_v48 }
 0x1cb   :  { %v6596_v39 = vpop.permute.xlu1 %4122  ;;  %v6640_v45 = vpop.permute.xlu2 %4172 }
 0x1cc   :  { %1128 = vmatpush.msrb.mxu2 %v835_v59  ;;  %v4125_v63 = vunpack.i.h.bf16 %v6596_v39  ;;  %v823_v59 = vsel %vm746_vm8, %v9952_v61, %v9949_v3  ;;  %v9953_v3 = vunpack.i.l.bf16 %v6606_v13  ;;  %v4010_v61 = vunpack.i.h.bf16 %v6306_v21 }
 0x1cd   :  { %v10251_v21 = vunpack.i.l.bf16 %v6365_v55  ;;  %v10255_v55 = vunpack.i.l.bf16 %v6640_v45 }
 0x1ce   :  { %1129 = vmatpush.msrb.mxu2 %v829_v1  ;;  %v813_v60 = vsel %vm746_vm8, %v4125_v63, %v10246_v36  ;;  %v801_v1 = vsel %vm746_vm8, %v4145_v29, %v10248_v25  ;;  %v9951_v36 = vunpack.i.l.bf16 %v6533_v28  ;;  %v9954_v63 = vunpack.i.l.bf16 %v6551_v49 }
 0x1cf   :  { %971 = vmatpush.msra.mxu0 %v813_v60  ;;  %v789_v34 = vsel %vm746_vm8, %v4010_v61, %v10251_v21  ;;  %v793_v61 = vsel %vm746_vm8, %v4144_v9, %v10255_v55  ;;  %v10259_v55 = vunpack.i.l.bf16 %v6425_v2 }
 0x1d0   :  { %1130 = vmatpush.msrb.mxu2 %v823_v59  ;;  %v811_v25 = vsel %vm746_vm8, %v9954_v63, %v9953_v3  ;;  %v4124_v59 = vunpack.i.l.bf16 %v6596_v39  ;;  %v10250_v3 = vunpack.i.h.bf16 %v6480_v18  ;;  %v10288_v39 = vunpack.i.h.bf16 %v6511_v11  ;;  %v10293_v11 = vld [vmem:[#allocation12_spill] sm:$0xff] }
 0x1d1   :  { %972 = vmatpush.msra.mxu0 %v807_v58  ;;  %v6633_v58 = vpop.permute.xlu0 %4162 }
 0x1d3   :  { %v6622_v10 = vpop.permute.xlu1 %4137  ;;  %973 = vmatpush.msra.mxu0 %v801_v1 }
 0x1d4   :  { %v9950_v60 = vunpack.i.l.bf16 %v6622_v10 }
 0x1d6   :  { %v817_v32 = vsel %vm746_vm8, %v9951_v36, %v9950_v60  ;;  %v3994_v36 = vunpack.i.l.bf16 %v6272_v24 }
 0x1d7   :  { %1131 = vmatpush.msrb.mxu2 %v817_v32 }
 0x1d9   :  { %1132 = vmatpush.msrb.mxu2 %v811_v25  ;;  %v10252_v25 = vunpack.i.l.bf16 %v6633_v58 }
 0x1db   :  { %v6642_v29 = vpop.permute.xlu1 %4152 }
 0x1dc   :  { %10249 = vst [vmem:[#allocation11_spill] sm:$0xff] %v6642_v29  ;;  %v9957_v60 = vunpack.i.h.bf16 %v6642_v29  ;;  %v4154_v32 = vunpack.i.l.bf16 %v6642_v29  ;;  %v6670_v29 = vpop.permute.xlu0 %4177 }
 0x1de   :  { %v795_v63 = vsel %vm746_vm8, %v4154_v32, %v10250_v3  ;;  %v805_v1 = vsel %vm746_vm8, %v4124_v59, %v9957_v60  ;;  %v799_v3 = vsel %vm746_vm8, %v10253_v26, %v10252_v25  ;;  %v3959_v32 = vunpack.i.l.bf16 %v6220_v23 }
 0x1df   :  { %974 = vmatpush.msra.mxu0 %v795_v63  ;;  %1133 = vmatpush.msrb.mxu2 %v805_v1  ;;  %v10254_v63 = vunpack.i.h.bf16 %v6272_v24  ;;  %v10256_v25 = vunpack.i.h.bf16 %v6317_v54  ;;  %v10257_v24 = vunpack.i.l.bf16 %v6317_v54  ;;  %v10260_v60 = vunpack.i.l.bf16 %v6367_v22 }
 0x1e0   :  { %v10262_v22 = vunpack.i.h.bf16 %v6250_v31 }
 0x1e1   :  { %975 = vmatpush.msra.mxu0 %v789_v34  ;;  %1134 = vmatpush.msrb.mxu2 %v799_v3  ;;  %v783_v1 = vsel %vm746_vm8, %v3994_v36, %v10254_v63  ;;  %v787_v36 = vsel %vm746_vm8, %v10257_v24, %v10256_v25  ;;  %v4179_v3 = vunpack.i.l.bf16 %v6670_v29  ;;  %v10258_v63 = vunpack.i.h.bf16 %v6220_v23 }
 0x1e2   :  { %v3924_v25 = vunpack.i.l.bf16 %v6116_v53  ;;  %v10261_v23 = vunpack.i.h.bf16 %v6425_v2  ;;  %v10266_v2 = vunpack.i.h.bf16 %v6116_v53  ;;  %v10270_v53 = vunpack.i.l.bf16 %v6032_v19 }
 0x1e3   :  { %v6680_v21 = vpop.permute.xlu1 %4167  ;;  %976 = vmatpush.msra.mxu0 %v783_v1  ;;  %1135 = vmatpush.msrb.mxu2 %v793_v61  ;;  %v771_v1 = vsel %vm746_vm8, %v3959_v32, %v10258_v63  ;;  %v4130_v63 = vunpack.i.h.bf16 %v6508_v0  ;;  %v10297_v48 = vld [vmem:[#allocation11_spill] sm:$0xff] }
 0x1e4   :  { %v4170_v26 = vunpack.i.h.bf16 %v6680_v21  ;;  %v4169_v34 = vunpack.i.l.bf16 %v6680_v21  ;;  %v759_v24 = vsel %vm746_vm8, %v3924_v25, %v10266_v2  ;;  %v4150_v25 = vunpack.i.h.bf16 %v6606_v13 }
 0x1e5   :  { %977 = vmatpush.msra.mxu0 %v6265_v35  ;;  %1136 = vmatpush.msrb.mxu2 %v787_v36  ;;  %v845_v35 = vsel %vm746_vm8, %v10261_v23, %v4179_v3  ;;  %v10268_v36 = vunpack.i.l.bf16 %v6393_v4  ;;  %v10278_v23 = vunpack.i.l.bf16 %v6046_v30 }
 0x1e6   :  { %v843_v61 = vsel %vm746_vm8, %v4169_v34, %v10259_v55  ;;  %v851_v54 = vsel %vm746_vm8, %v10260_v60, %v4170_v26  ;;  %v10263_v60 = vunpack.i.l.bf16 %v6250_v31  ;;  %v3889_v34 = vunpack.i.l.bf16 %v5946_v51 }
 0x1e7   :  { %978 = vmatpush.msra.mxu0 %v771_v1  ;;  %1002 = vmatpush.msra.mxu1 %v843_v61  ;;  %v10267_v31 = vunpack.i.h.bf16 %v6391_v50 }
 0x1e8   :  { %1081 = vmatpush.msrb.mxu3 %v851_v54  ;;  %1137 = vmatpush.msrb.mxu2 %v6304_v46  ;;  %v775_v32 = vsel %vm746_vm8, %v10263_v60, %v10262_v22  ;;  %v10264_v46 = vunpack.i.h.bf16 %v6393_v4  ;;  %v10272_v4 = vunpack.i.l.bf16 %v6391_v50  ;;  %v10275_v50 = vunpack.i.l.bf16 %v6478_v37 }
 0x1e9   :  { %1047 = vmatpush.msrb.mxu1 %v6386_v7  ;;  %979 = vmatpush.msra.mxu0 %v6199_v62  ;;  %v10265_v7 = vunpack.i.h.bf16 %v6376_v16  ;;  %v834_v16 = vsel %vm746_vm8, %v10268_v36, %v10267_v31  ;;  %v10276_v54 = vunpack.i.l.bf16 %v6427_v52  ;;  %v10280_v52 = vunpack.i.h.bf16 %v6431_v41 }
 0x1ea   :  { %1082 = vmatpush.msrb.mxu3 %v845_v35  ;;  %1138 = vmatpush.msrb.mxu2 %v775_v32  ;;  %v4159_v35 = vunpack.i.l.bf16 %v6553_v56  ;;  %v10281_v22 = vunpack.i.l.bf16 %v6446_v20  ;;  %v10282_v60 = vunpack.i.l.bf16 %v6551_v49  ;;  %v10284_v56 = vunpack.i.l.bf16 %v6480_v18 }
 0x1eb   :  { %v840_v62 = vsel %vm746_vm8, %v10265_v7, %v10264_v46  ;;  %1048 = vmatpush.msrb.mxu1 %v6399_v57  ;;  %980 = vmatpush.msra.mxu0 %v759_v24  ;;  %v10269_v57 = vunpack.i.h.bf16 %v6032_v19  ;;  %v4140_v19 = vunpack.i.h.bf16 %v6622_v10  ;;  %v10285_v20 = vunpack.i.h.bf16 %v6485_v15  ;;  %v4183_v46 = vpop.permute.xlu1 %4182  ;;  %v10289_v7 = vld [vmem:[#allocation15_spill] sm:$0xff] }
 0x1ec   :  { %1087 = vmatpush.msra.mxu3 %v840_v62  ;;  %1139 = vmatpush.msrb.mxu2 %v6231_v40  ;;  %v10271_v40 = vunpack.i.h.bf16 %v6478_v37  ;;  %v4165_v49 = vunpack.i.h.bf16 %v6633_v58  ;;  %v10286_v18 = vunpack.i.l.bf16 %v6508_v0  ;;  %v10287_v15 = vunpack.i.l.bf16 %v6555_v44  ;;  %v10291_v0 = vld [vmem:[#allocation7_spill] sm:$0xff] }
 0x1ed   :  { %1049 = vmatpush.msrb.mxu1 %v6458_v5  ;;  %v763_v1 = vsel %vm746_vm8, %v10270_v53, %v10269_v57  ;;  %981 = vmatpush.msra.mxu0 %v6129_v43  ;;  %v10273_v5 = vunpack.i.h.bf16 %v5946_v51  ;;  %v10274_v43 = vunpack.i.l.bf16 %v6506_v8  ;;  %v842_v51 = vsel %vm746_vm8, %v10276_v54, %v4130_v63  ;;  %v10296_v63 = vld [vmem:[#allocation10_spill] sm:$0xff]  ;;  %v10299_v53 = vld [vmem:[#allocation32_spill] sm:$0xff] }
 0x1ee   :  { %1088 = vmatpush.msra.mxu3 %v834_v16  ;;  %1140 = vmatpush.msrb.mxu2 %v763_v1  ;;  %v828_v55 = vsel %vm746_vm8, %v10272_v4, %v10271_v40  ;;  %v10279_v8 = vunpack.i.l.bf16 %v6533_v28  ;;  %v10283_v28 = vunpack.i.h.bf16 %v6450_v6  ;;  %v804_v32 = vsel %vm746_vm8, %v10285_v20, %v4124_v59  ;;  %v10295_v16 = vld [vmem:[#allocation34_spill] sm:$0xff] }
 0x1ef   :  { %1050 = vmatpush.msrb.mxu1 %v6496_v12  ;;  %v747_v61 = vsel %vm746_vm8, %v3889_v34, %v10273_v5  ;;  %v822_v12 = vsel %vm746_vm8, %v10275_v50, %v10274_v43  ;;  %3543 = vmatmul.msk.f32.vlgmr.msrb.gmra.mxu3 %vm963_vm9, %v6476_v14  ;;  %v4175_v6 = vunpack.i.h.bf16 %v6640_v45  ;;  %v798_v59 = vsel %vm746_vm8, %v10288_v39, %v10287_v15  ;;  %v4188_v43 = vpop.permute.xlu2 %4187  ;;  %v10305_v50 = vld [vmem:[#allocation28_spill] sm:$0xff]  ;;  %v10321_v15 = vld [vmem:[#allocation31_spill] sm:$0xff] }
 0x1f0   :  { %1089 = vmatpush.msra.mxu3 %v828_v55  ;;  %982 = vmatpush.msra.mxu0 %v747_v61  ;;  %v816_v37 = vsel %vm746_vm8, %v10280_v52, %v10279_v8  ;;  %v810_v41 = vsel %vm746_vm8, %v10283_v28, %v10282_v60  ;;  %v10290_v62 = vunpack.i.l.bf16 %v6622_v10  ;;  %v10292_v34 = vunpack.i.l.bf16 %v10291_v0  ;;  %v10304_v61 = vld [vmem:[#allocation33_spill] sm:$0xff]  ;;  %v10314_v60 = vld [vmem:[#allocation24_spill] sm:$0xff]  ;;  %v10315_v28 = vld [vmem:[#allocation26_spill] sm:$0xff] }
 0x1f1   :  { %1141 = vmatpush.msrb.mxu2 %v6172_v42  ;;  %983 = vmatmul.f32.vlgmr.msra.gmra.mxu0 %v6575_v27  ;;  %v10277_v42 = vunpack.i.h.bf16 %v6046_v30  ;;  %v836_v30 = vsel %vm746_vm8, %v10281_v22, %v4140_v19  ;;  %v4180_v44 = vunpack.i.h.bf16 %v6670_v29  ;;  %v4184_v24 = vunpack.i.l.bf16 %v4183_v46  ;;  %v10311_v8 = vld [vmem:[#allocation25_spill] sm:$0xff]  ;;  %v10312_v22 = vld [vmem:[#allocation8_spill] sm:$0xff] }
 0x1f2   :  { %1051 = vmatpush.msrb.mxu1 %v6443_v33  ;;  %1090 = vmatpush.msra.mxu3 %v822_v12  ;;  %v792_v2 = vsel %vm746_vm8, %v10292_v34, %v4144_v9  ;;  %v10294_v31 = vunpack.i.l.bf16 %v6606_v13  ;;  %v4185_v10 = vunpack.i.h.bf16 %v4183_v46  ;;  %v10298_v57 = vunpack.i.h.bf16 %v10297_v48  ;;  %v10302_v13 = vld [vmem:[#allocation23_spill] sm:$0xff]  ;;  %v10306_v12 = vld [vmem:[#allocation30_spill] sm:$0xff]  ;;  %v10320_v46 = vld [vmem:[#allocation20_spill] sm:$0xff] }
 0x1f3   :  { %1167 = vmatpush.msrb.mxu0 %v842_v51  ;;  %v751_v33 = vsel %vm746_vm8, %v10278_v23, %v10277_v42  ;;  %3541 = vmatmul.msk.f32.vlgmr.msra.gmra.mxu1 %vm963_vm9, %v6476_v14  ;;  %v10300_v1 = vunpack.i.h.bf16 %v10299_v53  ;;  %v10301_v40 = vunpack.i.l.bf16 %v10299_v53  ;;  %v10303_v55 = vunpack.i.l.bf16 %v6633_v58  ;;  %v23_v29 = vld [vmem:[%s9863_s5] sm:$0x3f]  ;;  %s6917_s5 = smov 0  }
 0x1f4   :  { %1142 = vmatpush.msrb.mxu2 %v751_v33  ;;  %1052 = vmatpush.msrb.mxu1 %v6463_v47  ;;  %v830_v47 = vsel %vm746_vm8, %v10284_v56, %v4150_v25  ;;  %v812_v36 = vsel %vm746_vm8, %v10294_v31, %v4175_v6  ;;  %v806_v9 = vsel %vm746_vm8, %v10298_v57, %v4180_v44  ;;  %v3990_v19 = vunpack.i.h.bf16 %v10304_v61  ;;  %v10308_v25 = vld [vmem:[#allocation18_spill] sm:$0xff]  ;;  %v4193_v33 = vpop.permute.xlu0 %4192 }
 0x1f5   :  { %1091 = vmatpush.msra.mxu3 %v816_v37  ;;  %1143 = vmatmul.f32.vlgmr.msrb.gmra.mxu2 %v6575_v27  ;;  %v780_v4 = vsel %vm746_vm8, %v10301_v40, %v10300_v1  ;;  %v800_v5 = vsel %vm746_vm8, %v10303_v55, %v4184_v24  ;;  %v10307_v54 = vunpack.i.l.bf16 %v6640_v45  ;;  %v10309_v42 = vunpack.i.h.bf16 %v10308_v25 }
 0x1f6   :  { %1168 = vmatpush.msrb.mxu0 %v836_v30  ;;  %1053 = vmatpush.msrb.mxu1 %v6504_v38  ;;  %v824_v38 = vsel %vm746_vm8, %v10286_v18, %v4159_v35  ;;  %v10310_v23 = vunpack.i.l.bf16 %v10308_v25  ;;  %v4190_v52 = vunpack.i.h.bf16 %v4188_v43  ;;  %v4189_v37 = vunpack.i.l.bf16 %v4188_v43  ;;  %v4198_v35 = vpop.permute.xlu1 %4197  ;;  %v10313_v30 = vld [vmem:[#allocation29_spill] sm:$0xff] }
 0x1f7   :  { %1092 = vmatpush.msra.mxu3 %v810_v41  ;;  %v794_v51 = vsel %vm746_vm8, %v10307_v54, %v4185_v10  ;;  %v3955_v45 = vunpack.i.h.bf16 %v10313_v30  ;;  %v10316_v41 = vunpack.i.l.bf16 %v10304_v61  ;;  %v4194_v20 = vunpack.i.l.bf16 %v4193_v33  ;;  %v10327_v10 = vld [vmem:[#allocation22_spill] sm:$0xff] }
 0x1f8   :  { %1169 = vmatpush.msrb.mxu0 %v830_v47  ;;  %1054 = vmatpush.msrb.mxu1 %v6526_v17  ;;  %v818_v17 = vsel %vm746_vm8, %v10290_v62, %v4165_v49  ;;  %v768_v58 = vsel %vm746_vm8, %v10310_v23, %v10309_v42  ;;  %v4195_v47 = vunpack.i.h.bf16 %v4193_v33  ;;  %v853_v39 = vsel %vm746_vm8, %v4189_v37, %v4190_v52 }
 0x1f9   :  { %1093 = vmatpush.msra.mxu3 %v804_v32  ;;  %v782_v56 = vsel %vm746_vm8, %v10316_v41, %v3990_v19  ;;  %v10317_v32 = vld [vmem:[#allocation19_spill] sm:$0xff]  ;;  %v4200_v62 = vunpack.i.h.bf16 %v4198_v35  ;;  %v10324_v0 = vunpack.i.l.bf16 %v10313_v30  ;;  %v846_v31 = vsel %vm746_vm8, %v4179_v3, %v4194_v20 }
 0x1fa   :  { %1170 = vmatpush.msrb.mxu0 %v824_v38  ;;  %1055 = vmatpush.msrb.mxu1 %v10289_v7  ;;  %v10318_v6 = vunpack.i.h.bf16 %v10317_v32  ;;  %v10319_v49 = vunpack.i.l.bf16 %v10317_v32  ;;  %v4199_v38 = vunpack.i.l.bf16 %v4198_v35  ;;  %v847_v44 = vsel %vm746_vm8, %v4194_v20, %v4195_v47 }
 0x1fb   :  { %1094 = vmatpush.msra.mxu3 %v798_v59  ;;  %v10322_v59 = vld [vmem:[#allocation16_spill] sm:$0xff]  ;;  %v770_v34 = vsel %vm746_vm8, %v10324_v0, %v3955_v45  ;;  %v6894_v57 = vperm.slane %v23_v29, 1  ;;  %v6898_v40 = vperm.slane %v23_v29, 0  ;;  %v6902_v19 = vperm.slane %v23_v29, 2 }
 0x1fc   :  { %1171 = vmatpush.msrb.mxu0 %v818_v17  ;;  %1056 = vmatpush.msrb.mxu1 %v10293_v11  ;;  %v756_v18 = vsel %vm746_vm8, %v10319_v49, %v10318_v6  ;;  %v3920_v7 = vunpack.i.h.bf16 %v10322_v59  ;;  %v10323_v17 = vld [vmem:[#allocation21_spill] sm:$0xff]  ;;  %v854_v24 = vsel %vm746_vm8, %v4190_v52, %v4199_v38  ;;  %v10325_v11 = vld [vmem:[#allocation27_spill] sm:$0xff]  ;;  %v6913_v35 = vperm.slane %v23_v29, 5 }
 0x1fd   :  { %1095 = vmatpush.msra.mxu3 %v792_v2  ;;  %v852_v2 = vsel %vm746_vm8, %v4170_v26, %v4189_v37  ;;  %v848_v26 = vsel %vm746_vm8, %v4195_v47, %v4200_v62  ;;  %10329 = vst [vmem:[#allocation13_spill] sm:$0xff] %v6894_v57  ;;  %v6911_v37 = vperm.slane %v23_v29, 3 }
 0x1fe   :  { %1172 = vmatpush.msrb.mxu0 %v812_v36  ;;  %1057 = vmatpush.msrb.mxu1 %v10295_v16  ;;  %v10326_v36 = vunpack.i.l.bf16 %v10322_v59  ;;  %10330 = vst [vmem:[#allocation9_spill] sm:$0xff] %v6898_v40 }
 0x1ff   :  { %1096 = vmatpush.msra.mxu3 %v10296_v63  ;;  %v10328_v63 = vld [vmem:[#allocation17_spill] sm:$0xff]  ;;  %10331 = vst [vmem:[#allocation6_spill] sm:$0xff] %v6902_v19 }
 0x200   :  { %1173 = vmatpush.msrb.mxu0 %v806_v9  ;;  %1058 = vmatpush.msrb.mxu1 %v10302_v13  ;;  %v758_v21 = vsel %vm746_vm8, %v10326_v36, %v3920_v7  ;;  %10333 = vst [vmem:[#allocation15_spill] sm:$0xff] %v6911_v37 }
 0x201   :  { %1097 = vmatpush.msra.mxu3 %v780_v4  ;;  %10334 = vst [vmem:[#allocation7_spill] sm:$0xff] %v6913_v35 }
 0x202   :  { %1174 = vmatpush.msrb.mxu0 %v800_v5  ;;  %1059 = vmatpush.msrb.mxu1 %v10305_v50 }
 0x203   :  { %1098 = vmatpush.msra.mxu3 %v10306_v12 }
 0x204   :  { %1175 = vmatpush.msrb.mxu0 %v794_v51  ;;  %1060 = vmatpush.msrb.mxu1 %v10311_v8  ;;  %v6906_v51 = vperm.slane %v23_v29, 4 }
 0x205   :  { %1099 = vmatpush.msra.mxu3 %v768_v58 }
 0x206   :  { %1176 = vmatpush.msrb.mxu0 %v10312_v22  ;;  %1061 = vmatpush.msrb.mxu1 %v10314_v60  ;;  %10332 = vst [vmem:[#allocation5_spill] sm:$0xff] %v6906_v51 }
 0x207   :  { %1100 = vmatpush.msra.mxu3 %v10315_v28 }
 0x208   :  { %1177 = vmatpush.msrb.mxu0 %v782_v56  ;;  %1062 = vmatpush.msrb.mxu1 %v10320_v46 }
 0x209   :  { %1101 = vmatpush.msra.mxu3 %v756_v18  ;;  %1063 = vmatmul.f32.vlgmr.msrb.gmra.mxu1 %v6575_v27 }
 0x20a   :  { %1178 = vmatpush.msrb.mxu0 %v10321_v15  ;;  %1161 = vmatpush.msra.mxu1 %v853_v39 }
 0x20b   :  { %1102 = vmatpush.msra.mxu3 %v10323_v17 }
 0x20c   :  { %1179 = vmatpush.msrb.mxu0 %v770_v34  ;;  %1103 = vmatmul.f32.vlgmr.msra.gmra.mxu3 %v6575_v27 }
 0x20d   :  { %1121 = vmatpush.msrb.mxu3 %v852_v2  ;;  %1162 = vmatpush.msra.mxu1 %v847_v44 }
 0x20e   :  { %1180 = vmatpush.msrb.mxu0 %v10325_v11 }
 0x20f   :  { %1201 = vmatpush.msrb.mxu1 %v854_v24  ;;  %1122 = vmatpush.msrb.mxu3 %v846_v31 }
 0x210   :  { %1181 = vmatpush.msrb.mxu0 %v758_v21 }
 0x211   :  { %1202 = vmatpush.msrb.mxu1 %v848_v26 }
 0x212   :  { %1182 = vmatpush.msrb.mxu0 %v10327_v10  ;;  %3545 = vmatmul.msk.f32.vlgmr.msra.gmra.mxu1 %vm963_vm9, %v6476_v14 }
 0x213   :  { %1183 = vmatmul.f32.vlgmr.msrb.gmra.mxu0 %v6575_v27 }
 0x214   :  { %3544 = vmatmul.msk.f32.vlgmr.msrb.gmra.mxu3 %vm963_vm9, %v6476_v14 }
 0x21a   :  { %3546 = vmatmul.msk.f32.vlgmr.msrb.gmra.mxu1 %vm963_vm9, %v6476_v14 }
 0x22b   :  { %v1044_v16 = vpop.f32.mrf.mxu3 }
 0x24c   :  { %v1024_v3 = vpop.f32.mrf.mxu2 }
 0x24d   :  { %v1025_v48 = vadd.f32 %v1024_v3, %v10328_v63 }
 0x24f   :  { %v1045_v9 = vadd.f32 %v1044_v16, %v1025_v48 }
 0x251   :  { %v1221_v53 = vmul.f32 %v6894_v57, %v1045_v9 }
 0x253   :  { %1227 = vst [vmem:[#allocation2 + $0xd8] sm:$0xff] %v1221_v53 }
 0x26e   :  { %v984_v27 = vpop.f32.mrf.mxu0 }
 0x26f   :  { %v985_v1 = vadd.f32 %v984_v27, %v10328_v63 }
 0x270   :  { %v1004_v14 = vpop.f32.mrf.mxu1 }
 0x271   :  { %v1005_v4 = vadd.f32 %v1004_v14, %v985_v1 }
 0x272   :  { %v1084_v55 = vpop.f32.mrf.mxu3 }
 0x273   :  { %v1220_v13 = vmul.f32 %v6898_v40, %v1005_v4 }
 0x275   :  { %1226 = vst [vmem:[#allocation2] sm:$0xff] %v1220_v13 }
 0x278   :  { %v1144_v50 = vpop.f32.mrf.mxu2 }
 0x279   :  { %v1145_v54 = vadd.f32 %v1144_v50, %v10328_v63 }
 0x286   :  { %v1064_v5 = vpop.f32.mrf.mxu1 }
 0x287   :  { %v1065_v61 = vadd.f32 %v1064_v5, %v10328_v63 }
 0x289   :  { %v1085_v43 = vadd.f32 %v1084_v55, %v1065_v61 }
 0x28b   :  { %v1222_v12 = vmul.f32 %v6902_v19, %v1085_v43 }
 0x28d   :  { %1228 = vst [vmem:[#allocation2 + $0x18] sm:$0xff] %v1222_v12 }
 0x28f   :  { %v1104_v25 = vpop.f32.mrf.mxu3  ;;  %v1164_v42 = vpop.f32.mrf.mxu1 }
 0x290   :  { %v1165_v23 = vadd.f32 %v1164_v42, %v1145_v54  ;;  %v1184_v33 = vpop.f32.mrf.mxu0  ;;  %v1105_v8 = vadd.f32 %v1104_v25, %v10328_v63 }
 0x291   :  { %v1185_v52 = vadd.f32 %v1184_v33, %v10328_v63 }
 0x292   :  { %v1224_v58 = vmul.f32 %v6906_v51, %v1165_v23 }
 0x294   :  { %1230 = vst [vmem:[#allocation2 + $0x68] sm:$0xff] %v1224_v58 }
 0x297   :  { %v1124_v22 = vpop.f32.mrf.mxu3  ;;  %v1204_v30 = vpop.f32.mrf.mxu1 }
 0x298   :  { %v1125_v45 = vadd.f32 %v1124_v22, %v1105_v8  ;;  %v1205_v60 = vadd.f32 %v1204_v30, %v1185_v52 }
 0x29a   :  { %v1223_v28 = vmul.f32 %v6911_v37, %v1125_v45  ;;  %v1225_v41 = vmul.f32 %v6913_v35, %v1205_v60 }
 0x29c   :  { %1229 = vst [vmem:[#allocation2 + $0x50] sm:$0xff] %v1223_v28 }
 0x29d   :  { %1231 = vst [vmem:[#allocation2 + $0x30] sm:$0xff] %v1225_v41 }
 0x29e LB: > { %s6922_s21 = sld [smem:[#allocation3]]  ;;  %s1241_s22 = ssub.s32 0, %s5392_s5  ;;  %s5392_s5 = sphi %s6917_s5, %s1237_s5  }
 0x29f   : > { %p1240_p0 = scmp.lt.s32.totalorder %s5392_s5, 0  ;;  %s3547_s23 = smin.u32 %s5392_s5, %s1241_s22 }
 0x2a0   : > { %s1243_s24 = sand.u32 1, %s3547_s23  }
 0x2a1   : > { %s1244_s25 = ssub.s32 0, %s1243_s24 }
 0x2a2   : > { %s10712_s25 = smov (!%p1240_p0, %s1244_s25), %s1243_s24 }
 0x2a3   : > { %p3549_p1 = scmp.lt.s32.totalorder %s10712_s25, 0  ;;  %s1250_s26 = sadd.s32 2, %s10712_s25 }
 0x2a4   : > { %p1239_p2 = scmp.eq.s32.totalorder %s6922_s21, 0 }
 0x2a5   : > { %s10714_s26 = smov (!%p3549_p1, %s1250_s26), %s10712_s25 }
 0x2a6   : > { %p1252_p3 = scmp.eq.s32.totalorder %s10714_s26, 0 }
 0x2a8   : > { %p1253_p4 = pnand %p1252_p3, %p1239_p2 }
 0x2aa   : > { %1256 = sbr.rel (%p1253_p4) target bundleno = 1550 (0x60e), region = 36 }
 0x2af   : > { %v1267_v56 = vld [vmem:[#allocation2 + $0x88] sm:$0xff]  ;;  %v1263_v20 = vld [vmem:[#allocation2 + $0x50] sm:$0xff]  ;;  %v1260_v18 = vld [vmem:[#allocation2] sm:$0xff]  ;;  %s5406_s27 = smov 127   ;;  %s5407_s28 = smov 126   ;;  %v5413_v4 = vmov 0  }
 0x2b0   : > { %v1268_v47 = vld [vmem:[#allocation2 + $0xe8] sm:$0xff]  ;;  %v1259_v49 = vld [vmem:[#allocation2 + $0xb0] sm:$0xff]  ;;  %v1269_v15 = vld [vmem:[#allocation2 + $0xb8] sm:$0xff]  ;;  %s5408_s29 = smov 110   ;;  %s5409_s30 = smov 109   ;;  %4477 = vset.pattern.permute.xlu1 %v5413_v4  ;;  %4793 = vset.pattern.permute.xlu0 %v5413_v4 }
 0x2b1   : > { %v6933_v32 = vpack.i.bf16 %v1268_v47, %v1267_v56  ;;  %v1264_v6 = vld [vmem:[#allocation2 + $0x68] sm:$0xff]  ;;  %v6937_v46 = vpack.i.bf16 %v1260_v18, %v1259_v49  ;;  %v1270_v39 = vld [vmem:[#allocation2 + $0x60] sm:$0xff]  ;;  %v1265_v59 = vld [vmem:[#allocation2 + $0x30] sm:$0xff]  ;;  %s5410_s0 = smov 108   ;;  %v6985_v29 = vpack.i.bf16 %v1269_v15, %v1268_v47  ;;  %s5411_s7 = smov 92  }
 0x2b2   : > { %v6935_v38 = vpack.i.bf16 %v1264_v6, %v1263_v20  ;;  %v1266_v7 = vld [vmem:[#allocation2 + $0x80] sm:$0xff]  ;;  %v1261_v62 = vld [vmem:[#allocation2 + $0xd8] sm:$0xff]  ;;  %v6942_v0 = vpack.i.bf16 %v1270_v39, %v1269_v15  ;;  %v1271_v44 = vld [vmem:[#allocation2 + $0xf0] sm:$0xff]  ;;  %v6968_v31 = vpack.i.bf16 %v1265_v59, %v1264_v6  ;;  %s5412_s8 = smov 91   ;;  %s5414_s9 = smov 90  }
 0x2b3   : > { %4223 = vrot.lane.b32.xlu2 %v6933_v32, %s5406_s27  ;;  %4203 = vrot.lane.b32.xlu0 %v6937_v46, %s5406_s27  ;;  %v1262_v17 = vld [vmem:[#allocation2 + $0x18] sm:$0xff]  ;;  %v6944_v34 = vpack.i.bf16 %v1266_v7, %v1265_v59  ;;  %v1272_v24 = vld [vmem:[#allocation2 + $0x8] sm:$0xff]  ;;  %v6972_v21 = vpack.i.bf16 %v1261_v62, %v1260_v18  ;;  %v6983_v10 = vpack.i.bf16 %v1271_v44, %v1270_v39  ;;  %s5415_s10 = smov 19   ;;  %s5416_s3 = smov 1  }
 0x2b4   : > { %4213 = vrot.lane.b32.xlu1 %v6935_v38, %s5406_s27  ;;  %v6946_v2 = vpack.i.bf16 %v1262_v17, %v1261_v62  ;;  %v6951_v11 = vpack.i.bf16 %v1272_v24, %v1271_v44  ;;  %v6970_v36 = vpack.i.bf16 %v1263_v20, %v1262_v17  ;;  %v1273_v26 = vld [vmem:[#allocation2 + $0x48] sm:$0xff]  ;;  %v1274_v16 = vld [vmem:[#allocation2 + $0x78] sm:$0xff]  ;;  %2365 = sst [smem:[#allocation4]] %s5416_s3 }
 0x2b5   : > { %v6987_v3 = vpack.i.bf16 %v1267_v56, %v1273_v26  ;;  %v6992_v63 = vpack.i.bf16 %v1274_v16, %v1272_v24 }
 0x2bb   : > { %4228 = vrot.lane.b32.xlu2 %v6942_v0, %s5406_s27  ;;  %4208 = vrot.lane.b32.xlu0 %v6946_v2, %s5406_s27 }
 0x2bc   : > { %4218 = vrot.lane.b32.xlu1 %v6944_v34, %s5406_s27 }
 0x2c3   : > { %4243 = vrot.lane.b32.xlu2 %v6946_v2, %s5407_s28  ;;  %4233 = vrot.lane.b32.xlu0 %v6951_v11, %s5406_s27 }
 0x2c4   : > { %4238 = vrot.lane.b32.xlu1 %v6937_v46, %s5407_s28 }
 0x2cb   : > { %4258 = vrot.lane.b32.xlu2 %v6933_v32, %s5407_s28  ;;  %4248 = vrot.lane.b32.xlu0 %v6935_v38, %s5407_s28 }
 0x2cc   : > { %4253 = vrot.lane.b32.xlu1 %v6944_v34, %s5407_s28 }
 0x2d3   : > { %4273 = vrot.lane.b32.xlu2 %v6937_v46, %s5408_s29  ;;  %4263 = vrot.lane.b32.xlu0 %v6942_v0, %s5407_s28 }
 0x2d4   : > { %4268 = vrot.lane.b32.xlu1 %v6951_v11, %s5407_s28 }
 0x2db   : > { %4288 = vrot.lane.b32.xlu2 %v6944_v34, %s5408_s29  ;;  %4278 = vrot.lane.b32.xlu0 %v6946_v2, %s5408_s29 }
 0x2dc   : > { %4283 = vrot.lane.b32.xlu1 %v6935_v38, %s5408_s29 }
 0x2e3   : > { %4303 = vrot.lane.b32.xlu2 %v6951_v11, %s5408_s29  ;;  %4293 = vrot.lane.b32.xlu0 %v6933_v32, %s5408_s29 }
 0x2e4   : > { %4298 = vrot.lane.b32.xlu1 %v6942_v0, %s5408_s29 }
 0x2eb   : > { %4318 = vrot.lane.b32.xlu2 %v6968_v31, %s5409_s30  ;;  %4308 = vrot.lane.b32.xlu0 %v6972_v21, %s5409_s30 }
 0x2ec   : > { %4313 = vrot.lane.b32.xlu1 %v6970_v36, %s5409_s30 }
 0x2f3   : > { %4333 = vrot.lane.b32.xlu2 %v6951_v11, %s5409_s30  ;;  %4323 = vrot.lane.b32.xlu0 %v6933_v32, %s5409_s30 }
 0x2f4   : > { %4328 = vrot.lane.b32.xlu1 %v6942_v0, %s5409_s30 }
 0x2fb   : > { %4348 = vrot.lane.b32.xlu2 %v6968_v31, %s5410_s0  ;;  %4338 = vrot.lane.b32.xlu0 %v6972_v21, %s5410_s0 }
 0x2fc   : > { %4343 = vrot.lane.b32.xlu1 %v6970_v36, %s5410_s0 }
 0x303   : > { %4363 = vrot.lane.b32.xlu2 %v6983_v10, %s5410_s0  ;;  %4353 = vrot.lane.b32.xlu0 %v6987_v3, %s5410_s0 }
 0x304   : > { %4358 = vrot.lane.b32.xlu1 %v6985_v29, %s5410_s0 }
 0x30b   : > { %4378 = vrot.lane.b32.xlu2 %v6970_v36, %s5411_s7  ;;  %4368 = vrot.lane.b32.xlu0 %v6992_v63, %s5410_s0 }
 0x30c   : > { %4373 = vrot.lane.b32.xlu1 %v6972_v21, %s5411_s7 }
 0x30d   : > { %v4224_v48 = vpop.permute.xlu2 %4223 }
 0x30e   : > { %v4226_v9 = vunpack.i.h.bf16 %v4224_v48  ;;  %v4225_v55 = vunpack.i.l.bf16 %v4224_v48 }
 0x310   : > { %v7020_v12 = vsel %vm193_vm0, %v4225_v55, %v4226_v9 }
 0x311   : > { %10336 = vst [vmem:[#allocation36_spill] sm:$0xff] %v7020_v12 }
 0x313   : > { %4393 = vrot.lane.b32.xlu2 %v6985_v29, %s5411_s7  ;;  %4383 = vrot.lane.b32.xlu0 %v6968_v31, %s5411_s7 }
 0x314   : > { %4388 = vrot.lane.b32.xlu1 %v6987_v3, %s5411_s7 }
 0x315   : > { %v4229_v53 = vpop.permute.xlu2 %4228 }
 0x316   : > { %v4230_v27 = vunpack.i.l.bf16 %v4229_v53  ;;  %v4231_v30 = vunpack.i.h.bf16 %v4229_v53 }
 0x318   : > { %v7001_v1 = vsel %vm193_vm0, %v4226_v9, %v4230_v27  ;;  %v7057_v47 = vsel %vm193_vm0, %v4230_v27, %v4231_v30 }
 0x319   : > { %10335 = vst [vmem:[#allocation35_spill] sm:$0xff] %v7001_v1 }
 0x31a   : > { %10337 = vst [vmem:[#allocation37_spill] sm:$0xff] %v7057_v47 }
 0x31b   : > { %4408 = vrot.lane.b32.xlu2 %v6972_v21, %s5412_s8  ;;  %4398 = vrot.lane.b32.xlu0 %v6983_v10, %s5411_s7 }
 0x31c   : > { %4403 = vrot.lane.b32.xlu1 %v6992_v63, %s5411_s7 }
 0x31d   : > { %v7006_v14 = vpop.permute.xlu2 %4243 }
 0x31e   : > { %v4245_v45 = vunpack.i.l.bf16 %v7006_v14  ;;  %v4246_v59 = vunpack.i.h.bf16 %v7006_v14 }
 0x323   : > { %4423 = vrot.lane.b32.xlu2 %v6987_v3, %s5412_s8  ;;  %4413 = vrot.lane.b32.xlu0 %v6970_v36, %s5412_s8 }
 0x324   : > { %4418 = vrot.lane.b32.xlu1 %v6968_v31, %s5412_s8 }
 0x325   : > { %v7011_v13 = vpop.permute.xlu2 %4258  ;;  %v7015_v61 = vpop.permute.xlu0 %4203 }
 0x326   : > { %v7013_v5 = vpop.permute.xlu1 %4213  ;;  %v9960_v62 = vunpack.i.l.bf16 %v7011_v13  ;;  %v4206_v7 = vunpack.i.h.bf16 %v7015_v61 }
 0x327   : > { %v4216_v43 = vunpack.i.h.bf16 %v7013_v5  ;;  %v4215_v50 = vunpack.i.l.bf16 %v7013_v5 }
 0x329   : > { %v7025_v54 = vsel %vm193_vm0, %v4215_v50, %v4216_v43 }
 0x32b   : > { %4438 = vrot.lane.b32.xlu2 %v6992_v63, %s5412_s8  ;;  %4428 = vrot.lane.b32.xlu0 %v6985_v29, %s5412_s8 }
 0x32c   : > { %4433 = vrot.lane.b32.xlu1 %v6983_v10, %s5412_s8 }
 0x32d   : > { %v7032_v42 = vpop.permute.xlu2 %4273  ;;  %v7036_v58 = vpop.permute.xlu0 %4208 }
 0x32e   : > { %v7034_v23 = vpop.permute.xlu1 %4218 }
 0x32f   : > { %v4221_v33 = vunpack.i.h.bf16 %v7034_v23  ;;  %v9963_v8 = vunpack.i.l.bf16 %v7034_v23 }
 0x331   : > { %v1323_v52 = vsel %vm193_vm0, %v4221_v33, %v4225_v55  ;;  %v1322_v22 = vsel %vm193_vm0, %v4216_v43, %v9963_v8  ;;  %v10346_v43 = vld [vmem:[#allocation14_spill] sm:$0xff]  ;;  %v9961_v33 = vunpack.i.h.bf16 %v7011_v13  ;;  %v4275_v55 = vunpack.i.l.bf16 %v7032_v42 }
 0x333   : > { %4453 = vrot.lane.b32.xlu2 %v6968_v31, %s5414_s9  ;;  %4443 = vrot.lane.b32.xlu0 %v6972_v21, %s5414_s9  ;;  %v7087_v31 = vsel %vm234_vm3, %v4245_v45, %v4246_v59 }
 0x334   : > { %4448 = vrot.lane.b32.xlu1 %v6970_v36, %s5414_s9  ;;  %10340 = vst [vmem:[#allocation40_spill] sm:$0xff] %v7087_v31 }
 0x335   : > { %v7051_v60 = vpop.permute.xlu2 %4288  ;;  %v7054_v56 = vpop.permute.xlu0 %4233 }
 0x336   : > { %v4290_v28 = vunpack.i.l.bf16 %v7051_v60  ;;  %v4239_v41 = vpop.permute.xlu1 %4238  ;;  %v4235_v6 = vunpack.i.l.bf16 %v7054_v56  ;;  %v9958_v15 = vunpack.i.h.bf16 %v7054_v56 }
 0x337   : > { %v4241_v20 = vunpack.i.h.bf16 %v4239_v41  ;;  %v4240_v17 = vunpack.i.l.bf16 %v4239_v41 }
 0x338   : > { %v7062_v49 = vpack.i.bf16 %v4290_v28, %v1322_v22  ;;  %v7069_v39 = vsel %vm193_vm0, %v4231_v30, %v4235_v6  ;;  %v1328_v44 = vsel %vm193_vm0, %v4235_v6, %v9958_v15 }
 0x339   : > { %v7065_v18 = vsel %vm234_vm3, %v4241_v20, %v4245_v45  ;;  %10339 = vst [vmem:[#allocation39_spill] sm:$0xff] %v7069_v39  ;;  %v7103_v9 = vsel %vm234_vm3, %v4240_v17, %v4241_v20 }
 0x33a   : > { %10338 = vst [vmem:[#allocation38_spill] sm:$0xff] %v7062_v49 }
 0x33b   : > { %4468 = vrot.lane.b32.xlu2 %v6983_v10, %s5414_s9  ;;  %4458 = vrot.lane.b32.xlu0 %v6987_v3, %s5414_s9  ;;  %10342 = vst [vmem:[#allocation42_spill] sm:$0xff] %v7103_v9 }
 0x33c   : > { %4463 = vrot.lane.b32.xlu1 %v6985_v29, %s5414_s9 }
 0x33d   : > { %v7084_v24 = vpop.permute.xlu2 %4303  ;;  %v7092_v26 = vpop.permute.xlu0 %4248 }
 0x33e   : > { %v4306_v36 = vunpack.i.h.bf16 %v7084_v24  ;;  %v7090_v21 = vpop.permute.xlu1 %4253  ;;  %v4251_v3 = vunpack.i.h.bf16 %v7092_v26  ;;  %v4250_v16 = vunpack.i.l.bf16 %v7092_v26 }
 0x33f   : > { %v4256_v10 = vunpack.i.h.bf16 %v7090_v21  ;;  %v9959_v29 = vunpack.i.l.bf16 %v7090_v21 }
 0x340   : > { %v7100_v48 = vpack.i.bf16 %v4306_v36, %v1328_v44  ;;  %v7120_v14 = vsel %vm234_vm3, %v4246_v59, %v4250_v16 }
 0x341   : > { %v7108_v53 = vsel %vm234_vm3, %v4256_v10, %v9960_v62  ;;  %v7115_v27 = vsel %vm234_vm3, %v4251_v3, %v9959_v29  ;;  %10345 = vst [vmem:[#allocation45_spill] sm:$0xff] %v7120_v14 }
 0x342   : > { %10341 = vst [vmem:[#allocation41_spill] sm:$0xff] %v7100_v48 }
 0x343   : > { %10343 = vst [vmem:[#allocation43_spill] sm:$0xff] %v7108_v53  ;;  %4473 = vrot.lane.b32.xlu0 %v6992_v63, %s5414_s9  ;;  %4479 = vrot.lane.b32.xlu2 %v6937_v46, %s5415_s10 }
 0x344   : > { %10344 = vst [vmem:[#allocation44_spill] sm:$0xff] %v7115_v27  ;;  %1607 = vperm.xlu1 %4477, %v10346_v43   ;;  %v4276_v43 = vunpack.i.h.bf16 %v7032_v42 }
 0x345   : > { %v7130_v22 = vpop.permute.xlu2 %4318  ;;  %v4264_v41 = vpop.permute.xlu0 %4263 }
 0x346   : > { %v9966_v30 = vunpack.i.h.bf16 %v7130_v22  ;;  %v7133_v45 = vpop.permute.xlu1 %4268  ;;  %v4266_v6 = vunpack.i.h.bf16 %v4264_v41  ;;  %v4265_v59 = vunpack.i.l.bf16 %v4264_v41  ;;  %v7165_v42 = vsel %vm275_vm1, %v4275_v55, %v4276_v43 }
 0x347   : > { %v4270_v20 = vunpack.i.l.bf16 %v7133_v45  ;;  %v9962_v41 = vunpack.i.h.bf16 %v7133_v45  ;;  %10350 = vst [vmem:[#allocation49_spill] sm:$0xff] %v7165_v42 }
 0x348   : > { %v7138_v17 = vpack.i.bf16 %v1323_v52, %v9966_v30  ;;  %v7146_v63 = vsel %vm234_vm3, %v9961_v33, %v4265_v59  ;;  %v7149_v10 = vsel %vm234_vm3, %v4265_v59, %v4266_v6  ;;  %v4205_v59 = vunpack.i.l.bf16 %v7015_v61 }
 0x349   : > { %v7141_v44 = vsel %vm234_vm3, %v4266_v6, %v4270_v20  ;;  %10348 = vst [vmem:[#allocation47_spill] sm:$0xff] %v7146_v63  ;;  %v1368_v4 = vsel %vm234_vm3, %v4270_v20, %v9962_v41  ;;  %v4211_v33 = vunpack.i.h.bf16 %v7036_v58 }
 0x34a   : > { %10347 = vst [vmem:[#allocation46_spill] sm:$0xff] %v7138_v17 }
 0x34b   : > { %10349 = vst [vmem:[#allocation48_spill] sm:$0xff] %v7149_v10  ;;  %4484 = vrot.lane.b32.xlu0 %v6946_v2, %s5415_s10  ;;  %4494 = vrot.lane.b32.xlu2 %v6944_v34, %s5415_s10 }
 0x34c   : > { %4489 = vrot.lane.b32.xlu1 %v6935_v38, %s5415_s10 }
 0x34d   : > { %v7161_v6 = vpop.permute.xlu2 %4333  ;;  %v4279_v38 = vpop.permute.xlu0 %4278 }
 0x34e   : > { %v9964_v25 = vunpack.i.h.bf16 %v7161_v6  ;;  %v4284_v52 = vpop.permute.xlu1 %4283  ;;  %v4281_v2 = vunpack.i.h.bf16 %v4279_v38  ;;  %v4280_v62 = vunpack.i.l.bf16 %v4279_v38  ;;  %v4210_v38 = vunpack.i.l.bf16 %v7036_v58 }
 0x34f   : > { %v4286_v15 = vunpack.i.h.bf16 %v4284_v52  ;;  %v4285_v29 = vunpack.i.l.bf16 %v4284_v52  ;;  %v1317_v58 = vsel %vm193_vm0, %v4205_v59, %v4206_v7 }
 0x350   : > { %v7174_v61 = vpack.i.bf16 %v9964_v25, %v1368_v4  ;;  %v7188_v52 = vsel %vm275_vm1, %v4276_v43, %v4280_v62  ;;  %v7192_v8 = vsel %vm275_vm1, %v4280_v62, %v4281_v2  ;;  %v4291_v62 = vunpack.i.h.bf16 %v7051_v60 }
 0x351   : > { %v7179_v55 = vsel %vm275_vm1, %v4286_v15, %v4290_v28  ;;  %v7182_v20 = vsel %vm275_vm1, %v4285_v29, %v4286_v15  ;;  %v7185_v41 = vsel %vm275_vm1, %v4281_v2, %v4285_v29  ;;  %v4305_v29 = vunpack.i.l.bf16 %v7084_v24 }
 0x352   : > { %10351 = vst [vmem:[#allocation50_spill] sm:$0xff] %v7174_v61  ;;  %v1320_v2 = vsel %vm193_vm0, %v4211_v33, %v4215_v50  ;;  %v1318_v28 = vsel %vm193_vm0, %v4206_v7, %v4210_v38  ;;  %v1319_v4 = vsel %vm193_vm0, %v4210_v38, %v4211_v33 }
 0x353   : > { %10352 = vst [vmem:[#allocation51_spill] sm:$0xff] %v7179_v55  ;;  %4499 = vrot.lane.b32.xlu0 %v6933_v32, %s5415_s10  ;;  %v4518_v33 = vpack.i.bf16 %v1320_v2, %v1319_v4  ;;  %v4513_v38 = vpack.i.bf16 %v1318_v28, %v1317_v58  ;;  %v1361_v2 = vsel %vm234_vm3, %v4250_v16, %v4251_v3  ;;  %v9973_v3 = vunpack.i.l.bf16 %v7161_v6 }
 0x354   : > { %10353 = vst [vmem:[#allocation52_spill] sm:$0xff] %v7182_v20  ;;  %4504 = vrot.lane.b32.xlu1 %v6942_v0, %s5415_s10  ;;  %v7217_v0 = vsel %vm275_vm1, %v4305_v29, %v4306_v36  ;;  %4509 = vrot.lane.b32.xlu2 %v6951_v11, %s5415_s10  ;;  %v10370_v11 = vunpack.i.l.bf16 %v7161_v6 }
 0x355   : > { %10354 = vst [vmem:[#allocation53_spill] sm:$0xff] %v7185_v41  ;;  %v7207_v43 = vpop.permute.xlu2 %4348  ;;  %v7219_v15 = vpop.permute.xlu0 %4293 }
 0x356   : > { %10355 = vst [vmem:[#allocation54_spill] sm:$0xff] %v7217_v0  ;;  %v4299_v32 = vpop.permute.xlu1 %4298  ;;  %v9965_v25 = vunpack.i.h.bf16 %v7219_v15  ;;  %v9967_v5 = vunpack.i.l.bf16 %v7219_v15  ;;  %v10364_v0 = vunpack.i.l.bf16 %v7130_v22  ;;  %v10367_v61 = vunpack.i.h.bf16 %v7219_v15 }
 0x357   : > { %v4301_v59 = vunpack.i.h.bf16 %v4299_v32  ;;  %v4300_v60 = vunpack.i.l.bf16 %v4299_v32  ;;  %v10368_v47 = vunpack.i.l.bf16 %v7219_v15 }
 0x358   : > { %v7235_v36 = vsel %vm275_vm1, %v4291_v62, %v9967_v5 }
 0x359   : > { %v1407_v50 = vsel %vm275_vm1, %v4301_v59, %v4305_v29  ;;  %v7225_v7 = vsel %vm275_vm1, %v4300_v60, %v4301_v59  ;;  %v7230_v24 = vsel %vm275_vm1, %v9965_v25, %v4300_v60  ;;  %10356 = vst [vmem:[#allocation55_spill] sm:$0xff] %v7235_v36  ;;  %v9968_v59 = vunpack.i.l.bf16 %v7130_v22 }
 0x35a   : > { %v10363_v36 = vunpack.i.h.bf16 %v7130_v22 }
 0x35b   : > { %4514 = vrot.lane.b32.xlu0 %v4513_v38, %s5415_s10 }
 0x35c   : > { %4519 = vrot.lane.b32.xlu1 %v4518_v33, %s5415_s10 }
 0x35d   : > { %v7244_v60 = vpop.permute.xlu2 %4363  ;;  %v7246_v30 = vpop.permute.xlu0 %4308 }
 0x35e   : > { %v4314_v25 = vpop.permute.xlu1 %4313  ;;  %v9971_v28 = vunpack.i.h.bf16 %v7246_v30  ;;  %v9970_v58 = vunpack.i.l.bf16 %v7246_v30  ;;  %v10373_v31 = vunpack.i.l.bf16 %v7246_v30 }
 0x35f   : > { %v4316_v62 = vunpack.i.h.bf16 %v4314_v25  ;;  %v4315_v4 = vunpack.i.l.bf16 %v4314_v25 }
 0x360   : > { %v7270_v29 = vpack.i.bf16 %v9970_v58, %v1361_v2 }
 0x361   : > { %v7258_v33 = vsel %vm312_vm2, %v4316_v62, %v9968_v59  ;;  %v7261_v38 = vsel %vm312_vm2, %v4315_v4, %v4316_v62  ;;  %v7266_v25 = vsel %vm312_vm2, %v9971_v28, %v4315_v4  ;;  %v4351_v28 = vunpack.i.h.bf16 %v7207_v43 }
 0x362   : > { %10357 = vst [vmem:[#allocation56_spill] sm:$0xff] %v7270_v29 }
 0x365   : > { %v7275_v16 = vpop.permute.xlu2 %4378  ;;  %v7277_v5 = vpop.permute.xlu0 %4323 }
 0x366   : > { %v4329_v32 = vpop.permute.xlu1 %4328  ;;  %v9977_v35 = vunpack.i.h.bf16 %v7277_v5  ;;  %v9979_v4 = vunpack.i.l.bf16 %v7277_v5  ;;  %v10380_v1 = vunpack.i.h.bf16 %v7277_v5 }
 0x367   : > { %v4331_v62 = vunpack.i.h.bf16 %v4329_v32  ;;  %v4330_v59 = vunpack.i.l.bf16 %v4329_v32 }
 0x368   : > { %v7298_v32 = vpack.i.bf16 %v9979_v4, %v7141_v44 }
 0x369   : > { %v7284_v2 = vsel %vm312_vm2, %v4331_v62, %v9973_v3  ;;  %v7287_v26 = vsel %vm312_vm2, %v4330_v59, %v4331_v62  ;;  %v7292_v58 = vsel %vm312_vm2, %v9977_v35, %v4330_v59  ;;  %v4350_v3 = vunpack.i.l.bf16 %v7207_v43 }
 0x36a   : > { %10358 = vst [vmem:[#allocation57_spill] sm:$0xff] %v7298_v32  ;;  %v10381_v32 = vunpack.i.l.bf16 %v7277_v5 }
 0x36b   : > { %v1477_v62 = vsel %vm353_vm4, %v4350_v3, %v4351_v28 }
 0x36c   : > { %v7468_v29 = vsel %vm312_vm2, %v10381_v32, %v10380_v1 }
 0x36d   : > { %v7303_v51 = vpop.permute.xlu2 %4393  ;;  %v7306_v40 = vpop.permute.xlu0 %4338 }
 0x36e   : > { %v4344_v19 = vpop.permute.xlu1 %4343  ;;  %v9982_v57 = vunpack.i.h.bf16 %v7306_v40  ;;  %v9983_v49 = vunpack.i.l.bf16 %v7306_v40 }
 0x36f   : > { %v4346_v59 = vunpack.i.h.bf16 %v4344_v19  ;;  %v4345_v35 = vunpack.i.l.bf16 %v4344_v19  ;;  %v9991_v19 = vunpack.i.h.bf16 %v7244_v60 }
 0x370   : > { %v7323_v4 = vpack.i.bf16 %v1477_v62, %v9983_v49  ;;  %v9994_v49 = vunpack.i.h.bf16 %v7275_v16 }
 0x371   : > { %v7311_v44 = vsel %vm353_vm4, %v4346_v59, %v4350_v3  ;;  %v7314_v37 = vsel %vm353_vm4, %v4345_v35, %v4346_v59  ;;  %v7319_v43 = vsel %vm353_vm4, %v9982_v57, %v4345_v35 }
 0x372   : > { %10359 = vst [vmem:[#allocation58_spill] sm:$0xff] %v7323_v4 }
 0x375   : > { %v7327_v17 = vpop.permute.xlu2 %4408  ;;  %v4354_v3 = vpop.permute.xlu0 %4353 }
 0x376   : > { %v7329_v9 = vpop.permute.xlu1 %4358  ;;  %v4356_v27 = vunpack.i.h.bf16 %v4354_v3  ;;  %v4355_v48 = vunpack.i.l.bf16 %v4354_v3 }
 0x377   : > { %v9986_v59 = vunpack.i.l.bf16 %v7329_v9 }
 0x378   : > { %v7337_v57 = vpack.i.bf16 %v4356_v27, %v1407_v50  ;;  %v7340_v62 = vsel %vm353_vm4, %v4351_v28, %v4355_v48 }
 0x379   : > { %v7335_v35 = vsel %vm353_vm4, %v4356_v27, %v9986_v59  ;;  %10361 = vst [vmem:[#allocation60_spill] sm:$0xff] %v7340_v62 }
 0x37a   : > { %10360 = vst [vmem:[#allocation59_spill] sm:$0xff] %v7337_v57 }
 0x37d   : > { %v7347_v42 = vpop.permute.xlu2 %4423  ;;  %v7351_v55 = vpop.permute.xlu0 %4368 }
 0x37e   : > { %v7349_v3 = vpop.permute.xlu1 %4373  ;;  %v9992_v27 = vunpack.i.l.bf16 %v7351_v55  ;;  %v4371_v10 = vunpack.i.h.bf16 %v7351_v55 }
 0x380   : > { %v7359_v48 = vsel %vm353_vm4, %v9991_v19, %v9992_v27  ;;  %v7374_v19 = vsel %vm312_vm2, %v10364_v0, %v10363_v36  ;;  %v10369_v36 = vunpack.i.h.bf16 %v7161_v6 }
 0x381   : > { %10362 = vst [vmem:[#allocation61_spill] sm:$0xff] %v7359_v48 }
 0x382   : > { %10365 = vst [vmem:[#allocation62_spill] sm:$0xff] %v7374_v19  ;;  %v7417_v19 = vsel %vm312_vm2, %v10370_v11, %v10369_v36  ;;  %v10375_v11 = vunpack.i.l.bf16 %v7034_v23 }
 0x383   : > { %10371 = vst [vmem:[#allocation64_spill] sm:$0xff] %v7417_v19 }
 0x385   : > { %v7363_v46 = vpop.permute.xlu2 %4438  ;;  %v4384_v28 = vpop.permute.xlu0 %4383 }
 0x386   : > { %v7365_v50 = vpop.permute.xlu1 %4388  ;;  %v4386_v62 = vunpack.i.h.bf16 %v4384_v28  ;;  %v4385_v53 = vunpack.i.l.bf16 %v4384_v28  ;;  %v7389_v28 = vsel %vm275_vm1, %v10368_v47, %v10367_v61 }
 0x387   : > { %v4390_v59 = vunpack.i.l.bf16 %v7365_v50 }
 0x388   : > { %v7382_v27 = vsel %vm394_vm5, %v9994_v49, %v4385_v53  ;;  %v7392_v22 = vsel %vm394_vm5, %v4385_v53, %v4386_v62 }
 0x389   : > { %v7377_v34 = vsel %vm394_vm5, %v4386_v62, %v4390_v59 }
 0x38a   : > { %10366 = vst [vmem:[#allocation63_spill] sm:$0xff] %v7377_v34  ;;  %v10372_v34 = vunpack.i.h.bf16 %v7246_v30 }
 0x38c   : > { %v7424_v14 = vsel %vm312_vm2, %v10373_v31, %v10372_v34  ;;  %v4425_v31 = vunpack.i.l.bf16 %v7347_v42 }
 0x38d   : > { %v7402_v49 = vpop.permute.xlu2 %4453  ;;  %v7406_v15 = vpop.permute.xlu0 %4398 }
 0x38e   : > { %v10000_v47 = vunpack.i.h.bf16 %v7402_v49  ;;  %v4455_v61 = vunpack.i.l.bf16 %v7402_v49  ;;  %v4404_v53 = vpop.permute.xlu1 %4403  ;;  %v10002_v39 = vunpack.i.h.bf16 %v7406_v15 }
 0x38f   : > { %v4406_v62 = vunpack.i.h.bf16 %v4404_v53  ;;  %v4405_v0 = vunpack.i.l.bf16 %v4404_v53 }
 0x390   : > { %v1597_v59 = vsel %vm476_vm7, %v4455_v61, %v10000_v47 }
 0x391   : > { %v7427_v53 = vsel %vm394_vm5, %v4405_v0, %v4406_v62  ;;  %v7432_v47 = vsel %vm394_vm5, %v10002_v39, %v4405_v0  ;;  %v7440_v30 = vpack.i.bf16 %v10375_v11, %v1597_v59  ;;  %v10377_v59 = vunpack.i.h.bf16 %v7011_v13 }
 0x392   : > { %10374 = vst [vmem:[#allocation65_spill] sm:$0xff] %v7427_v53  ;;  %v10378_v11 = vunpack.i.l.bf16 %v7011_v13 }
 0x393   : > { %10376 = vst [vmem:[#allocation66_spill] sm:$0xff] %v7440_v30 }
 0x394   : > { %v7461_v30 = vsel %vm234_vm3, %v10378_v11, %v10377_v59  ;;  %v10384_v11 = vunpack.i.h.bf16 %v7133_v45 }
 0x395   : > { %v7443_v34 = vpop.permute.xlu2 %4468  ;;  %v7449_v39 = vpop.permute.xlu0 %4413  ;;  %10379 = vst [vmem:[#allocation67_spill] sm:$0xff] %v7461_v30 }
 0x396   : > { %v10005_v62 = vunpack.i.h.bf16 %v7443_v34  ;;  %v4470_v12 = vunpack.i.l.bf16 %v7443_v34  ;;  %v7447_v0 = vpop.permute.xlu1 %4418  ;;  %v4415_v41 = vunpack.i.l.bf16 %v7449_v39  ;;  %v4416_v48 = vunpack.i.h.bf16 %v7449_v39 }
 0x397   : > { %v4421_v6 = vunpack.i.h.bf16 %v7447_v0  ;;  %v10383_v63 = vunpack.i.l.bf16 %v7447_v0 }
 0x398   : > { %v1602_v23 = vsel %vm476_vm7, %v4470_v12, %v10005_v62 }
 0x399   : > { %v7471_v36 = vsel %vm435_vm6, %v4421_v6, %v4425_v31  ;;  %v7476_v62 = vsel %vm435_vm6, %v10383_v63, %v4421_v6  ;;  %v7484_v5 = vpack.i.bf16 %v1602_v23, %v10384_v11  ;;  %v10012_v31 = vunpack.i.h.bf16 %v7347_v42 }
 0x39a   : > { %10382 = vst [vmem:[#allocation68_spill] sm:$0xff] %v7471_v36  ;;  %v4411_v23 = vunpack.i.h.bf16 %v7327_v17  ;;  %v10386_v11 = vunpack.i.l.bf16 %v7351_v55  ;;  %v1555_v55 = vsel %vm435_vm6, %v4415_v41, %v4416_v48 }
 0x39b   : > { %10385 = vst [vmem:[#allocation69_spill] sm:$0xff] %v7484_v5 }
 0x39c   : > { %v1484_v5 = vsel %vm353_vm4, %v10386_v11, %v4371_v10  ;;  %v1554_v10 = vsel %vm435_vm6, %v4411_v23, %v4415_v41  ;;  %v10389_v41 = vunpack.i.h.bf16 %v7402_v49  ;;  %v4376_v49 = vunpack.i.h.bf16 %v7349_v3 }
 0x39d   : > { %v4429_v32 = vpop.permute.xlu0 %4428 }
 0x39e   : > { %v7486_v1 = vpop.permute.xlu1 %4433  ;;  %v4430_v4 = vunpack.i.l.bf16 %v4429_v32 }
 0x3a0   : > { %v1559_v63 = vsel %vm435_vm6, %v10012_v31, %v4430_v4 }
 0x3a5   : > { %v4444_v13 = vpop.permute.xlu0 %4443 }
 0x3a6   : > { %v4449_v6 = vpop.permute.xlu1 %4448  ;;  %v4446_v53 = vunpack.i.h.bf16 %v4444_v13  ;;  %v4445_v45 = vunpack.i.l.bf16 %v4444_v13 }
 0x3a7   : > { %v4451_v19 = vunpack.i.h.bf16 %v4449_v6  ;;  %v4450_v59 = vunpack.i.l.bf16 %v4449_v6  ;;  %v10388_v6 = vunpack.i.l.bf16 %v7090_v21 }
 0x3a8   : > { %v7501_v30 = vpack.i.bf16 %v4445_v45, %v1484_v5 }
 0x3a9   : > { %v1596_v20 = vsel %vm476_vm7, %v4451_v19, %v4455_v61  ;;  %v1595_v36 = vsel %vm476_vm7, %v4450_v59, %v4451_v19  ;;  %v1594_v31 = vsel %vm476_vm7, %v4446_v53, %v4450_v59  ;;  %v1593_v61 = vsel %vm476_vm7, %v4445_v45, %v4446_v53 }
 0x3aa   : > { %10387 = vst [vmem:[#allocation70_spill] sm:$0xff] %v7501_v30  ;;  %v4533_v57 = vpack.i.bf16 %v1559_v63, %v1594_v31  ;;  %v7505_v13 = vpack.i.bf16 %v1596_v20, %v10388_v6  ;;  %v4548_v63 = vpack.i.bf16 %v1555_v55, %v1554_v10  ;;  %v4435_v55 = vunpack.i.l.bf16 %v7486_v1 }
 0x3ac   : > { %4534 = vrot.lane.b32.xlu1 %v4533_v57, %s5415_s10 }
 0x3ad   : > { %v4459_v11 = vpop.permute.xlu0 %4458 }
 0x3ae   : > { %v4464_v19 = vpop.permute.xlu1 %4463  ;;  %v4461_v30 = vunpack.i.h.bf16 %v4459_v11  ;;  %v4460_v31 = vunpack.i.l.bf16 %v4459_v11  ;;  %v4436_v11 = vunpack.i.h.bf16 %v7486_v1 }
 0x3af   : > { %v4466_v59 = vunpack.i.h.bf16 %v4464_v19  ;;  %v4465_v5 = vunpack.i.l.bf16 %v4464_v19  ;;  %v4431_v19 = vunpack.i.h.bf16 %v4429_v32 }
 0x3b0   : > { %v7517_v20 = vpack.i.bf16 %v4461_v30, %v1595_v36  ;;  %v7522_v53 = vsel %vm476_vm7, %v10389_v41, %v4460_v31  ;;  %v4375_v36 = vunpack.i.l.bf16 %v7349_v3  ;;  %v1562_v3 = vsel %vm435_vm6, %v4435_v55, %v4436_v11 }
 0x3b1   : > { %v7513_v21 = vsel %vm476_vm7, %v4466_v59, %v4470_v12  ;;  %v1600_v39 = vsel %vm476_vm7, %v4465_v5, %v4466_v59  ;;  %v1599_v57 = vsel %vm476_vm7, %v4461_v30, %v4465_v5  ;;  %v4400_v12 = vunpack.i.l.bf16 %v7406_v15 }
 0x3b2   : > { %v4523_v45 = vpack.i.bf16 %v1599_v57, %v7025_v54  ;;  %v4528_v6 = vpack.i.bf16 %v1593_v61, %v1600_v39  ;;  %v4688_v10 = vpack.i.bf16 %v7065_v18, %v7513_v21  ;;  %v4410_v54 = vunpack.i.l.bf16 %v7327_v17  ;;  %v10445_v18 = vld [vmem:[#allocation70_spill] sm:$0xff] }
 0x3b3   : > { %v10390_v61 = vunpack.i.h.bf16 %v7406_v15  ;;  %v1561_v1 = vsel %vm435_vm6, %v4431_v19, %v4435_v55  ;;  %v1560_v59 = vsel %vm435_vm6, %v4430_v4, %v4431_v19  ;;  %v10391_v17 = vunpack.i.h.bf16 %v7443_v34 }
 0x3b4   : > { %4524 = vrot.lane.b32.xlu2 %v4523_v45, %s5415_s10  ;;  %4549 = vrot.lane.b32.xlu1 %v4548_v63, %s5415_s10  ;;  %v1553_v31 = vsel %vm435_vm6, %v4410_v54, %v4411_v23  ;;  %v1513_v63 = vsel %vm394_vm5, %v4375_v36, %v4376_v49  ;;  %v4538_v39 = vpack.i.bf16 %v1561_v1, %v1560_v59  ;;  %v10392_v41 = vunpack.i.h.bf16 %v7054_v56 }
 0x3b5   : > { %4529 = vrot.lane.b32.xlu0 %v4528_v6, %s5415_s10  ;;  %v7536_v30 = vpop.permute.xlu0 %4473  ;;  %v1522_v32 = vsel %vm394_vm5, %v4400_v12, %v10390_v61  ;;  %v4365_v4 = vunpack.i.l.bf16 %v7244_v60  ;;  %v4361_v23 = vunpack.i.h.bf16 %v7329_v9  ;;  %v4543_v6 = vpack.i.bf16 %v1553_v31, %v1562_v3 }
 0x3b6   : > { %v4475_v5 = vunpack.i.l.bf16 %v7536_v30  ;;  %v4563_v57 = vpack.i.bf16 %v1513_v63, %v1522_v32  ;;  %v4396_v55 = vunpack.i.h.bf16 %v7303_v51  ;;  %v4395_v34 = vunpack.i.l.bf16 %v7303_v51 }
 0x3b7   : > { %v4391_v19 = vunpack.i.h.bf16 %v7365_v50  ;;  %v1481_v56 = vsel %vm353_vm4, %v4361_v23, %v4365_v4  ;;  %v10393_v61 = vunpack.i.l.bf16 %v7329_v9  ;;  %v10394_v1 = vunpack.i.l.bf16 %v7447_v0 }
 0x3b8   : > { %v1603_v15 = vsel %vm476_vm7, %v10391_v17, %v4475_v5  ;;  %v1520_v31 = vsel %vm394_vm5, %v4395_v34, %v4396_v55  ;;  %v1521_v3 = vsel %vm394_vm5, %v4396_v55, %v4400_v12  ;;  %v4380_v17 = vunpack.i.l.bf16 %v7275_v16 }
 0x3b9   : > { %v7554_v45 = vpack.i.bf16 %v10392_v41, %v1603_v15  ;;  %v1480_v32 = vsel %vm353_vm4, %v10393_v61, %v4361_v23  ;;  %v1556_v59 = vsel %vm435_vm6, %v4416_v48, %v10394_v1  ;;  %v1519_v51 = vsel %vm394_vm5, %v4391_v19, %v4395_v34 }
 0x3ba   : > { %v4553_v63 = vpack.i.bf16 %v1519_v51, %v1556_v59  ;;  %v4578_v50 = vpack.i.bf16 %v1481_v56, %v1480_v32  ;;  %v4558_v15 = vpack.i.bf16 %v1521_v3, %v1520_v31  ;;  %v10395_v9 = vunpack.i.h.bf16 %v7275_v16 }
 0x3bb   : > { %v1514_v0 = vsel %vm394_vm5, %v4376_v49, %v4380_v17  ;;  %v4440_v41 = vunpack.i.l.bf16 %v7363_v46  ;;  %v10398_v16 = vunpack.i.h.bf16 %v7244_v60  ;;  %v10400_v55 = vunpack.i.l.bf16 %v7306_v40 }
 0x3bc   : > { %4539 = vrot.lane.b32.xlu2 %v4538_v39, %s5415_s10  ;;  %4564 = vrot.lane.b32.xlu1 %v4563_v57, %s5415_s10  ;;  %v1515_v48 = vsel %vm394_vm5, %v4380_v17, %v10395_v9  ;;  %v10396_v39 = vpack.i.bf16 %v7314_v37, %v7319_v43  ;;  %v10397_v57 = vpack.i.bf16 %v7335_v35, %v7382_v27  ;;  %v10401_v43 = vunpack.i.h.bf16 %v7347_v42  ;;  %v10421_v9 = vld [vmem:[#allocation53_spill] sm:$0xff] }
 0x3bd   : > { %4544 = vrot.lane.b32.xlu0 %v4543_v6, %s5415_s10  ;;  %v4568_v12 = vpack.i.bf16 %v1515_v48, %v1514_v0  ;;  %v1482_v23 = vsel %vm353_vm4, %v4365_v4, %v10398_v16  ;;  %v1563_v49 = vsel %vm435_vm6, %v4436_v11, %v4440_v41  ;;  %v10399_v6 = vunpack.i.h.bf16 %v7306_v40  ;;  %v10413_v4 = vld [vmem:[#allocation59_spill] sm:$0xff]  ;;  %v10423_v0 = vld [vmem:[#allocation65_spill] sm:$0xff]  ;;  %v10428_v16 = vld [vmem:[#allocation58_spill] sm:$0xff] }
 0x3be   : > { %v4583_v34 = vpack.i.bf16 %v10401_v43, %v1482_v23  ;;  %v10402_v60 = vpack.i.bf16 %v7287_v26, %v7292_v58  ;;  %v4598_v35 = vpack.i.bf16 %v4410_v54, %v7311_v44  ;;  %v10403_v40 = vpack.i.bf16 %v7261_v38, %v7266_v25  ;;  %v7620_v58 = vpop.permute.xlu1 %1607  ;;  %v7631_v25 = vpop.permute.xlu2 %4479  ;;  %v10432_v43 = vld [vmem:[#allocation47_spill] sm:$0xff] }
 0x3bf   : > { %v1473_v37 = vsel %vm353_vm4, %v10400_v55, %v10399_v6  ;;  %v10404_v42 = vpack.i.bf16 %v7468_v29, %v7476_v62  ;;  %v4613_v27 = vpack.i.bf16 %v4391_v19, %v7284_v2  ;;  %10405 = vst [vmem:[#allocation71_spill] sm:$0xff] %v7620_v58  ;;  %v10406_v26 = vpack.i.bf16 %v7225_v7, %v7230_v24  ;;  %v7634_v44 = vpop.permute.xlu0 %4484 }
 0x3c0   : > { %v4588_v56 = vpack.i.bf16 %v1473_v37, %v1563_v49  ;;  %v10407_v38 = vpack.i.bf16 %v7424_v14, %v7432_v47  ;;  %v4628_v29 = vpack.i.bf16 %v4375_v36, %v7258_v33  ;;  %10408 = vst [vmem:[#allocation72_spill] sm:$0xff] %v7634_v44  ;;  %v4441_v2 = vunpack.i.h.bf16 %v7363_v46  ;;  %v10431_v37 = vld [vmem:[#allocation48_spill] sm:$0xff] }
 0x3c1   : > { %v10015_v62 = vunpack.i.l.bf16 %v7634_v44  ;;  %v10409_v7 = vpack.i.bf16 %v7192_v8, %v7188_v52  ;;  %v10019_v14 = vunpack.i.h.bf16 %v7631_v25  ;;  %v10411_v33 = vpack.i.bf16 %v7389_v28, %v7392_v22  ;;  %v10412_v52 = vld [vmem:[#allocation61_spill] sm:$0xff]  ;;  %v10414_v28 = vld [vmem:[#allocation67_spill] sm:$0xff]  ;;  %v10415_v22 = vld [vmem:[#allocation68_spill] sm:$0xff] }
 0x3c2   : > { %v1564_v46 = vsel %vm435_vm6, %v4440_v41, %v4441_v2  ;;  %v10016_v11 = vunpack.i.h.bf16 %v7634_v44  ;;  %v10416_v19 = vpack.i.bf16 %v10414_v28, %v10415_v22  ;;  %v10442_v2 = vld [vmem:[#allocation63_spill] sm:$0xff]  ;;  %v10449_v22 = vld [vmem:[#allocation50_spill] sm:$0xff] }
 0x3c3   : > { %v7658_v8 = vsel %vm746_vm8, %v10019_v14, %v10015_v62  ;;  %v4648_v36 = vpack.i.bf16 %v1564_v46, %v10412_v52 }
 0x3c4   : > { %4554 = vrot.lane.b32.xlu2 %v4553_v63, %s5415_s10  ;;  %4579 = vrot.lane.b32.xlu1 %v4578_v50, %s5415_s10 }
 0x3c5   : > { %4559 = vrot.lane.b32.xlu0 %v4558_v15, %s5415_s10  ;;  %v10420_v15 = vld [vmem:[#allocation52_spill] sm:$0xff] }
 0x3c6   : > { %v7644_v24 = vpop.permute.xlu1 %4489  ;;  %v4495_v54 = vpop.permute.xlu2 %4494  ;;  %v10422_v48 = vpack.i.bf16 %v10420_v15, %v10421_v9 }
 0x3c7   : > { %10410 = vst [vmem:[#allocation73_spill] sm:$0xff] %v7644_v24  ;;  %v10017_v47 = vunpack.i.l.bf16 %v7644_v24  ;;  %v7674_v32 = vpop.permute.xlu0 %4499  ;;  %v4497_v59 = vunpack.i.h.bf16 %v4495_v54  ;;  %v10018_v3 = vunpack.i.h.bf16 %v7644_v24  ;;  %v4496_v50 = vunpack.i.l.bf16 %v4495_v54  ;;  %v10446_v54 = vld [vmem:[#allocation39_spill] sm:$0xff] }
 0x3c8   : > { %v10032_v1 = vunpack.i.l.bf16 %v7674_v32  ;;  %v10033_v63 = vunpack.i.h.bf16 %v7674_v32 }
 0x3c9   : > { %v7672_v61 = vsel %vm746_vm8, %v10016_v11, %v10017_v47  ;;  %v7706_v41 = vsel %vm746_vm8, %v10018_v3, %v4496_v50 }
 0x3ca   : > { %10417 = vst [vmem:[#allocation61_spill] sm:$0xff] %v7672_v61  ;;  %v7686_v17 = vsel %vm746_vm8, %v4497_v59, %v10032_v1  ;;  %v10451_v59 = vld [vmem:[#allocation55_spill] sm:$0xff] }
 0x3cb   : > { %10419 = vst [vmem:[#allocation67_spill] sm:$0xff] %v7686_v17 }
 0x3cc   : > { %4569 = vrot.lane.b32.xlu2 %v4568_v12, %s5415_s10  ;;  %4594 = vrot.lane.b32.xlu1 %v10396_v39, %s5415_s10  ;;  %v10424_v12 = vld [vmem:[#allocation64_spill] sm:$0xff]  ;;  %10427 = vst [vmem:[#allocation52_spill] sm:$0xff] %v7706_v41 }
 0x3cd   : > { %4574 = vrot.lane.b32.xlu0 %v10397_v57, %s5415_s10  ;;  %v10425_v39 = vpack.i.bf16 %v10423_v0, %v10424_v12  ;;  %v10453_v12 = vld [vmem:[#allocation51_spill] sm:$0xff] }
 0x3ce   : > { %v7678_v31 = vpop.permute.xlu1 %4504  ;;  %v7710_v23 = vpop.permute.xlu2 %4509 }
 0x3cf   : > { %10418 = vst [vmem:[#allocation59_spill] sm:$0xff] %v7678_v31  ;;  %v10020_v51 = vunpack.i.l.bf16 %v7678_v31  ;;  %v10021_v49 = vunpack.i.h.bf16 %v7678_v31  ;;  %v10014_v6 = vunpack.i.l.bf16 %v7710_v23  ;;  %v7770_v9 = vpop.permute.xlu0 %4514 }
 0x3d0   : > { %10429 = vst [vmem:[#allocation53_spill] sm:$0xff] %v7710_v23 }
 0x3d1   : > { %v7701_v57 = vsel %vm746_vm8, %v10033_v63, %v10020_v51  ;;  %v7719_v55 = vsel %vm746_vm8, %v10021_v49, %v10014_v6 }
 0x3d2   : > { %10426 = vst [vmem:[#allocation68_spill] sm:$0xff] %v7701_v57 }
 0x3d3   : > { %10430 = vst [vmem:[#allocation65_spill] sm:$0xff] %v7719_v55 }
 0x3d4   : > { %4584 = vrot.lane.b32.xlu2 %v4583_v34, %s5415_s10  ;;  %4609 = vrot.lane.b32.xlu1 %v10402_v60, %s5415_s10  ;;  %v10433_v34 = vpack.i.bf16 %v10431_v37, %v10432_v43  ;;  %v10435_v60 = vld [vmem:[#allocation57_spill] sm:$0xff]  ;;  %v10457_v43 = vld [vmem:[#allocation43_spill] sm:$0xff] }
 0x3d5   : > { %4589 = vrot.lane.b32.xlu0 %v4588_v56, %s5415_s10  ;;  %v10434_v56 = vld [vmem:[#allocation56_spill] sm:$0xff]  ;;  %v10456_v37 = vld [vmem:[#allocation41_spill] sm:$0xff] }
 0x3d6   : > { %v7751_v21 = vpop.permute.xlu1 %4519 }
 0x3d7   : > { %v10057_v31 = vunpack.i.l.bf16 %v7751_v21 }
 0x3dc   : > { %4599 = vrot.lane.b32.xlu2 %v4598_v35, %s5415_s10  ;;  %4624 = vrot.lane.b32.xlu1 %v10403_v40, %s5415_s10  ;;  %v10436_v35 = vld [vmem:[#allocation35_spill] sm:$0xff]  ;;  %v10437_v40 = vld [vmem:[#allocation36_spill] sm:$0xff] }
 0x3dd   : > { %4604 = vrot.lane.b32.xlu0 %v10404_v42, %s5415_s10  ;;  %v10438_v42 = vpack.i.bf16 %v10436_v35, %v10437_v40 }
 0x3e4   : > { %4614 = vrot.lane.b32.xlu2 %v4613_v27, %s5415_s10  ;;  %4639 = vrot.lane.b32.xlu1 %v10406_v26, %s5415_s10  ;;  %v10439_v27 = vld [vmem:[#allocation45_spill] sm:$0xff]  ;;  %v10440_v26 = vld [vmem:[#allocation40_spill] sm:$0xff] }
 0x3e5   : > { %4619 = vrot.lane.b32.xlu0 %v10407_v38, %s5415_s10  ;;  %v10441_v38 = vpack.i.bf16 %v10439_v27, %v10440_v26 }
 0x3ec   : > { %4629 = vrot.lane.b32.xlu2 %v4628_v29, %s5415_s10  ;;  %4654 = vrot.lane.b32.xlu1 %v10409_v7, %s5415_s10  ;;  %v10443_v7 = vld [vmem:[#allocation62_spill] sm:$0xff] }
 0x3ed   : > { %4634 = vrot.lane.b32.xlu0 %v10411_v33, %s5415_s10  ;;  %v10444_v33 = vpack.i.bf16 %v10442_v2, %v10443_v7 }
 0x3f4   : > { %4644 = vrot.lane.b32.xlu2 %v10413_v4, %s5415_s10  ;;  %4669 = vrot.lane.b32.xlu1 %v10416_v19, %s5415_s10  ;;  %v10447_v4 = vld [vmem:[#allocation37_spill] sm:$0xff]  ;;  %v10450_v19 = vld [vmem:[#allocation54_spill] sm:$0xff] }
 0x3f5   : > { %4649 = vrot.lane.b32.xlu0 %v4648_v36, %s5415_s10  ;;  %v10448_v28 = vpack.i.bf16 %v10446_v54, %v10447_v4 }
 0x3fc   : > { %4659 = vrot.lane.b32.xlu2 %v10422_v48, %s5415_s10  ;;  %4684 = vrot.lane.b32.xlu1 %v10425_v39, %s5415_s10  ;;  %v10454_v39 = vld [vmem:[#allocation49_spill] sm:$0xff] }
 0x3fd   : > { %4664 = vrot.lane.b32.xlu0 %v10428_v16, %s5415_s10  ;;  %v10455_v16 = vpack.i.bf16 %v10453_v12, %v10454_v39  ;;  %v10463_v12 = vld [vmem:[#allocation46_spill] sm:$0xff] }
 0x404   : > { %4674 = vrot.lane.b32.xlu2 %v10433_v34, %s5415_s10  ;;  %4699 = vrot.lane.b32.xlu1 %v10434_v56, %s5415_s10  ;;  %v10458_v34 = vld [vmem:[#allocation60_spill] sm:$0xff] }
 0x405   : > { %4679 = vrot.lane.b32.xlu0 %v10435_v60, %s5415_s10  ;;  %v10459_v56 = vpack.i.bf16 %v10457_v43, %v10458_v34 }
 0x40c   : > { %4689 = vrot.lane.b32.xlu2 %v4688_v10, %s5415_s10  ;;  %4714 = vrot.lane.b32.xlu1 %v10438_v42, %s5415_s10 }
 0x40d   : > { %4694 = vrot.lane.b32.xlu0 %v10441_v38, %s5415_s10 }
 0x40e   : > { %v7741_v29 = vpop.permute.xlu2 %4524 }
 0x414   : > { %4704 = vrot.lane.b32.xlu2 %v10444_v33, %s5415_s10  ;;  %4729 = vrot.lane.b32.xlu1 %v10445_v18, %s5415_s10  ;;  %v10031_v33 = vunpack.i.h.bf16 %v7741_v29 }
 0x415   : > { %4709 = vrot.lane.b32.xlu0 %v7517_v20, %s5415_s10  ;;  %v10452_v20 = vpack.i.bf16 %v10450_v19, %v10451_v59  ;;  %v10460_v19 = vld [vmem:[#allocation44_spill] sm:$0xff]  ;;  %v10461_v59 = vld [vmem:[#allocation42_spill] sm:$0xff] }
 0x416   : > { %v4540_v10 = vpop.permute.xlu2 %4539 }
 0x417   : > { %v4542_v46 = vunpack.i.h.bf16 %v4540_v10  ;;  %v4541_v52 = vunpack.i.l.bf16 %v4540_v10 }
 0x419   : > { %v7754_v36 = vsel %vm746_vm8, %v4541_v52, %v4542_v46 }
 0x41c   : > { %4719 = vrot.lane.b32.xlu2 %v10448_v28, %s5415_s10  ;;  %4744 = vrot.lane.b32.xlu1 %v10449_v22, %s5415_s10  ;;  %v4476_v22 = vunpack.i.h.bf16 %v7536_v30 }
 0x41d   : > { %4724 = vrot.lane.b32.xlu0 %v10452_v20, %s5415_s10  ;;  %v10462_v20 = vpack.i.bf16 %v10460_v19, %v10461_v59 }
 0x41e   : > { %v7766_v50 = vpop.permute.xlu2 %4554  ;;  %v7768_v15 = vpop.permute.xlu1 %4534 }
 0x41f   : > { %v4537_v48 = vunpack.i.h.bf16 %v7768_v15  ;;  %v10027_v60 = vunpack.i.l.bf16 %v7766_v50  ;;  %v10030_v4 = vunpack.i.l.bf16 %v7768_v15 }
 0x421   : > { %v1953_v0 = vsel %vm746_vm8, %v4537_v48, %v4541_v52 }
 0x422   : > { %2121 = vmatpush.msra.mxu2 %v1953_v0 }
 0x424   : > { %4734 = vrot.lane.b32.xlu2 %v10455_v16, %s5415_s10  ;;  %4759 = vrot.lane.b32.xlu1 %v10456_v37, %s5415_s10  ;;  %v1604_v37 = vsel %vm476_vm7, %v4475_v5, %v4476_v22  ;;  %v10464_v5 = vld [vmem:[#allocation38_spill] sm:$0xff]  ;;  %v10465_v22 = vld [vmem:[#allocation69_spill] sm:$0xff] }
 0x425   : > { %4739 = vrot.lane.b32.xlu0 %v10459_v56, %s5415_s10 }
 0x426   : > { %v7785_v35 = vpop.permute.xlu2 %4569  ;;  %v4550_v40 = vpop.permute.xlu1 %4549 }
 0x427   : > { %v4572_v42 = vunpack.i.h.bf16 %v7785_v35  ;;  %v4571_v27 = vunpack.i.l.bf16 %v7785_v35  ;;  %v4552_v26 = vunpack.i.h.bf16 %v4550_v40  ;;  %v4551_v38 = vunpack.i.l.bf16 %v4550_v40  ;;  %v7789_v2 = vpop.permute.xlu0 %4529 }
 0x428   : > { %v10029_v7 = vunpack.i.h.bf16 %v7789_v2  ;;  %v10036_v18 = vunpack.i.l.bf16 %v7789_v2 }
 0x429   : > { %v7797_v10 = vsel %vm746_vm8, %v4552_v26, %v10027_v60  ;;  %v7800_v52 = vsel %vm746_vm8, %v4551_v38, %v4552_v26  ;;  %v7805_v54 = vsel %vm746_vm8, %v4571_v27, %v4572_v42 }
 0x42a   : > { %v1965_v28 = vsel %vm746_vm8, %v10031_v33, %v10036_v18  ;;  %v1959_v0 = vsel %vm746_vm8, %v10029_v7, %v10030_v4 }
 0x42b   : > { %2155 = vmatpush.msra.mxu3 %v1965_v28  ;;  %v4788_v28 = vpack.i.bf16 %v7522_v53, %v1604_v37 }
 0x42c   : > { %4749 = vrot.lane.b32.xlu2 %v10462_v20, %s5415_s10  ;;  %4774 = vrot.lane.b32.xlu1 %v7505_v13, %s5415_s10 }
 0x42d   : > { %4754 = vrot.lane.b32.xlu0 %v10463_v12, %s5415_s10  ;;  %2156 = vmatpush.msra.mxu3 %v1959_v0 }
 0x42e   : > { %v7827_v39 = vpop.permute.xlu2 %4584  ;;  %v7829_v16 = vpop.permute.xlu1 %4564 }
 0x42f   : > { %v7834_v43 = vpop.permute.xlu0 %4544  ;;  %v4587_v13 = vunpack.i.h.bf16 %v7827_v39  ;;  %v10024_v53 = vunpack.i.l.bf16 %v7827_v39  ;;  %v4567_v12 = vunpack.i.h.bf16 %v7829_v16  ;;  %v10026_v37 = vunpack.i.l.bf16 %v7829_v16 }
 0x430   : > { %v4547_v34 = vunpack.i.h.bf16 %v7834_v43  ;;  %v4546_v56 = vunpack.i.l.bf16 %v7834_v43 }
 0x431   : > { %v1952_v40 = vsel %vm746_vm8, %v4587_v13, %v4537_v48  ;;  %v4557_v48 = vunpack.i.h.bf16 %v7766_v50 }
 0x432   : > { %2081 = vmatpush.msra.mxu0 %v1952_v40  ;;  %v1947_v26 = vsel %vm746_vm8, %v4547_v34, %v4551_v38  ;;  %v7845_v30 = vsel %vm746_vm8, %v4542_v46, %v4546_v56 }
 0x433   : > { %2122 = vmatpush.msra.mxu2 %v1947_v26 }
 0x434   : > { %4764 = vrot.lane.b32.xlu2 %v10464_v5, %s5415_s10  ;;  %4789 = vrot.lane.b32.xlu1 %v4788_v28, %s5415_s10 }
 0x435   : > { %4769 = vrot.lane.b32.xlu0 %v10465_v22, %s5415_s10 }
 0x436   : > { %v7853_v19 = vpop.permute.xlu2 %4599  ;;  %v4580_v38 = vpop.permute.xlu1 %4579 }
 0x437   : > { %v4602_v59 = vunpack.i.h.bf16 %v7853_v19  ;;  %v4582_v46 = vunpack.i.h.bf16 %v4580_v38  ;;  %v4581_v20 = vunpack.i.l.bf16 %v4580_v38  ;;  %v4560_v0 = vpop.permute.xlu0 %4559  ;;  %v10022_v6 = vunpack.i.l.bf16 %v7853_v19 }
 0x438   : > { %v4562_v13 = vunpack.i.h.bf16 %v4560_v0  ;;  %v4561_v40 = vunpack.i.l.bf16 %v4560_v0 }
 0x439   : > { %v1946_v26 = vsel %vm746_vm8, %v4602_v59, %v4547_v34  ;;  %v7863_v28 = vsel %vm746_vm8, %v4582_v46, %v10024_v53  ;;  %v7866_v5 = vsel %vm746_vm8, %v4581_v20, %v4582_v46  ;;  %v1935_v34 = vsel %vm746_vm8, %v4567_v12, %v4571_v27  ;;  %v10466_v59 = vld [vmem:[#allocation66_spill] sm:$0xff] }
 0x43a   : > { %2082 = vmatpush.msra.mxu0 %v1946_v26  ;;  %v1941_v22 = vsel %vm746_vm8, %v4557_v48, %v4561_v40  ;;  %v7872_v38 = vsel %vm746_vm8, %v4562_v13, %v10026_v37  ;;  %v7875_v0 = vsel %vm746_vm8, %v4561_v40, %v4562_v13 }
 0x43b   : > { %2123 = vmatpush.msra.mxu2 %v1941_v22 }
 0x43c   : > { %4779 = vrot.lane.b32.xlu2 %v7554_v45, %s5415_s10 }
 0x43d   : > { %4784 = vrot.lane.b32.xlu0 %v10466_v59, %s5415_s10  ;;  %2124 = vmatpush.msra.mxu2 %v1935_v34 }
 0x43e   : > { %v7882_v46 = vpop.permute.xlu2 %4614  ;;  %v4595_v26 = vpop.permute.xlu1 %4594 }
 0x43f   : > { %v4617_v62 = vunpack.i.h.bf16 %v7882_v46  ;;  %v4597_v11 = vunpack.i.h.bf16 %v4595_v26  ;;  %v4596_v13 = vunpack.i.l.bf16 %v4595_v26  ;;  %v7886_v40 = vpop.permute.xlu0 %4574  ;;  %v10023_v3 = vunpack.i.l.bf16 %v7882_v46 }
 0x440   : > { %v4577_v22 = vunpack.i.h.bf16 %v7886_v40  ;;  %v10025_v45 = vunpack.i.l.bf16 %v7886_v40 }
 0x441   : > { %v1940_v27 = vsel %vm746_vm8, %v4617_v62, %v4557_v48  ;;  %v7894_v34 = vsel %vm746_vm8, %v4597_v11, %v10022_v6  ;;  %v7897_v59 = vsel %vm746_vm8, %v4596_v13, %v4597_v11 }
 0x442   : > { %2083 = vmatpush.msra.mxu0 %v1940_v27  ;;  %v1929_v47 = vsel %vm746_vm8, %v4577_v22, %v4581_v20  ;;  %v7905_v26 = vsel %vm746_vm8, %v4572_v42, %v10025_v45 }
 0x443   : > { %2125 = vmatpush.msra.mxu2 %v1929_v47 }
 0x446   : > { %v7907_v62 = vpop.permute.xlu2 %4629  ;;  %v4610_v48 = vpop.permute.xlu1 %4609 }
 0x447   : > { %v4632_v14 = vunpack.i.h.bf16 %v7907_v62  ;;  %v4612_v11 = vunpack.i.h.bf16 %v4610_v48  ;;  %v4611_v51 = vunpack.i.l.bf16 %v4610_v48  ;;  %v7911_v27 = vpop.permute.xlu0 %4589 }
 0x448   : > { %v4592_v20 = vunpack.i.h.bf16 %v7911_v27  ;;  %v4591_v49 = vunpack.i.l.bf16 %v7911_v27 }
 0x449   : > { %v1934_v35 = vsel %vm746_vm8, %v4632_v14, %v4567_v12  ;;  %v7919_v47 = vsel %vm746_vm8, %v4612_v11, %v10023_v3  ;;  %v7922_v42 = vsel %vm746_vm8, %v4611_v51, %v4612_v11  ;;  %v10028_v12 = vunpack.i.l.bf16 %v7907_v62 }
 0x44a   : > { %2084 = vmatpush.msra.mxu0 %v1934_v35  ;;  %v1923_v6 = vsel %vm746_vm8, %v4592_v20, %v4596_v13  ;;  %v7928_v48 = vsel %vm746_vm8, %v4546_v56, %v4591_v49 }
 0x44b   : > { %2126 = vmatpush.msra.mxu2 %v1923_v6 }
 0x44e   : > { %v7930_v27 = vpop.permute.xlu2 %4644  ;;  %v4625_v14 = vpop.permute.xlu1 %4624 }
 0x44f   : > { %v4647_v3 = vunpack.i.h.bf16 %v7930_v27  ;;  %v4627_v53 = vunpack.i.h.bf16 %v4625_v14  ;;  %v4626_v45 = vunpack.i.l.bf16 %v4625_v14  ;;  %v7934_v11 = vpop.permute.xlu0 %4604  ;;  %v10035_v60 = vunpack.i.l.bf16 %v7930_v27 }
 0x450   : > { %v4607_v35 = vunpack.i.h.bf16 %v7934_v11 }
 0x451   : > { %v1928_v13 = vsel %vm746_vm8, %v4647_v3, %v4577_v22  ;;  %v7941_v43 = vsel %vm746_vm8, %v4627_v53, %v10028_v12  ;;  %v7944_v6 = vsel %vm746_vm8, %v4626_v45, %v4627_v53 }
 0x452   : > { %2085 = vmatpush.msra.mxu0 %v1928_v13  ;;  %v1917_v56 = vsel %vm746_vm8, %v4607_v35, %v4611_v51 }
 0x453   : > { %2127 = vmatpush.msra.mxu2 %v1917_v56 }
 0x456   : > { %v7947_v37 = vpop.permute.xlu2 %4659  ;;  %v7949_v14 = vpop.permute.xlu1 %4639 }
 0x457   : > { %v10034_v3 = vunpack.i.h.bf16 %v7949_v14  ;;  %v7953_v22 = vpop.permute.xlu0 %4619  ;;  %v10041_v4 = vunpack.i.l.bf16 %v7949_v14 }
 0x458   : > { %v4622_v12 = vunpack.i.h.bf16 %v7953_v22 }
 0x459   : > { %v7961_v53 = vsel %vm746_vm8, %v10034_v3, %v10035_v60 }
 0x45a   : > { %v1911_v51 = vsel %vm746_vm8, %v4622_v12, %v4626_v45 }
 0x45b   : > { %2128 = vmatpush.msra.mxu2 %v1911_v51 }
 0x45e   : > { %v7964_v13 = vpop.permute.xlu2 %4674  ;;  %v7966_v56 = vpop.permute.xlu1 %4654 }
 0x45f   : > { %v7968_v7 = vpop.permute.xlu0 %4634  ;;  %v10040_v33 = vunpack.i.h.bf16 %v7966_v56  ;;  %v10042_v1 = vunpack.i.l.bf16 %v7966_v56  ;;  %v10044_v18 = vunpack.i.l.bf16 %v7964_v13 }
 0x460   : > { %v10043_v63 = vunpack.i.h.bf16 %v7968_v7 }
 0x461   : > { %v1899_v51 = vsel %vm746_vm8, %v10042_v1, %v10040_v33  ;;  %v10467_v33 = vunpack.i.l.bf16 %v7789_v2 }
 0x462   : > { %v1905_v45 = vsel %vm746_vm8, %v10043_v63, %v10041_v4  ;;  %v8010_v63 = vld [vmem:[%s9859_s2 + $0x8] sm:$0xff] }
 0x463   : > { %2129 = vmatpush.msra.mxu2 %v1905_v45  ;;  %3551 = vmatmul.msk.f32.vlgmr.msra.gmra.mxu3 %vm963_vm9, %v8010_v63 }
 0x465   : > { %2130 = vmatpush.msra.mxu2 %v1899_v51 }
 0x466   : > { %v7984_v3 = vpop.permute.xlu2 %4689  ;;  %v7986_v60 = vpop.permute.xlu1 %4669 }
 0x467   : > { %v10048_v58 = vunpack.i.l.bf16 %v7984_v3  ;;  %v10045_v41 = vunpack.i.h.bf16 %v7986_v60  ;;  %v7991_v23 = vpop.permute.xlu0 %4649 }
 0x468   : > { %v4652_v45 = vunpack.i.h.bf16 %v7991_v23 }
 0x469   : > { %v1893_v51 = vsel %vm746_vm8, %v10045_v41, %v10044_v18  ;;  %v1966_v4 = vsel %vm746_vm8, %v10467_v33, %v10048_v58 }
 0x46a   : > { %2131 = vmatpush.msra.mxu2 %v1893_v51  ;;  %2195 = vmatpush.msrb.mxu3 %v1966_v4  ;;  %v8005_v1 = vsel %vm746_vm8, %v4591_v49, %v4652_v45 }
 0x46b   : > { %10468 = vst [vmem:[#allocation64_spill] sm:$0xff] %v8005_v1 }
 0x46e   : > { %v8014_v18 = vpop.permute.xlu1 %4684  ;;  %v8024_v45 = vpop.permute.xlu2 %4704 }
 0x46f   : > { %v8016_v41 = vpop.permute.xlu0 %4664 }
 0x470   : > { %v4666_v44 = vunpack.i.l.bf16 %v8016_v41 }
 0x472   : > { %v1922_v33 = vsel %vm746_vm8, %v4666_v44, %v4592_v20  ;;  %v10054_v20 = vunpack.i.h.bf16 %v7984_v3 }
 0x473   : > { %2086 = vmatpush.msra.mxu0 %v1922_v33 }
 0x476   : > { %v8020_v4 = vpop.permute.xlu1 %4699 }
 0x477   : > { %v8022_v49 = vpop.permute.xlu0 %4679  ;;  %v4702_v51 = vunpack.i.h.bf16 %v8020_v4 }
 0x478   : > { %v4682_v58 = vunpack.i.h.bf16 %v8022_v49 }
 0x479   : > { %v1910_v61 = vsel %vm746_vm8, %v4702_v51, %v4622_v12 }
 0x47a   : > { %v1916_v1 = vsel %vm746_vm8, %v4682_v58, %v4607_v35  ;;  %v10058_v58 = vunpack.i.h.bf16 %v7770_v9 }
 0x47b   : > { %2087 = vmatpush.msra.mxu0 %v1916_v1  ;;  %v8040_v1 = vpop.permute.xlu2 %4719 }
 0x47c   : > { %v1875_v51 = vsel %vm746_vm8, %v10058_v58, %v10057_v31  ;;  %v8072_v31 = vld [vmem:[%s9859_s2] sm:$0xff] }
 0x47d   : > { %2088 = vmatpush.msra.mxu0 %v1910_v61 }
 0x47e   : > { %v8030_v24 = vpop.permute.xlu1 %4714 }
 0x47f   : > { %v8032_v44 = vpop.permute.xlu0 %4694  ;;  %v10055_v33 = vunpack.i.h.bf16 %v8030_v24  ;;  %v10056_v57 = vunpack.i.l.bf16 %v8030_v24 }
 0x480   : > { %v10053_v55 = vunpack.i.l.bf16 %v8032_v44 }
 0x481   : > { %v1881_v12 = vsel %vm746_vm8, %v10056_v57, %v10055_v33 }
 0x482   : > { %v1887_v61 = vsel %vm746_vm8, %v10054_v20, %v10053_v55  ;;  %v10470_v55 = vunpack.i.h.bf16 %v7674_v32  ;;  %v10471_v20 = vunpack.i.l.bf16 %v7674_v32  ;;  %v10473_v32 = vunpack.i.l.bf16 %v7768_v15 }
 0x483   : > { %2132 = vmatpush.msra.mxu2 %v1887_v61  ;;  %v10474_v15 = vunpack.i.h.bf16 %v7789_v2 }
 0x484   : > { %v1869_v33 = vsel %vm746_vm8, %v10471_v20, %v10470_v55  ;;  %v4606_v20 = vunpack.i.l.bf16 %v7934_v11 }
 0x485   : > { %2133 = vmatpush.msra.mxu2 %v1881_v12 }
 0x486   : > { %v8052_v35 = vpop.permute.xlu1 %4729 }
 0x487   : > { %10469 = vst [vmem:[#allocation58_spill] sm:$0xff] %v8052_v35  ;;  %v8059_v17 = vpop.permute.xlu0 %4709  ;;  %2134 = vmatpush.msra.mxu2 %v1875_v51  ;;  %v4732_v57 = vunpack.i.h.bf16 %v8052_v35  ;;  %v10472_v51 = vunpack.i.h.bf16 %v7741_v29  ;;  %v4621_v35 = vunpack.i.l.bf16 %v7953_v22 }
 0x488   : > { %v4711_v61 = vunpack.i.l.bf16 %v8059_v17  ;;  %v4712_v12 = vunpack.i.h.bf16 %v8059_v17 }
 0x489   : > { %2135 = vmatpush.msra.mxu2 %v1869_v33  ;;  %v8084_v33 = vpop.permute.xlu2 %4734 }
 0x48a   : > { %v1964_v58 = vsel %vm746_vm8, %v4712_v12, %v10472_v51  ;;  %v1960_v55 = vsel %vm746_vm8, %v10473_v32, %v4711_v61  ;;  %v1958_v12 = vsel %vm746_vm8, %v4732_v57, %v10474_v15  ;;  %v10477_v32 = vunpack.i.h.bf16 %v7968_v7 }
 0x48b   : > { %2115 = vmatpush.msra.mxu1 %v1964_v58  ;;  %2136 = vmatpush.msra.mxu2 %v7658_v8  ;;  %v4636_v8 = vunpack.i.l.bf16 %v7968_v7  ;;  %v4651_v58 = vunpack.i.l.bf16 %v7991_v23  ;;  %v4667_v15 = vunpack.i.h.bf16 %v8016_v41 }
 0x48c   : > { %2196 = vmatpush.msrb.mxu3 %v1960_v55  ;;  %2137 = vmatmul.f32.vlgmr.msra.gmra.mxu2 %v8072_v31 }
 0x48d   : > { %2241 = vmatpush.msrb.mxu2 %v7928_v48  ;;  %2116 = vmatpush.msra.mxu1 %v1958_v12  ;;  %v10480_v12 = vunpack.i.l.bf16 %v7966_v56 }
 0x48e   : > { %2201 = vmatpush.msra.mxu3 %v7845_v30  ;;  %v8093_v51 = vpop.permute.xlu1 %4744  ;;  %v10475_v30 = vunpack.i.l.bf16 %v7766_v50  ;;  %3550 = vmatmul.msk.f32.vlgmr.msra.gmra.mxu1 %vm963_vm9, %v8010_v63  ;;  %v10476_v50 = vunpack.i.l.bf16 %v7829_v16  ;;  %v4686_v16 = vunpack.i.l.bf16 %v8014_v18 }
 0x48f   : > { %3552 = vmatmul.msk.f32.vlgmr.msrb.gmra.mxu3 %vm963_vm9, %v8010_v63  ;;  %2161 = vmatpush.msrb.mxu1 %v7754_v36  ;;  %v8105_v48 = vpop.permute.xlu0 %4724  ;;  %v4736_v36 = vunpack.i.l.bf16 %v8084_v33  ;;  %v4747_v22 = vunpack.i.h.bf16 %v8093_v51 }
 0x490   : > { %2202 = vmatpush.msra.mxu3 %v7797_v10  ;;  %v1950_v2 = vsel %vm746_vm8, %v10475_v30, %v4606_v20  ;;  %v4726_v57 = vunpack.i.l.bf16 %v8105_v48  ;;  %v1944_v10 = vsel %vm746_vm8, %v10476_v50, %v4621_v35 }
 0x491   : > { %2242 = vmatpush.msrb.mxu2 %v1950_v2  ;;  %2162 = vmatpush.msrb.mxu1 %v7800_v52  ;;  %v10478_v52 = vunpack.i.l.bf16 %v7886_v40  ;;  %v1898_v40 = vsel %vm746_vm8, %v4736_v36, %v10480_v12  ;;  %v8141_v30 = vpop.permute.xlu2 %4749  ;;  %v4706_v2 = vunpack.i.l.bf16 %v8024_v45  ;;  %v1921_v23 = vsel %vm746_vm8, %v4686_v16, %v4747_v22 }
 0x492   : > { %2203 = vmatpush.msra.mxu3 %v7872_v38  ;;  %v1904_v55 = vsel %vm746_vm8, %v4726_v57, %v10477_v32  ;;  %v4751_v50 = vunpack.i.l.bf16 %v8141_v30  ;;  %v4661_v32 = vunpack.i.l.bf16 %v7947_v37 }
 0x493   : > { %2243 = vmatpush.msrb.mxu2 %v1944_v10  ;;  %2163 = vmatpush.msrb.mxu1 %v7875_v0  ;;  %v1938_v38 = vsel %vm746_vm8, %v10478_v52, %v4636_v8  ;;  %v10479_v0 = vunpack.i.l.bf16 %v7827_v39  ;;  %v4727_v10 = vunpack.i.h.bf16 %v8105_v48 }
 0x494   : > { %2204 = vmatpush.msra.mxu3 %v7905_v26  ;;  %2089 = vmatpush.msra.mxu0 %v1904_v55  ;;  %v10483_v55 = vunpack.i.h.bf16 %v7986_v60 }
 0x495   : > { %2244 = vmatpush.msrb.mxu2 %v1938_v38  ;;  %2164 = vmatpush.msrb.mxu1 %v7805_v54  ;;  %v1932_v26 = vsel %vm746_vm8, %v10479_v0, %v4651_v58  ;;  %v10481_v54 = vunpack.i.l.bf16 %v7853_v19  ;;  %v10482_v19 = vunpack.i.l.bf16 %v7882_v46  ;;  %v4737_v38 = vunpack.i.h.bf16 %v8084_v33  ;;  %v10513_v33 = vld [vmem:[#allocation53_spill] sm:$0xff] }
 0x496   : > { %2205 = vmatpush.msra.mxu3 %v7863_v28  ;;  %2090 = vmatpush.msra.mxu0 %v1898_v40  ;;  %v8153_v57 = vpop.permute.xlu1 %4759  ;;  %v10484_v46 = vunpack.i.l.bf16 %v7907_v62  ;;  %v10486_v62 = vunpack.i.h.bf16 %v7984_v3  ;;  %v4722_v40 = vunpack.i.h.bf16 %v8040_v1 }
 0x497   : > { %2245 = vmatpush.msrb.mxu2 %v1932_v26  ;;  %2165 = vmatpush.msrb.mxu1 %v7866_v5  ;;  %v1926_v39 = vsel %vm746_vm8, %v10481_v54, %v4667_v15  ;;  %v8151_v28 = vpop.permute.xlu0 %4739  ;;  %v1920_v5 = vsel %vm746_vm8, %v10482_v19, %v4686_v16  ;;  %v4697_v26 = vunpack.i.h.bf16 %v8032_v44  ;;  %v4752_v54 = vunpack.i.h.bf16 %v8141_v30  ;;  %v10515_v30 = vld [vmem:[#allocation52_spill] sm:$0xff] }
 0x498   : > { %2206 = vmatpush.msra.mxu3 %v7894_v34  ;;  %v4742_v36 = vunpack.i.h.bf16 %v8151_v28  ;;  %v4662_v34 = vunpack.i.h.bf16 %v7947_v37  ;;  %v4746_v37 = vunpack.i.l.bf16 %v8093_v51  ;;  %v1886_v0 = vsel %vm746_vm8, %v4751_v50, %v10486_v62 }
 0x499   : > { %2246 = vmatpush.msrb.mxu2 %v1926_v39  ;;  %2166 = vmatpush.msrb.mxu1 %v7897_v59  ;;  %v1914_v59 = vsel %vm746_vm8, %v10484_v46, %v4706_v2  ;;  %v10489_v50 = vunpack.i.h.bf16 %v7966_v56  ;;  %v4721_v19 = vunpack.i.l.bf16 %v8040_v1  ;;  %v4526_v1 = vunpack.i.l.bf16 %v7741_v29 }
 0x49a   : > { %2207 = vmatpush.msra.mxu3 %v7919_v47  ;;  %v1892_v52 = vsel %vm746_vm8, %v4742_v36, %v10483_v55  ;;  %v4681_v47 = vunpack.i.l.bf16 %v8022_v49  ;;  %v4677_v49 = vunpack.i.h.bf16 %v7964_v13  ;;  %v1902_v39 = vsel %vm746_vm8, %v4662_v34, %v4737_v38  ;;  %v8210_v55 = vpop.permute.xlu2 %4764 }
 0x49b   : > { %2247 = vmatpush.msrb.mxu2 %v1920_v5  ;;  %2167 = vmatpush.msrb.mxu1 %v7922_v42  ;;  %v10485_v42 = vunpack.i.l.bf16 %v7930_v27  ;;  %v1901_v27 = vsel %vm746_vm8, %v4661_v32, %v4662_v34  ;;  %v4701_v5 = vunpack.i.l.bf16 %v8020_v4  ;;  %v4761_v34 = vunpack.i.l.bf16 %v8153_v57 }
 0x49c   : > { %2208 = vmatpush.msra.mxu3 %v7941_v43  ;;  %2091 = vmatpush.msra.mxu0 %v1892_v52  ;;  %v1895_v46 = vsel %vm746_vm8, %v4677_v49, %v4681_v47  ;;  %v1896_v56 = vsel %vm746_vm8, %v4681_v47, %v4746_v37  ;;  %v10491_v62 = vunpack.i.l.bf16 %v8030_v24  ;;  %v4522_v47 = vunpack.i.h.bf16 %v7751_v21 }
 0x49d   : > { %2248 = vmatpush.msrb.mxu2 %v1914_v59  ;;  %2168 = vmatpush.msrb.mxu1 %v7944_v6  ;;  %v1908_v43 = vsel %vm746_vm8, %v10485_v42, %v4727_v10  ;;  %v10487_v6 = vunpack.i.h.bf16 %v7949_v14  ;;  %v4516_v59 = vunpack.i.l.bf16 %v7770_v9  ;;  %v1890_v29 = vsel %vm746_vm8, %v4701_v5, %v4752_v54 }
 0x49e   : > { %2209 = vmatpush.msra.mxu3 %v7961_v53  ;;  %2092 = vmatpush.msra.mxu0 %v1886_v0  ;;  %v10488_v53 = vunpack.i.l.bf16 %v7949_v14  ;;  %v1900_v14 = vsel %vm746_vm8, %v10489_v50, %v4661_v32  ;;  %v8220_v4 = vpop.permute.xlu1 %4774  ;;  %v10490_v32 = vunpack.i.l.bf16 %v7964_v13  ;;  %v10492_v13 = vunpack.i.l.bf16 %v8032_v44 }
 0x49f   : > { %2249 = vmatpush.msrb.mxu2 %v1908_v43  ;;  %v8203_v36 = vpop.permute.xlu0 %4754  ;;  %v1889_v43 = vsel %vm746_vm8, %v4697_v26, %v4701_v5  ;;  %v10494_v44 = vunpack.i.h.bf16 %v8030_v24 }
 0x4a0   : > { %v1906_v12 = vsel %vm746_vm8, %v10488_v53, %v10487_v6  ;;  %2210 = vmatpush.msra.mxu3 %v1901_v27  ;;  %v4757_v52 = vunpack.i.h.bf16 %v8203_v36  ;;  %v1894_v42 = vsel %vm746_vm8, %v10490_v32, %v4677_v49  ;;  %v4766_v6 = vunpack.i.l.bf16 %v8210_v55 }
 0x4a1   : > { %2169 = vmatpush.msrb.mxu1 %v1906_v12  ;;  %2250 = vmatpush.msrb.mxu2 %v1902_v39  ;;  %v1888_v49 = vsel %vm746_vm8, %v10492_v13, %v4697_v26  ;;  %v1883_v53 = vsel %vm746_vm8, %v4721_v19, %v4722_v40  ;;  %v4481_v12 = vunpack.i.l.bf16 %v7631_v25  ;;  %v1884_v27 = vsel %vm746_vm8, %v4722_v40, %v4761_v34  ;;  %v10495_v40 = vld [vmem:[#allocation67_spill] sm:$0xff] }
 0x4a2   : > { %2211 = vmatpush.msra.mxu3 %v1895_v46  ;;  %v1880_v0 = vsel %vm746_vm8, %v4757_v52, %v10491_v62  ;;  %v10493_v39 = vunpack.i.h.bf16 %v7770_v9  ;;  %v1882_v26 = vsel %vm746_vm8, %v10494_v44, %v4721_v19  ;;  %v1878_v5 = vsel %vm746_vm8, %v4526_v1, %v4766_v6  ;;  %v10497_v19 = vld [vmem:[#allocation59_spill] sm:$0xff]  ;;  %v10501_v62 = vld [vmem:[#allocation65_spill] sm:$0xff] }
 0x4a3   : > { %2170 = vmatpush.msrb.mxu1 %v1900_v14  ;;  %2251 = vmatpush.msrb.mxu2 %v1896_v56  ;;  %v1877_v14 = vsel %vm746_vm8, %v4522_v47, %v4526_v1  ;;  %v10496_v46 = vunpack.i.l.bf16 %v7751_v21  ;;  %v10499_v56 = vunpack.i.l.bf16 %v10497_v19  ;;  %v10500_v1 = vunpack.i.h.bf16 %v7631_v25  ;;  %v8269_v21 = vpop.permute.xlu2 %4779 }
 0x4a4   : > { %2212 = vmatpush.msra.mxu3 %v1889_v43  ;;  %2093 = vmatpush.msra.mxu0 %v1880_v0  ;;  %v1874_v50 = vsel %vm746_vm8, %v4516_v59, %v10493_v39  ;;  %v10498_v59 = vunpack.i.h.bf16 %v10497_v19  ;;  %v4671_v43 = vunpack.i.l.bf16 %v7986_v60  ;;  %v4777_v0 = vunpack.i.h.bf16 %v8220_v4  ;;  %v10507_v39 = vld [vmem:[#allocation61_spill] sm:$0xff] }
 0x4a5   : > { %2171 = vmatpush.msrb.mxu1 %v1894_v42  ;;  %2252 = vmatpush.msrb.mxu2 %v1890_v29  ;;  %v1876_v24 = vsel %vm746_vm8, %v10496_v46, %v4522_v47  ;;  %v1862_v42 = vsel %vm746_vm8, %v4481_v12, %v10500_v1  ;;  %v10502_v29 = vld [vmem:[#allocation68_spill] sm:$0xff]  ;;  %v10503_v47 = vld [vmem:[#allocation73_spill] sm:$0xff]  ;;  %v4687_v12 = vunpack.i.h.bf16 %v8014_v18  ;;  %v4707_v44 = vunpack.i.h.bf16 %v8024_v45 }
 0x4a6   : > { %2213 = vmatpush.msra.mxu3 %v1883_v53  ;;  %2094 = vmatpush.msra.mxu0 %v1874_v50  ;;  %v1871_v32 = vsel %vm746_vm8, %v10499_v56, %v10498_v59  ;;  %v10504_v13 = vunpack.i.h.bf16 %v10503_v47  ;;  %v10506_v53 = vunpack.i.l.bf16 %v7984_v3  ;;  %v10508_v50 = vld [vmem:[#allocation64_spill] sm:$0xff]  ;;  %v1951_v46 = vsel %vm746_vm8, %v4606_v20, %v4671_v43  ;;  %v10512_v56 = vld [vmem:[#allocation58_spill] sm:$0xff] }
 0x4a7   : > { %2172 = vmatpush.msrb.mxu1 %v1888_v49  ;;  %2253 = vmatpush.msrb.mxu2 %v1884_v27  ;;  %v8252_v52 = vpop.permute.xlu0 %4769  ;;  %v10505_v49 = vunpack.i.l.bf16 %v10503_v47  ;;  %v4790_v27 = vpop.permute.xlu1 %4789  ;;  %v10509_v3 = vld [vmem:[#allocation72_spill] sm:$0xff]  ;;  %v1961_v19 = vsel %vm746_vm8, %v4711_v61, %v4777_v0  ;;  %v1945_v11 = vsel %vm746_vm8, %v4621_v35, %v4687_v12  ;;  %v1939_v17 = vsel %vm746_vm8, %v4636_v8, %v4707_v44 }
 0x4a8   : > { %2214 = vmatpush.msra.mxu3 %v1877_v14  ;;  %v4772_v9 = vunpack.i.h.bf16 %v8252_v52  ;;  %2095 = vmatpush.msra.mxu0 %v10495_v40  ;;  %v10510_v14 = vunpack.i.h.bf16 %v10509_v3  ;;  %v4792_v43 = vunpack.i.h.bf16 %v4790_v27  ;;  %v4756_v8 = vunpack.i.l.bf16 %v8203_v36 }
 0x4a9   : > { %2173 = vmatpush.msrb.mxu1 %v1882_v26  ;;  %2254 = vmatpush.msrb.mxu2 %v1878_v5  ;;  %v1866_v25 = vsel %vm746_vm8, %v10505_v49, %v10504_v13  ;;  %v4781_v26 = vunpack.i.l.bf16 %v8269_v21  ;;  %v10511_v5 = vunpack.i.l.bf16 %v10509_v3  ;;  %v4782_v16 = vunpack.i.h.bf16 %v8269_v21  ;;  %v10517_v21 = vld [vmem:[#allocation13_spill] sm:$0xff] }
 0x4aa   : > { %2215 = vmatpush.msra.mxu3 %v1871_v32  ;;  %2096 = vmatpush.msra.mxu0 %v1862_v42  ;;  %v1967_v60 = vsel %vm746_vm8, %v10506_v53, %v4772_v9  ;;  %v4731_v32 = vunpack.i.l.bf16 %v10512_v56  ;;  %v4741_v42 = vunpack.i.l.bf16 %v8151_v28  ;;  %v1915_v41 = vsel %vm746_vm8, %v4706_v2, %v4756_v8  ;;  %v2331_v8 = vld [vmem:[#allocation2 + $0x68] sm:$0xff] }
 0x4ab   : > { %2174 = vmatpush.msrb.mxu1 %v1876_v24  ;;  %2255 = vmatpush.msrb.mxu2 %v10501_v62  ;;  %v1864_v40 = vsel %vm746_vm8, %v10511_v5, %v10510_v14  ;;  %v4791_v24 = vunpack.i.l.bf16 %v4790_v27  ;;  %v1968_v1 = vsel %vm746_vm8, %v4772_v9, %v4781_v26  ;;  %v4762_v9 = vunpack.i.h.bf16 %v8153_v57  ;;  %v10516_v57 = vld [vmem:[#allocation71_spill] sm:$0xff] }
 0x4ac   : > { %2097 = vmatmul.f32.vlgmr.msra.gmra.mxu0 %v8072_v31  ;;  %2216 = vmatpush.msra.mxu3 %v10507_v39  ;;  %v1933_v35 = vsel %vm746_vm8, %v4651_v58, %v4731_v32  ;;  %v1927_v28 = vsel %vm746_vm8, %v4667_v15, %v4741_v42  ;;  %v4767_v58 = vunpack.i.h.bf16 %v8210_v55  ;;  %v4771_v15 = vunpack.i.l.bf16 %v8252_v52  ;;  %v2327_v32 = vld [vmem:[#allocation2] sm:$0xff] }
 0x4ad   : > { %2175 = vmatpush.msrb.mxu1 %v10502_v29  ;;  %2256 = vmatpush.msrb.mxu2 %v1866_v25  ;;  %v1969_v62 = vsel %vm746_vm8, %v4781_v26, %v4791_v24  ;;  %v1909_v36 = vsel %vm746_vm8, %v4727_v10, %v4762_v9  ;;  %v4512_v10 = vunpack.i.h.bf16 %v10513_v33  ;;  %v10518_v25 = vld [vmem:[#allocation9_spill] sm:$0xff] }
 0x4ae   : > { %2281 = vmatpush.msrb.mxu0 %v10508_v50  ;;  %2217 = vmatmul.f32.vlgmr.msra.gmra.mxu3 %v8072_v31  ;;  %v1903_v18 = vsel %vm746_vm8, %v4737_v38, %v4767_v58  ;;  %v1897_v45 = vsel %vm746_vm8, %v4746_v37, %v4771_v15  ;;  %v1885_v38 = vsel %vm746_vm8, %v4761_v34, %v4782_v16  ;;  %v10519_v50 = vld [vmem:[#allocation6_spill] sm:$0xff] }
 0x4af   : > { %2235 = vmatpush.msrb.mxu3 %v1967_v60  ;;  %2257 = vmatmul.f32.vlgmr.msrb.gmra.mxu2 %v8072_v31  ;;  %v4785_v59 = vpop.permute.xlu0 %4784 }
 0x4b0   : > { %2176 = vmatpush.msrb.mxu1 %v1864_v40  ;;  %2282 = vmatpush.msrb.mxu0 %v1951_v46  ;;  %v4786_v20 = vunpack.i.l.bf16 %v4785_v59  ;;  %v4787_v48 = vunpack.i.h.bf16 %v4785_v59  ;;  %v10520_v40 = vld [vmem:[#allocation5_spill] sm:$0xff]  ;;  %v10521_v59 = vld [vmem:[#allocation15_spill] sm:$0xff] }
 0x4b1   : > { %2177 = vmatmul.f32.vlgmr.msrb.gmra.mxu1 %v8072_v31  ;;  %2236 = vmatpush.msrb.mxu3 %v1961_v19 }
 0x4b2   : > { %2275 = vmatpush.msra.mxu1 %v1968_v1  ;;  %2283 = vmatpush.msrb.mxu0 %v1945_v11  ;;  %v1962_v61 = vsel %vm746_vm8, %v4777_v0, %v4786_v20  ;;  %v1963_v7 = vsel %vm746_vm8, %v4786_v20, %v4792_v43  ;;  %v4776_v0 = vunpack.i.l.bf16 %v8220_v4  ;;  %v1879_v51 = vsel %vm746_vm8, %v4766_v6, %v4787_v48  ;;  %v2328_v1 = vld [vmem:[#allocation2 + $0xd8] sm:$0xff] }
 0x4b3   : > { %v2329_v20 = vld [vmem:[#allocation2 + $0x18] sm:$0xff] }
 0x4b4   : > { %2284 = vmatpush.msrb.mxu0 %v1939_v17  ;;  %2276 = vmatpush.msra.mxu1 %v1962_v61  ;;  %v1891_v2 = vsel %vm746_vm8, %v4752_v54, %v4776_v0  ;;  %v2330_v17 = vld [vmem:[#allocation2 + $0x50] sm:$0xff] }
 0x4b5   : > { %v2332_v0 = vld [vmem:[#allocation2 + $0x30] sm:$0xff] }
 0x4b6   : > { %2315 = vmatpush.msrb.mxu1 %v1969_v62  ;;  %2285 = vmatpush.msrb.mxu0 %v1933_v35 }
 0x4b7   : > { %3553 = vmatmul.msk.f32.vlgmr.msrb.gmra.mxu3 %vm963_vm9, %v8010_v63 }
 0x4b8   : > { %2316 = vmatpush.msrb.mxu1 %v1963_v7  ;;  %2286 = vmatpush.msrb.mxu0 %v1927_v28 }
 0x4b9   : > { %3554 = vmatmul.msk.f32.vlgmr.msra.gmra.mxu1 %vm963_vm9, %v8010_v63 }
 0x4ba   : > { %2287 = vmatpush.msrb.mxu0 %v1921_v23 }
 0x4bc   : > { %2288 = vmatpush.msrb.mxu0 %v1915_v41 }
 0x4be   : > { %2289 = vmatpush.msrb.mxu0 %v1909_v36 }
 0x4c0   : > { %2290 = vmatpush.msrb.mxu0 %v1903_v18  ;;  %v10522_v18 = vld [vmem:[#allocation7_spill] sm:$0xff] }
 0x4c1   : > { %3555 = vmatmul.msk.f32.vlgmr.msrb.gmra.mxu1 %vm963_vm9, %v8010_v63  ;;  %v10514_v63 = vunpack.i.l.bf16 %v10513_v33 }
 0x4c2   : > { %2291 = vmatpush.msrb.mxu0 %v1897_v45 }
 0x4c3   : > { %v1873_v37 = vsel %vm746_vm8, %v10514_v63, %v4512_v10 }
 0x4c4   : > { %2292 = vmatpush.msrb.mxu0 %v1891_v2 }
 0x4c6   : > { %2293 = vmatpush.msrb.mxu0 %v1885_v38 }
 0x4c8   : > { %2294 = vmatpush.msrb.mxu0 %v1879_v51 }
 0x4ca   : > { %2295 = vmatpush.msrb.mxu0 %v1873_v37 }
 0x4cc   : > { %2296 = vmatpush.msrb.mxu0 %v10515_v30 }
 0x4cd   : > { %2297 = vmatmul.f32.vlgmr.msrb.gmra.mxu0 %v8072_v31 }
 0x4e6   : > { %v2158_v4 = vpop.f32.mrf.mxu3 }
 0x50b   : > { %v2118_v55 = vpop.f32.mrf.mxu1 }
 0x50f   : > { %v2138_v54 = vpop.f32.mrf.mxu2 }
 0x510   : > { %v2139_v52 = vadd.f32 %v2138_v54, %v10516_v57 }
 0x512   : > { %v2159_v34 = vadd.f32 %v2158_v4, %v2139_v52  ;;  %v2198_v6 = vpop.f32.mrf.mxu3 }
 0x514   : > { %v2322_v29 = vmul.f32 %v2159_v34, %v10517_v21 }
 0x516   : > { %2360 = vst [vmem:[#allocation2 + $0x40] sm:$0xff] %v2322_v29  ;;  %v2334_v42 = vsub.f32 %v2322_v29, %v2328_v1 }
 0x518   : > { %v2340_v62 = vand.u32 2147483647, %v2334_v42 }
 0x529   : > { %v2098_v47 = vpop.f32.mrf.mxu0 }
 0x52a   : > { %v2099_v13 = vadd.f32 %v2098_v47, %v10516_v57 }
 0x52c   : > { %v2119_v49 = vadd.f32 %v2118_v55, %v2099_v13 }
 0x52e   : > { %v2321_v53 = vmul.f32 %v2119_v49, %v10518_v25  ;;  %v2178_v60 = vpop.f32.mrf.mxu1 }
 0x52f   : > { %v2179_v12 = vadd.f32 %v2178_v60, %v10516_v57 }
 0x530   : > { %2359 = vst [vmem:[#allocation2 + $0x58] sm:$0xff] %v2321_v53  ;;  %v2333_v11 = vsub.f32 %v2321_v53, %v2327_v32 }
 0x531   : > { %v2199_v31 = vadd.f32 %v2198_v6, %v2179_v12  ;;  %v2218_v27 = vpop.f32.mrf.mxu3 }
 0x532   : > { %v2258_v39 = vpop.f32.mrf.mxu2  ;;  %v2219_v5 = vadd.f32 %v2218_v27, %v10516_v57  ;;  %v2339_v61 = vand.u32 2147483647, %v2333_v11 }
 0x533   : > { %v2323_v44 = vmul.f32 %v2199_v31, %v10519_v50  ;;  %v2259_v26 = vadd.f32 %v2258_v39, %v10516_v57 }
 0x534   : > { %v2345_v35 = vadd.f32 %v2340_v62, %v2339_v61 }
 0x535   : > { %2361 = vst [vmem:[#allocation2 + $0xc8] sm:$0xff] %v2323_v44  ;;  %v2335_v43 = vsub.f32 %v2323_v44, %v2329_v20 }
 0x536   : > { %v2278_v3 = vpop.f32.mrf.mxu1 }
 0x537   : > { %v2279_v14 = vadd.f32 %v2278_v3, %v2259_v26  ;;  %v2341_v7 = vand.u32 2147483647, %v2335_v43 }
 0x539   : > { %v2325_v46 = vmul.f32 %v2279_v14, %v10520_v40  ;;  %v2346_v36 = vadd.f32 %v2345_v35, %v2341_v7 }
 0x53a   : > { %v2238_v24 = vpop.f32.mrf.mxu3 }
 0x53b   : > { %v2239_v19 = vadd.f32 %v2238_v24, %v2219_v5  ;;  %2363 = vst [vmem:[#allocation2 + $0x90] sm:$0xff] %v2325_v46  ;;  %v2337_v41 = vsub.f32 %v2325_v46, %v2331_v8 }
 0x53d   : > { %v2324_v56 = vmul.f32 %v2239_v19, %v10521_v59  ;;  %v2343_v48 = vand.u32 2147483647, %v2337_v41 }
 0x53e   : > { %v2318_v9 = vpop.f32.mrf.mxu1 }
 0x53f   : > { %2362 = vst [vmem:[#allocation2 + $0xe0] sm:$0xff] %v2324_v56  ;;  %v2336_v22 = vsub.f32 %v2324_v56, %v2330_v17 }
 0x541   : > { %v2342_v23 = vand.u32 2147483647, %v2336_v22 }
 0x543   : > { %v2347_v45 = vadd.f32 %v2346_v36, %v2342_v23 }
 0x545   : > { %v2348_v10 = vadd.f32 %v2347_v45, %v2343_v48 }
 0x54a   : > { %v2298_v28 = vpop.f32.mrf.mxu0 }
 0x54b   : > { %v2299_v58 = vadd.f32 %v2298_v28, %v10516_v57 }
 0x54d   : > { %v2319_v15 = vadd.f32 %v2318_v9, %v2299_v58 }
 0x54f   : > { %v2326_v16 = vmul.f32 %v2319_v15, %v10522_v18 }
 0x551   : > { %v2338_v2 = vsub.f32 %v2326_v16, %v2332_v0  ;;  %2364 = vst [vmem:[#allocation2 + $0x70] sm:$0xff] %v2326_v16 }
 0x553   : > { %v2344_v33 = vand.u32 2147483647, %v2338_v2 }
 0x555   : > { %v2349_v38 = vadd.f32 %v2348_v10, %v2344_v33 }
 0x557   : > { %2350 = vadd.xlane.f32.xlu2 %v2349_v38 }
 0x5ca   : > { %v2351_v51 = vpop.xlane.xlu2 %2350 }
 0x5cb   : > { %v2352_v63 = vrot.slane %v2351_v51, 4 }
 0x5cd   : > { %v2353_v37 = vadd.f32 %v2352_v63, %v2351_v51 }
 0x5cf   : > { %v2354_v30 = vrot.slane %v2353_v37, 2 }
 0x5d1   : > { %v2355_v54 = vadd.f32 %v2354_v30, %v2353_v37 }
 0x5d3   : > { %v2356_v4 = vrot.slane %v2355_v54, 1 }
 0x5d5   : > { %v2357_v57 = vadd.f32 %v2356_v4, %v2355_v54 }
 0x5d7   : > { %3564 = vpush %v2357_v57 }
 0x608   : > { %s3565_s15 = spop %3564 }
 0x609   : > { %p2366_p5 = scmp.lt.f32.partialorder %s3565_s15, 1.0 }
 0x60b   : > { %s2367_s16 = scalar_select %p2366_p5, 1, 0 }
 0x60d   : > { %2368 = sst [smem:[#allocation3]] %s2367_s16 }
 0x60e PF: > { %p2369_p6 = scmp.ne.s32.totalorder %s10714_s26, 0 }
 0x610   : > { %p2370_p7 = pnand %p2369_p6, %p1239_p2 }
 0x612   : > { %2373 = sbr.rel (%p2370_p7) target bundleno = 2422 (0x976), region = 40 }
 0x617   : > { %v2384_v52 = vld [vmem:[#allocation2 + $0xd0] sm:$0xff]  ;;  %v2380_v21 = vld [vmem:[#allocation2 + $0xe0] sm:$0xff]  ;;  %v2376_v6 = vld [vmem:[#allocation2 + $0x38] sm:$0xff]  ;;  %s5417_s4 = smov 127   ;;  %s5418_s17 = smov 126   ;;  %v5424_v62 = vmov 0  }
 0x618   : > { %v2385_v34 = vld [vmem:[#allocation2 + $0x10] sm:$0xff]  ;;  %v2377_v47 = vld [vmem:[#allocation2 + $0x58] sm:$0xff]  ;;  %v2386_v25 = vld [vmem:[#allocation2 + $0x28] sm:$0xff]  ;;  %s5419_s18 = smov 110   ;;  %s5420_s19 = smov 109   ;;  %5069 = vset.pattern.permute.xlu1 %v5424_v62  ;;  %5385 = vset.pattern.permute.xlu0 %v5424_v62 }
 0x619   : > { %v8377_v29 = vpack.i.bf16 %v2385_v34, %v2384_v52  ;;  %v2381_v55 = vld [vmem:[#allocation2 + $0x90] sm:$0xff]  ;;  %v8381_v49 = vpack.i.bf16 %v2377_v47, %v2376_v6  ;;  %v2387_v53 = vld [vmem:[#allocation2 + $0xa0] sm:$0xff]  ;;  %v2383_v12 = vld [vmem:[#allocation2 + $0xa8] sm:$0xff]  ;;  %s5421_s1 = smov 108   ;;  %v8429_v59 = vpack.i.bf16 %v2386_v25, %v2385_v34  ;;  %s5422_s20 = smov 92  }
 0x61a   : > { %v8379_v13 = vpack.i.bf16 %v2381_v55, %v2380_v21  ;;  %v2382_v60 = vld [vmem:[#allocation2 + $0x70] sm:$0xff]  ;;  %v2378_v31 = vld [vmem:[#allocation2 + $0x40] sm:$0xff]  ;;  %v2379_v27 = vld [vmem:[#allocation2 + $0xc8] sm:$0xff]  ;;  %v8386_v39 = vpack.i.bf16 %v2387_v53, %v2386_v25  ;;  %s5423_s21 = smov 91   ;;  %s5425_s22 = smov 90  }
 0x61b   : > { %4815 = vrot.lane.b32.xlu2 %v8377_v29, %s5417_s4  ;;  %4795 = vrot.lane.b32.xlu0 %v8381_v49, %s5417_s4  ;;  %v8388_v50 = vpack.i.bf16 %v2383_v12, %v2382_v60  ;;  %v8390_v44 = vpack.i.bf16 %v2379_v27, %v2378_v31  ;;  %v2388_v26 = vld [vmem:[#allocation2 + $0xf8] sm:$0xff]  ;;  %v2389_v3 = vld [vmem:[#allocation2 + $0x20] sm:$0xff]  ;;  %v8412_v5 = vpack.i.bf16 %v2382_v60, %v2381_v55  ;;  %s5426_s23 = smov 19   ;;  %s5427_s28 = smov 0  }
 0x61c   : > { %4805 = vrot.lane.b32.xlu1 %v8379_v13, %s5417_s4  ;;  %v8395_v14 = vpack.i.bf16 %v2389_v3, %v2388_v26  ;;  %v8414_v40 = vpack.i.bf16 %v2380_v21, %v2379_v27  ;;  %v8416_v46 = vpack.i.bf16 %v2378_v31, %v2377_v47  ;;  %v2390_v24 = vld [vmem:[#allocation2 + $0xc0] sm:$0xff]  ;;  %v8427_v19 = vpack.i.bf16 %v2388_v26, %v2387_v53  ;;  %v2391_v32 = vld [vmem:[#allocation2 + $0x98] sm:$0xff]  ;;  %3482 = sst [smem:[#allocation4]] %s5427_s28 }
 0x61d   : > { %v8431_v56 = vpack.i.bf16 %v2384_v52, %v2390_v24  ;;  %v8436_v1 = vpack.i.bf16 %v2391_v32, %v2389_v3 }
 0x623   : > { %4820 = vrot.lane.b32.xlu2 %v8386_v39, %s5417_s4  ;;  %4800 = vrot.lane.b32.xlu0 %v8390_v44, %s5417_s4 }
 0x624   : > { %4810 = vrot.lane.b32.xlu1 %v8388_v50, %s5417_s4 }
 0x62b   : > { %4835 = vrot.lane.b32.xlu2 %v8390_v44, %s5418_s17  ;;  %4825 = vrot.lane.b32.xlu0 %v8395_v14, %s5417_s4 }
 0x62c   : > { %4830 = vrot.lane.b32.xlu1 %v8381_v49, %s5418_s17 }
 0x633   : > { %4850 = vrot.lane.b32.xlu2 %v8377_v29, %s5418_s17  ;;  %4840 = vrot.lane.b32.xlu0 %v8379_v13, %s5418_s17 }
 0x634   : > { %4845 = vrot.lane.b32.xlu1 %v8388_v50, %s5418_s17 }
 0x63b   : > { %4865 = vrot.lane.b32.xlu2 %v8381_v49, %s5419_s18  ;;  %4855 = vrot.lane.b32.xlu0 %v8386_v39, %s5418_s17 }
 0x63c   : > { %4860 = vrot.lane.b32.xlu1 %v8395_v14, %s5418_s17 }
 0x643   : > { %4880 = vrot.lane.b32.xlu2 %v8388_v50, %s5419_s18  ;;  %4870 = vrot.lane.b32.xlu0 %v8390_v44, %s5419_s18 }
 0x644   : > { %4875 = vrot.lane.b32.xlu1 %v8379_v13, %s5419_s18 }
 0x64b   : > { %4895 = vrot.lane.b32.xlu2 %v8395_v14, %s5419_s18  ;;  %4885 = vrot.lane.b32.xlu0 %v8377_v29, %s5419_s18 }
 0x64c   : > { %4890 = vrot.lane.b32.xlu1 %v8386_v39, %s5419_s18 }
 0x653   : > { %4910 = vrot.lane.b32.xlu2 %v8412_v5, %s5420_s19  ;;  %4900 = vrot.lane.b32.xlu0 %v8416_v46, %s5420_s19 }
 0x654   : > { %4905 = vrot.lane.b32.xlu1 %v8414_v40, %s5420_s19 }
 0x65b   : > { %4925 = vrot.lane.b32.xlu2 %v8395_v14, %s5420_s19  ;;  %4915 = vrot.lane.b32.xlu0 %v8377_v29, %s5420_s19 }
 0x65c   : > { %4920 = vrot.lane.b32.xlu1 %v8386_v39, %s5420_s19 }
 0x663   : > { %4940 = vrot.lane.b32.xlu2 %v8412_v5, %s5421_s1  ;;  %4930 = vrot.lane.b32.xlu0 %v8416_v46, %s5421_s1 }
 0x664   : > { %4935 = vrot.lane.b32.xlu1 %v8414_v40, %s5421_s1 }
 0x66b   : > { %4955 = vrot.lane.b32.xlu2 %v8427_v19, %s5421_s1  ;;  %4945 = vrot.lane.b32.xlu0 %v8431_v56, %s5421_s1 }
 0x66c   : > { %4950 = vrot.lane.b32.xlu1 %v8429_v59, %s5421_s1 }
 0x673   : > { %4970 = vrot.lane.b32.xlu2 %v8414_v40, %s5422_s20  ;;  %4960 = vrot.lane.b32.xlu0 %v8436_v1, %s5421_s1 }
 0x674   : > { %4965 = vrot.lane.b32.xlu1 %v8416_v46, %s5422_s20 }
 0x675   : > { %v4816_v11 = vpop.permute.xlu2 %4815 }
 0x676   : > { %v4818_v20 = vunpack.i.h.bf16 %v4816_v11  ;;  %v4817_v35 = vunpack.i.l.bf16 %v4816_v11 }
 0x678   : > { %v8464_v23 = vsel %vm193_vm0, %v4817_v35, %v4818_v20 }
 0x679   : > { %10524 = vst [vmem:[#allocation75_spill] sm:$0xff] %v8464_v23 }
 0x67b   : > { %4985 = vrot.lane.b32.xlu2 %v8429_v59, %s5422_s20  ;;  %4975 = vrot.lane.b32.xlu0 %v8412_v5, %s5422_s20 }
 0x67c   : > { %4980 = vrot.lane.b32.xlu1 %v8431_v56, %s5422_s20 }
 0x67d   : > { %v4821_v42 = vpop.permute.xlu2 %4820 }
 0x67e   : > { %v4822_v17 = vunpack.i.l.bf16 %v4821_v42  ;;  %v4823_v2 = vunpack.i.h.bf16 %v4821_v42 }
 0x680   : > { %v8445_v61 = vsel %vm193_vm0, %v4818_v20, %v4822_v17  ;;  %v8501_v37 = vsel %vm193_vm0, %v4822_v17, %v4823_v2  ;;  %v10534_v20 = vld [vmem:[#allocation14_spill] sm:$0xff] }
 0x681   : > { %10523 = vst [vmem:[#allocation74_spill] sm:$0xff] %v8445_v61 }
 0x682   : > { %10525 = vst [vmem:[#allocation76_spill] sm:$0xff] %v8501_v37 }
 0x683   : > { %5000 = vrot.lane.b32.xlu2 %v8416_v46, %s5423_s21  ;;  %4990 = vrot.lane.b32.xlu0 %v8427_v19, %s5422_s20 }
 0x684   : > { %4995 = vrot.lane.b32.xlu1 %v8436_v1, %s5422_s20 }
 0x685   : > { %v8450_v43 = vpop.permute.xlu2 %4835 }
 0x686   : > { %v4837_v33 = vunpack.i.l.bf16 %v8450_v43  ;;  %v4838_v21 = vunpack.i.h.bf16 %v8450_v43 }
 0x688   : > { %v8531_v60 = vsel %vm234_vm3, %v4837_v33, %v4838_v21 }
 0x689   : > { %10528 = vst [vmem:[#allocation79_spill] sm:$0xff] %v8531_v60 }
 0x68b   : > { %5015 = vrot.lane.b32.xlu2 %v8431_v56, %s5423_s21  ;;  %5005 = vrot.lane.b32.xlu0 %v8414_v40, %s5423_s21 }
 0x68c   : > { %5010 = vrot.lane.b32.xlu1 %v8412_v5, %s5423_s21 }
 0x68d   : > { %v8455_v22 = vpop.permute.xlu2 %4850  ;;  %v8459_v8 = vpop.permute.xlu0 %4795 }
 0x68e   : > { %v8457_v7 = vpop.permute.xlu1 %4805  ;;  %v10063_v6 = vunpack.i.l.bf16 %v8455_v22  ;;  %v10064_v42 = vunpack.i.h.bf16 %v8455_v22 }
 0x68f   : > { %v4808_v28 = vunpack.i.h.bf16 %v8457_v7  ;;  %v4807_v9 = vunpack.i.l.bf16 %v8457_v7 }
 0x691   : > { %v8469_v58 = vsel %vm193_vm0, %v4807_v9, %v4808_v28 }
 0x693   : > { %5030 = vrot.lane.b32.xlu2 %v8436_v1, %s5423_s21  ;;  %5020 = vrot.lane.b32.xlu0 %v8429_v59, %s5423_s21 }
 0x694   : > { %5025 = vrot.lane.b32.xlu1 %v8427_v19, %s5423_s21 }
 0x695   : > { %v8476_v15 = vpop.permute.xlu2 %4865  ;;  %v8480_v0 = vpop.permute.xlu0 %4800 }
 0x696   : > { %v8478_v36 = vpop.permute.xlu1 %4810  ;;  %v4803_v32 = vunpack.i.h.bf16 %v8480_v0 }
 0x697   : > { %v4813_v18 = vunpack.i.h.bf16 %v8478_v36  ;;  %v10065_v16 = vunpack.i.l.bf16 %v8478_v36 }
 0x699   : > { %v2440_v45 = vsel %vm193_vm0, %v4813_v18, %v4817_v35  ;;  %v2439_v48 = vsel %vm193_vm0, %v4808_v28, %v10065_v16 }
 0x69b   : > { %5045 = vrot.lane.b32.xlu2 %v8412_v5, %s5425_s22  ;;  %5035 = vrot.lane.b32.xlu0 %v8416_v46, %s5425_s22 }
 0x69c   : > { %5040 = vrot.lane.b32.xlu1 %v8414_v40, %s5425_s22 }
 0x69d   : > { %v8495_v10 = vpop.permute.xlu2 %4880  ;;  %v8498_v63 = vpop.permute.xlu0 %4825 }
 0x69e   : > { %v4882_v38 = vunpack.i.l.bf16 %v8495_v10  ;;  %v4831_v51 = vpop.permute.xlu1 %4830  ;;  %v4827_v54 = vunpack.i.l.bf16 %v8498_v63  ;;  %v10060_v52 = vunpack.i.h.bf16 %v8498_v63 }
 0x69f   : > { %v4833_v30 = vunpack.i.h.bf16 %v4831_v51  ;;  %v4832_v47 = vunpack.i.l.bf16 %v4831_v51 }
 0x6a0   : > { %v8506_v4 = vpack.i.bf16 %v4882_v38, %v2439_v48  ;;  %v8513_v34 = vsel %vm193_vm0, %v4823_v2, %v4827_v54  ;;  %v2445_v25 = vsel %vm193_vm0, %v4827_v54, %v10060_v52  ;;  %v4867_v54 = vunpack.i.l.bf16 %v8476_v15 }
 0x6a1   : > { %v8509_v57 = vsel %vm234_vm3, %v4833_v30, %v4837_v33  ;;  %10527 = vst [vmem:[#allocation78_spill] sm:$0xff] %v8513_v34  ;;  %v8547_v24 = vsel %vm234_vm3, %v4832_v47, %v4833_v30  ;;  %v4868_v30 = vunpack.i.h.bf16 %v8476_v15  ;;  %v4798_v47 = vunpack.i.h.bf16 %v8459_v8 }
 0x6a2   : > { %10526 = vst [vmem:[#allocation77_spill] sm:$0xff] %v8506_v4 }
 0x6a3   : > { %5060 = vrot.lane.b32.xlu2 %v8427_v19, %s5425_s22  ;;  %5050 = vrot.lane.b32.xlu0 %v8431_v56, %s5425_s22  ;;  %10530 = vst [vmem:[#allocation81_spill] sm:$0xff] %v8547_v24  ;;  %v8609_v15 = vsel %vm275_vm1, %v4867_v54, %v4868_v30 }
 0x6a4   : > { %5055 = vrot.lane.b32.xlu1 %v8429_v59, %s5425_s22  ;;  %10538 = vst [vmem:[#allocation88_spill] sm:$0xff] %v8609_v15 }
 0x6a5   : > { %v8528_v53 = vpop.permute.xlu2 %4895  ;;  %v8536_v27 = vpop.permute.xlu0 %4840 }
 0x6a6   : > { %v4898_v12 = vunpack.i.h.bf16 %v8528_v53  ;;  %v8534_v31 = vpop.permute.xlu1 %4845  ;;  %v4843_v5 = vunpack.i.h.bf16 %v8536_v27  ;;  %v4842_v40 = vunpack.i.l.bf16 %v8536_v27 }
 0x6a7   : > { %v4848_v26 = vunpack.i.h.bf16 %v8534_v31  ;;  %v10061_v3 = vunpack.i.l.bf16 %v8534_v31 }
 0x6a8   : > { %v8544_v46 = vpack.i.bf16 %v4898_v12, %v2445_v25  ;;  %v8564_v56 = vsel %vm234_vm3, %v4838_v21, %v4842_v40 }
 0x6a9   : > { %v8552_v19 = vsel %vm234_vm3, %v4848_v26, %v10063_v6  ;;  %v8559_v59 = vsel %vm234_vm3, %v4843_v5, %v10061_v3  ;;  %10533 = vst [vmem:[#allocation84_spill] sm:$0xff] %v8564_v56  ;;  %v4797_v26 = vunpack.i.l.bf16 %v8459_v8 }
 0x6aa   : > { %10529 = vst [vmem:[#allocation80_spill] sm:$0xff] %v8544_v46 }
 0x6ab   : > { %10531 = vst [vmem:[#allocation82_spill] sm:$0xff] %v8552_v19  ;;  %5065 = vrot.lane.b32.xlu0 %v8436_v1, %s5425_s22  ;;  %5071 = vrot.lane.b32.xlu2 %v8381_v49, %s5426_s23 }
 0x6ac   : > { %10532 = vst [vmem:[#allocation83_spill] sm:$0xff] %v8559_v59  ;;  %2724 = vperm.xlu1 %5069, %v10534_v20  }
 0x6ad   : > { %v8574_v17 = vpop.permute.xlu2 %4910  ;;  %v4856_v35 = vpop.permute.xlu0 %4855 }
 0x6ae   : > { %v10074_v43 = vunpack.i.h.bf16 %v8574_v17  ;;  %v8577_v62 = vpop.permute.xlu1 %4860  ;;  %v4858_v18 = vunpack.i.h.bf16 %v4856_v35  ;;  %v4857_v48 = vunpack.i.l.bf16 %v4856_v35 }
 0x6af   : > { %v4862_v28 = vunpack.i.l.bf16 %v8577_v62  ;;  %v10062_v21 = vunpack.i.h.bf16 %v8577_v62 }
 0x6b0   : > { %v8582_v2 = vpack.i.bf16 %v2440_v45, %v10074_v43  ;;  %v8590_v1 = vsel %vm234_vm3, %v10064_v42, %v4857_v48  ;;  %v8593_v51 = vsel %vm234_vm3, %v4857_v48, %v4858_v18 }
 0x6b1   : > { %v8585_v33 = vsel %vm234_vm3, %v4858_v18, %v4862_v28  ;;  %10536 = vst [vmem:[#allocation86_spill] sm:$0xff] %v8590_v1  ;;  %v2485_v20 = vsel %vm234_vm3, %v4862_v28, %v10062_v21 }
 0x6b2   : > { %10535 = vst [vmem:[#allocation85_spill] sm:$0xff] %v8582_v2 }
 0x6b3   : > { %10537 = vst [vmem:[#allocation87_spill] sm:$0xff] %v8593_v51  ;;  %5076 = vrot.lane.b32.xlu0 %v8390_v44, %s5426_s23  ;;  %5086 = vrot.lane.b32.xlu2 %v8388_v50, %s5426_s23 }
 0x6b4   : > { %5081 = vrot.lane.b32.xlu1 %v8379_v13, %s5426_s23 }
 0x6b5   : > { %v8605_v25 = vpop.permute.xlu2 %4925  ;;  %v4871_v13 = vpop.permute.xlu0 %4870 }
 0x6b6   : > { %v10068_v35 = vunpack.i.h.bf16 %v8605_v25  ;;  %v4876_v18 = vpop.permute.xlu1 %4875  ;;  %v4873_v44 = vunpack.i.h.bf16 %v4871_v13  ;;  %v4872_v55 = vunpack.i.l.bf16 %v4871_v13  ;;  %v4802_v13 = vunpack.i.l.bf16 %v8480_v0 }
 0x6b7   : > { %v4878_v48 = vunpack.i.h.bf16 %v4876_v18  ;;  %v4877_v11 = vunpack.i.l.bf16 %v4876_v18  ;;  %v2434_v0 = vsel %vm193_vm0, %v4797_v26, %v4798_v47 }
 0x6b8   : > { %v8618_v8 = vpack.i.bf16 %v10068_v35, %v2485_v20  ;;  %v8632_v18 = vsel %vm275_vm1, %v4868_v30, %v4872_v55  ;;  %v8636_v45 = vsel %vm275_vm1, %v4872_v55, %v4873_v44  ;;  %v4883_v55 = vunpack.i.h.bf16 %v8495_v10 }
 0x6b9   : > { %v8623_v54 = vsel %vm275_vm1, %v4878_v48, %v4882_v38  ;;  %v8626_v28 = vsel %vm275_vm1, %v4877_v11, %v4878_v48  ;;  %v8629_v41 = vsel %vm275_vm1, %v4873_v44, %v4877_v11  ;;  %v4897_v11 = vunpack.i.l.bf16 %v8528_v53 }
 0x6ba   : > { %10539 = vst [vmem:[#allocation89_spill] sm:$0xff] %v8618_v8  ;;  %v2437_v44 = vsel %vm193_vm0, %v4803_v32, %v4807_v9  ;;  %v2435_v38 = vsel %vm193_vm0, %v4798_v47, %v4802_v13  ;;  %v2436_v20 = vsel %vm193_vm0, %v4802_v13, %v4803_v32 }
 0x6bb   : > { %10540 = vst [vmem:[#allocation90_spill] sm:$0xff] %v8623_v54  ;;  %5091 = vrot.lane.b32.xlu0 %v8377_v29, %s5426_s23  ;;  %v5110_v32 = vpack.i.bf16 %v2437_v44, %v2436_v20  ;;  %v5105_v13 = vpack.i.bf16 %v2435_v38, %v2434_v0  ;;  %v2478_v44 = vsel %vm234_vm3, %v4842_v40, %v4843_v5  ;;  %v10069_v5 = vunpack.i.l.bf16 %v8605_v25 }
 0x6bc   : > { %10541 = vst [vmem:[#allocation91_spill] sm:$0xff] %v8626_v28  ;;  %5096 = vrot.lane.b32.xlu1 %v8386_v39, %s5426_s23  ;;  %v8661_v39 = vsel %vm275_vm1, %v4897_v11, %v4898_v12  ;;  %5101 = vrot.lane.b32.xlu2 %v8395_v14, %s5426_s23  ;;  %v10558_v14 = vunpack.i.l.bf16 %v8605_v25 }
 0x6bd   : > { %10542 = vst [vmem:[#allocation92_spill] sm:$0xff] %v8629_v41  ;;  %v8651_v30 = vpop.permute.xlu2 %4940  ;;  %v8663_v48 = vpop.permute.xlu0 %4885 }
 0x6be   : > { %10543 = vst [vmem:[#allocation93_spill] sm:$0xff] %v8661_v39  ;;  %v4891_v29 = vpop.permute.xlu1 %4890  ;;  %v10071_v52 = vunpack.i.h.bf16 %v8663_v48  ;;  %v10070_v7 = vunpack.i.l.bf16 %v8663_v48  ;;  %v10552_v39 = vunpack.i.l.bf16 %v8574_v17  ;;  %v10555_v8 = vunpack.i.h.bf16 %v8663_v48 }
 0x6bf   : > { %v4893_v26 = vunpack.i.h.bf16 %v4891_v29  ;;  %v4892_v10 = vunpack.i.l.bf16 %v4891_v29  ;;  %v10556_v37 = vunpack.i.l.bf16 %v8663_v48 }
 0x6c0   : > { %v8679_v12 = vsel %vm275_vm1, %v4883_v55, %v10070_v7 }
 0x6c1   : > { %v2524_v9 = vsel %vm275_vm1, %v4893_v26, %v4897_v11  ;;  %v8669_v47 = vsel %vm275_vm1, %v4892_v10, %v4893_v26  ;;  %v8674_v53 = vsel %vm275_vm1, %v10071_v52, %v4892_v10  ;;  %10544 = vst [vmem:[#allocation94_spill] sm:$0xff] %v8679_v12  ;;  %v10072_v26 = vunpack.i.l.bf16 %v8574_v17 }
 0x6c2   : > { %v10551_v12 = vunpack.i.h.bf16 %v8574_v17 }
 0x6c3   : > { %5106 = vrot.lane.b32.xlu0 %v5105_v13, %s5426_s23 }
 0x6c4   : > { %5111 = vrot.lane.b32.xlu1 %v5110_v32, %s5426_s23 }
 0x6c5   : > { %v8688_v10 = vpop.permute.xlu2 %4955  ;;  %v8690_v21 = vpop.permute.xlu0 %4900 }
 0x6c6   : > { %v4906_v3 = vpop.permute.xlu1 %4905  ;;  %v10067_v38 = vunpack.i.h.bf16 %v8690_v21  ;;  %v10066_v0 = vunpack.i.l.bf16 %v8690_v21  ;;  %v10561_v60 = vunpack.i.l.bf16 %v8690_v21 }
 0x6c7   : > { %v4908_v55 = vunpack.i.h.bf16 %v4906_v3  ;;  %v4907_v20 = vunpack.i.l.bf16 %v4906_v3 }
 0x6c8   : > { %v8714_v11 = vpack.i.bf16 %v10066_v0, %v2478_v44 }
 0x6c9   : > { %v8702_v32 = vsel %vm312_vm2, %v4908_v55, %v10072_v26  ;;  %v8705_v13 = vsel %vm312_vm2, %v4907_v20, %v4908_v55  ;;  %v8710_v3 = vsel %vm312_vm2, %v10067_v38, %v4907_v20  ;;  %v4943_v38 = vunpack.i.h.bf16 %v8651_v30 }
 0x6ca   : > { %10545 = vst [vmem:[#allocation95_spill] sm:$0xff] %v8714_v11 }
 0x6cd   : > { %v8719_v40 = vpop.permute.xlu2 %4970  ;;  %v8721_v6 = vpop.permute.xlu0 %4915 }
 0x6ce   : > { %v4921_v29 = vpop.permute.xlu1 %4920  ;;  %v10073_v16 = vunpack.i.h.bf16 %v8721_v6  ;;  %v10075_v20 = vunpack.i.l.bf16 %v8721_v6  ;;  %v10568_v61 = vunpack.i.h.bf16 %v8721_v6 }
 0x6cf   : > { %v4923_v55 = vunpack.i.h.bf16 %v4921_v29  ;;  %v4922_v42 = vunpack.i.l.bf16 %v4921_v29 }
 0x6d0   : > { %v8742_v29 = vpack.i.bf16 %v10075_v20, %v8585_v33 }
 0x6d1   : > { %v8728_v44 = vsel %vm312_vm2, %v4923_v55, %v10069_v5  ;;  %v8731_v27 = vsel %vm312_vm2, %v4922_v42, %v4923_v55  ;;  %v8736_v0 = vsel %vm312_vm2, %v10073_v16, %v4922_v42  ;;  %v4942_v5 = vunpack.i.l.bf16 %v8651_v30 }
 0x6d2   : > { %10546 = vst [vmem:[#allocation96_spill] sm:$0xff] %v8742_v29  ;;  %v10569_v29 = vunpack.i.l.bf16 %v8721_v6 }
 0x6d3   : > { %v2594_v55 = vsel %vm353_vm4, %v4942_v5, %v4943_v38 }
 0x6d4   : > { %v8912_v11 = vsel %vm312_vm2, %v10569_v29, %v10568_v61 }
 0x6d5   : > { %v8747_v7 = vpop.permute.xlu2 %4985  ;;  %v8750_v26 = vpop.permute.xlu0 %4930 }
 0x6d6   : > { %v4936_v52 = vpop.permute.xlu1 %4935  ;;  %v10078_v43 = vunpack.i.h.bf16 %v8750_v26  ;;  %v10079_v4 = vunpack.i.l.bf16 %v8750_v26 }
 0x6d7   : > { %v4938_v42 = vunpack.i.h.bf16 %v4936_v52  ;;  %v4937_v16 = vunpack.i.l.bf16 %v4936_v52  ;;  %v10087_v52 = vunpack.i.h.bf16 %v8688_v10 }
 0x6d8   : > { %v8767_v20 = vpack.i.bf16 %v2594_v55, %v10079_v4  ;;  %v10090_v4 = vunpack.i.h.bf16 %v8719_v40 }
 0x6d9   : > { %v8755_v33 = vsel %vm353_vm4, %v4938_v42, %v4942_v5  ;;  %v8758_v35 = vsel %vm353_vm4, %v4937_v16, %v4938_v42  ;;  %v8763_v30 = vsel %vm353_vm4, %v10078_v43, %v4937_v16 }
 0x6da   : > { %10547 = vst [vmem:[#allocation97_spill] sm:$0xff] %v8767_v20 }
 0x6dd   : > { %v8771_v2 = vpop.permute.xlu2 %5000  ;;  %v4946_v5 = vpop.permute.xlu0 %4945 }
 0x6de   : > { %v8773_v24 = vpop.permute.xlu1 %4950  ;;  %v4948_v59 = vunpack.i.h.bf16 %v4946_v5  ;;  %v4947_v46 = vunpack.i.l.bf16 %v4946_v5 }
 0x6df   : > { %v10082_v42 = vunpack.i.l.bf16 %v8773_v24 }
 0x6e0   : > { %v8781_v43 = vpack.i.bf16 %v4948_v59, %v2524_v9  ;;  %v8784_v55 = vsel %vm353_vm4, %v4943_v38, %v4947_v46 }
 0x6e1   : > { %v8779_v16 = vsel %vm353_vm4, %v4948_v59, %v10082_v42  ;;  %10549 = vst [vmem:[#allocation99_spill] sm:$0xff] %v8784_v55 }
 0x6e2   : > { %10548 = vst [vmem:[#allocation98_spill] sm:$0xff] %v8781_v43 }
 0x6e5   : > { %v8791_v15 = vpop.permute.xlu2 %5015  ;;  %v8795_v54 = vpop.permute.xlu0 %4960 }
 0x6e6   : > { %v8793_v5 = vpop.permute.xlu1 %4965  ;;  %v10088_v59 = vunpack.i.l.bf16 %v8795_v54  ;;  %v4963_v51 = vunpack.i.h.bf16 %v8795_v54 }
 0x6e8   : > { %v8803_v46 = vsel %vm353_vm4, %v10087_v52, %v10088_v59  ;;  %v8818_v52 = vsel %vm312_vm2, %v10552_v39, %v10551_v12  ;;  %v10557_v12 = vunpack.i.h.bf16 %v8605_v25 }
 0x6e9   : > { %10550 = vst [vmem:[#allocation100_spill] sm:$0xff] %v8803_v46 }
 0x6ea   : > { %10553 = vst [vmem:[#allocation101_spill] sm:$0xff] %v8818_v52  ;;  %v8861_v52 = vsel %vm312_vm2, %v10558_v14, %v10557_v12  ;;  %v10563_v14 = vunpack.i.l.bf16 %v8478_v36 }
 0x6eb   : > { %10559 = vst [vmem:[#allocation103_spill] sm:$0xff] %v8861_v52 }
 0x6ed   : > { %v8807_v49 = vpop.permute.xlu2 %5030  ;;  %v4976_v38 = vpop.permute.xlu0 %4975 }
 0x6ee   : > { %v8809_v9 = vpop.permute.xlu1 %4980  ;;  %v4978_v55 = vunpack.i.h.bf16 %v4976_v38  ;;  %v4977_v19 = vunpack.i.l.bf16 %v4976_v38  ;;  %v8833_v38 = vsel %vm275_vm1, %v10556_v37, %v10555_v8 }
 0x6ef   : > { %v4982_v42 = vunpack.i.l.bf16 %v8809_v9 }
 0x6f0   : > { %v8826_v59 = vsel %vm394_vm5, %v10090_v4, %v4977_v19  ;;  %v8836_v17 = vsel %vm394_vm5, %v4977_v19, %v4978_v55 }
 0x6f1   : > { %v8821_v50 = vsel %vm394_vm5, %v4978_v55, %v4982_v42 }
 0x6f2   : > { %10554 = vst [vmem:[#allocation102_spill] sm:$0xff] %v8821_v50  ;;  %v10560_v50 = vunpack.i.h.bf16 %v8690_v21 }
 0x6f4   : > { %v8868_v56 = vsel %vm312_vm2, %v10561_v60, %v10560_v50  ;;  %v5017_v60 = vunpack.i.l.bf16 %v8791_v15 }
 0x6f5   : > { %v8846_v4 = vpop.permute.xlu2 %5045  ;;  %v8850_v48 = vpop.permute.xlu0 %4990 }
 0x6f6   : > { %v10096_v37 = vunpack.i.h.bf16 %v8846_v4  ;;  %v5047_v8 = vunpack.i.l.bf16 %v8846_v4  ;;  %v4996_v19 = vpop.permute.xlu1 %4995  ;;  %v10098_v34 = vunpack.i.h.bf16 %v8850_v48 }
 0x6f7   : > { %v4998_v55 = vunpack.i.h.bf16 %v4996_v19  ;;  %v4997_v39 = vunpack.i.l.bf16 %v4996_v19 }
 0x6f8   : > { %v2714_v42 = vsel %vm476_vm7, %v5047_v8, %v10096_v37 }
 0x6f9   : > { %v8871_v19 = vsel %vm394_vm5, %v4997_v39, %v4998_v55  ;;  %v8876_v37 = vsel %vm394_vm5, %v10098_v34, %v4997_v39  ;;  %v8884_v21 = vpack.i.bf16 %v10563_v14, %v2714_v42  ;;  %v10565_v42 = vunpack.i.h.bf16 %v8455_v22 }
 0x6fa   : > { %10562 = vst [vmem:[#allocation104_spill] sm:$0xff] %v8871_v19  ;;  %v10566_v14 = vunpack.i.l.bf16 %v8455_v22 }
 0x6fb   : > { %10564 = vst [vmem:[#allocation105_spill] sm:$0xff] %v8884_v21 }
 0x6fc   : > { %v8905_v21 = vsel %vm234_vm3, %v10566_v14, %v10565_v42  ;;  %v10572_v14 = vunpack.i.h.bf16 %v8577_v62 }
 0x6fd   : > { %v8887_v50 = vpop.permute.xlu2 %5060  ;;  %v8893_v34 = vpop.permute.xlu0 %5005  ;;  %10567 = vst [vmem:[#allocation106_spill] sm:$0xff] %v8905_v21 }
 0x6fe   : > { %v10101_v55 = vunpack.i.h.bf16 %v8887_v50  ;;  %v5062_v23 = vunpack.i.l.bf16 %v8887_v50  ;;  %v8891_v39 = vpop.permute.xlu1 %5010  ;;  %v5007_v41 = vunpack.i.l.bf16 %v8893_v34  ;;  %v5008_v46 = vunpack.i.h.bf16 %v8893_v34 }
 0x6ff   : > { %v5013_v25 = vunpack.i.h.bf16 %v8891_v39  ;;  %v10571_v1 = vunpack.i.l.bf16 %v8891_v39 }
 0x700   : > { %v2719_v36 = vsel %vm476_vm7, %v5062_v23, %v10101_v55 }
 0x701   : > { %v8915_v12 = vsel %vm435_vm6, %v5013_v25, %v5017_v60  ;;  %v8920_v55 = vsel %vm435_vm6, %v10571_v1, %v5013_v25  ;;  %v8928_v6 = vpack.i.bf16 %v2719_v36, %v10572_v14  ;;  %v10108_v60 = vunpack.i.h.bf16 %v8791_v15 }
 0x702   : > { %10570 = vst [vmem:[#allocation107_spill] sm:$0xff] %v8915_v12  ;;  %v5003_v36 = vunpack.i.h.bf16 %v8771_v2  ;;  %v10574_v14 = vunpack.i.l.bf16 %v8795_v54  ;;  %v2672_v54 = vsel %vm435_vm6, %v5007_v41, %v5008_v46 }
 0x703   : > { %10573 = vst [vmem:[#allocation108_spill] sm:$0xff] %v8928_v6 }
 0x704   : > { %v2601_v6 = vsel %vm353_vm4, %v10574_v14, %v4963_v51  ;;  %v2671_v51 = vsel %vm435_vm6, %v5003_v36, %v5007_v41  ;;  %v10577_v41 = vunpack.i.h.bf16 %v8846_v4  ;;  %v4968_v4 = vunpack.i.h.bf16 %v8793_v5 }
 0x705   : > { %v5021_v29 = vpop.permute.xlu0 %5020 }
 0x706   : > { %v8930_v61 = vpop.permute.xlu1 %5025  ;;  %v5022_v20 = vunpack.i.l.bf16 %v5021_v29 }
 0x708   : > { %v2676_v1 = vsel %vm435_vm6, %v10108_v60, %v5022_v20 }
 0x70d   : > { %v5036_v22 = vpop.permute.xlu0 %5035 }
 0x70e   : > { %v5041_v25 = vpop.permute.xlu1 %5040  ;;  %v5038_v19 = vunpack.i.h.bf16 %v5036_v22  ;;  %v5037_v62 = vunpack.i.l.bf16 %v5036_v22 }
 0x70f   : > { %v5043_v52 = vunpack.i.h.bf16 %v5041_v25  ;;  %v5042_v42 = vunpack.i.l.bf16 %v5041_v25  ;;  %v10576_v25 = vunpack.i.l.bf16 %v8534_v31 }
 0x710   : > { %v8945_v21 = vpack.i.bf16 %v5037_v62, %v2601_v6 }
 0x711   : > { %v2713_v28 = vsel %vm476_vm7, %v5043_v52, %v5047_v8  ;;  %v2712_v12 = vsel %vm476_vm7, %v5042_v42, %v5043_v52  ;;  %v2711_v60 = vsel %vm476_vm7, %v5038_v19, %v5042_v42  ;;  %v2710_v8 = vsel %vm476_vm7, %v5037_v62, %v5038_v19 }
 0x712   : > { %10575 = vst [vmem:[#allocation109_spill] sm:$0xff] %v8945_v21  ;;  %v5125_v43 = vpack.i.bf16 %v2676_v1, %v2711_v60  ;;  %v8949_v22 = vpack.i.bf16 %v2713_v28, %v10576_v25  ;;  %v5140_v1 = vpack.i.bf16 %v2672_v54, %v2671_v51  ;;  %v5027_v54 = vunpack.i.l.bf16 %v8930_v61 }
 0x714   : > { %5126 = vrot.lane.b32.xlu1 %v5125_v43, %s5426_s23 }
 0x715   : > { %v5051_v14 = vpop.permute.xlu0 %5050 }
 0x716   : > { %v5056_v52 = vpop.permute.xlu1 %5055  ;;  %v5053_v21 = vunpack.i.h.bf16 %v5051_v14  ;;  %v5052_v60 = vunpack.i.l.bf16 %v5051_v14  ;;  %v5028_v14 = vunpack.i.h.bf16 %v8930_v61 }
 0x717   : > { %v5058_v42 = vunpack.i.h.bf16 %v5056_v52  ;;  %v5057_v6 = vunpack.i.l.bf16 %v5056_v52  ;;  %v5023_v52 = vunpack.i.h.bf16 %v5021_v29 }
 0x718   : > { %v8961_v28 = vpack.i.bf16 %v5053_v21, %v2712_v12  ;;  %v8966_v19 = vsel %vm476_vm7, %v10577_v41, %v5052_v60  ;;  %v4967_v12 = vunpack.i.l.bf16 %v8793_v5  ;;  %v2679_v5 = vsel %vm435_vm6, %v5027_v54, %v5028_v14 }
 0x719   : > { %v8957_v31 = vsel %vm476_vm7, %v5058_v42, %v5062_v23  ;;  %v2717_v34 = vsel %vm476_vm7, %v5057_v6, %v5058_v42  ;;  %v2716_v43 = vsel %vm476_vm7, %v5053_v21, %v5057_v6  ;;  %v4992_v23 = vunpack.i.l.bf16 %v8850_v48 }
 0x71a   : > { %v5115_v62 = vpack.i.bf16 %v2716_v43, %v8469_v58  ;;  %v5120_v25 = vpack.i.bf16 %v2710_v8, %v2717_v34  ;;  %v5280_v51 = vpack.i.bf16 %v8509_v57, %v8957_v31  ;;  %v5002_v58 = vunpack.i.l.bf16 %v8771_v2  ;;  %v10633_v57 = vld [vmem:[#allocation109_spill] sm:$0xff] }
 0x71b   : > { %v10578_v8 = vunpack.i.h.bf16 %v8850_v48  ;;  %v2678_v61 = vsel %vm435_vm6, %v5023_v52, %v5027_v54  ;;  %v2677_v42 = vsel %vm435_vm6, %v5022_v20, %v5023_v52  ;;  %v10579_v2 = vunpack.i.h.bf16 %v8887_v50 }
 0x71c   : > { %5116 = vrot.lane.b32.xlu2 %v5115_v62, %s5426_s23  ;;  %5141 = vrot.lane.b32.xlu1 %v5140_v1, %s5426_s23  ;;  %v2670_v60 = vsel %vm435_vm6, %v5002_v58, %v5003_v36  ;;  %v2630_v1 = vsel %vm394_vm5, %v4967_v12, %v4968_v4  ;;  %v5130_v34 = vpack.i.bf16 %v2678_v61, %v2677_v42  ;;  %v10580_v41 = vunpack.i.h.bf16 %v8498_v63 }
 0x71d   : > { %5121 = vrot.lane.b32.xlu0 %v5120_v25, %s5426_s23  ;;  %v8980_v21 = vpop.permute.xlu0 %5065  ;;  %v2639_v29 = vsel %vm394_vm5, %v4992_v23, %v10578_v8  ;;  %v4957_v20 = vunpack.i.l.bf16 %v8688_v10  ;;  %v4953_v36 = vunpack.i.h.bf16 %v8773_v24  ;;  %v5135_v25 = vpack.i.bf16 %v2670_v60, %v2679_v5 }
 0x71e   : > { %v5067_v6 = vunpack.i.l.bf16 %v8980_v21  ;;  %v5155_v43 = vpack.i.bf16 %v2630_v1, %v2639_v29  ;;  %v4988_v54 = vunpack.i.h.bf16 %v8747_v7  ;;  %v4987_v50 = vunpack.i.l.bf16 %v8747_v7 }
 0x71f   : > { %v4983_v52 = vunpack.i.h.bf16 %v8809_v9  ;;  %v2598_v63 = vsel %vm353_vm4, %v4953_v36, %v4957_v20  ;;  %v10581_v8 = vunpack.i.l.bf16 %v8773_v24  ;;  %v10582_v61 = vunpack.i.l.bf16 %v8891_v39 }
 0x720   : > { %v2720_v48 = vsel %vm476_vm7, %v10579_v2, %v5067_v6  ;;  %v2637_v60 = vsel %vm394_vm5, %v4987_v50, %v4988_v54  ;;  %v2638_v5 = vsel %vm394_vm5, %v4988_v54, %v4992_v23  ;;  %v4972_v2 = vunpack.i.l.bf16 %v8719_v40 }
 0x721   : > { %v8998_v62 = vpack.i.bf16 %v10580_v41, %v2720_v48  ;;  %v2597_v29 = vsel %vm353_vm4, %v10581_v8, %v4953_v36  ;;  %v2673_v42 = vsel %vm435_vm6, %v5008_v46, %v10582_v61  ;;  %v2636_v7 = vsel %vm394_vm5, %v4983_v52, %v4987_v50 }
 0x722   : > { %v5145_v1 = vpack.i.bf16 %v2636_v7, %v2673_v42  ;;  %v5170_v9 = vpack.i.bf16 %v2598_v63, %v2597_v29  ;;  %v5150_v48 = vpack.i.bf16 %v2638_v5, %v2637_v60  ;;  %v10583_v24 = vunpack.i.h.bf16 %v8719_v40 }
 0x723   : > { %v2631_v39 = vsel %vm394_vm5, %v4968_v4, %v4972_v2  ;;  %v5032_v41 = vunpack.i.l.bf16 %v8807_v49  ;;  %v10586_v40 = vunpack.i.h.bf16 %v8688_v10  ;;  %v10588_v54 = vunpack.i.l.bf16 %v8750_v26 }
 0x724   : > { %5131 = vrot.lane.b32.xlu2 %v5130_v34, %s5426_s23  ;;  %5156 = vrot.lane.b32.xlu1 %v5155_v43, %s5426_s23  ;;  %v2632_v46 = vsel %vm394_vm5, %v4972_v2, %v10583_v24  ;;  %v10584_v34 = vpack.i.bf16 %v8758_v35, %v8763_v30  ;;  %v10585_v43 = vpack.i.bf16 %v8779_v16, %v8826_v59  ;;  %v10589_v30 = vunpack.i.h.bf16 %v8791_v15  ;;  %v10609_v24 = vld [vmem:[#allocation92_spill] sm:$0xff] }
 0x725   : > { %5136 = vrot.lane.b32.xlu0 %v5135_v25, %s5426_s23  ;;  %v5160_v23 = vpack.i.bf16 %v2632_v46, %v2631_v39  ;;  %v2599_v36 = vsel %vm353_vm4, %v4957_v20, %v10586_v40  ;;  %v2680_v4 = vsel %vm435_vm6, %v5028_v14, %v5032_v41  ;;  %v10587_v25 = vunpack.i.h.bf16 %v8750_v26  ;;  %v10601_v20 = vld [vmem:[#allocation98_spill] sm:$0xff]  ;;  %v10611_v39 = vld [vmem:[#allocation104_spill] sm:$0xff]  ;;  %v10616_v40 = vld [vmem:[#allocation97_spill] sm:$0xff] }
 0x726   : > { %v5175_v50 = vpack.i.bf16 %v10589_v30, %v2599_v36  ;;  %v10590_v10 = vpack.i.bf16 %v8731_v27, %v8736_v0  ;;  %v5190_v16 = vpack.i.bf16 %v5002_v58, %v8755_v33  ;;  %v10591_v26 = vpack.i.bf16 %v8705_v13, %v8710_v3  ;;  %v9064_v0 = vpop.permute.xlu1 %2724  ;;  %v9075_v3 = vpop.permute.xlu2 %5071  ;;  %v10620_v30 = vld [vmem:[#allocation86_spill] sm:$0xff] }
 0x727   : > { %v2590_v35 = vsel %vm353_vm4, %v10588_v54, %v10587_v25  ;;  %v10592_v15 = vpack.i.bf16 %v8912_v11, %v8920_v55  ;;  %v5205_v59 = vpack.i.bf16 %v4983_v52, %v8728_v44  ;;  %10593 = vst [vmem:[#allocation110_spill] sm:$0xff] %v9064_v0  ;;  %v10594_v27 = vpack.i.bf16 %v8669_v47, %v8674_v53  ;;  %v9078_v33 = vpop.permute.xlu0 %5076 }
 0x728   : > { %v5180_v63 = vpack.i.bf16 %v2590_v35, %v2680_v4  ;;  %v10595_v13 = vpack.i.bf16 %v8868_v56, %v8876_v37  ;;  %v5220_v11 = vpack.i.bf16 %v4967_v12, %v8702_v32  ;;  %10596 = vst [vmem:[#allocation111_spill] sm:$0xff] %v9078_v33  ;;  %v5033_v44 = vunpack.i.h.bf16 %v8807_v49  ;;  %v10619_v35 = vld [vmem:[#allocation87_spill] sm:$0xff] }
 0x729   : > { %v10111_v55 = vunpack.i.l.bf16 %v9078_v33  ;;  %v10597_v47 = vpack.i.bf16 %v8636_v45, %v8632_v18  ;;  %v10115_v56 = vunpack.i.h.bf16 %v9075_v3  ;;  %v10599_v32 = vpack.i.bf16 %v8833_v38, %v8836_v17  ;;  %v10600_v18 = vld [vmem:[#allocation100_spill] sm:$0xff]  ;;  %v10602_v38 = vld [vmem:[#allocation106_spill] sm:$0xff]  ;;  %v10603_v17 = vld [vmem:[#allocation107_spill] sm:$0xff] }
 0x72a   : > { %v2681_v49 = vsel %vm435_vm6, %v5032_v41, %v5033_v44  ;;  %v10112_v14 = vunpack.i.h.bf16 %v9078_v33  ;;  %v10604_v52 = vpack.i.bf16 %v10602_v38, %v10603_v17  ;;  %v10630_v44 = vld [vmem:[#allocation102_spill] sm:$0xff]  ;;  %v10637_v17 = vld [vmem:[#allocation89_spill] sm:$0xff] }
 0x72b   : > { %v9102_v45 = vsel %vm746_vm8, %v10115_v56, %v10111_v55  ;;  %v5240_v12 = vpack.i.bf16 %v2681_v49, %v10600_v18 }
 0x72c   : > { %5146 = vrot.lane.b32.xlu2 %v5145_v1, %s5426_s23  ;;  %5171 = vrot.lane.b32.xlu1 %v5170_v9, %s5426_s23 }
 0x72d   : > { %5151 = vrot.lane.b32.xlu0 %v5150_v48, %s5426_s23  ;;  %v10608_v48 = vld [vmem:[#allocation91_spill] sm:$0xff] }
 0x72e   : > { %v9088_v53 = vpop.permute.xlu1 %5081  ;;  %v5087_v58 = vpop.permute.xlu2 %5086  ;;  %v10610_v46 = vpack.i.bf16 %v10608_v48, %v10609_v24 }
 0x72f   : > { %10598 = vst [vmem:[#allocation112_spill] sm:$0xff] %v9088_v53  ;;  %v10113_v37 = vunpack.i.l.bf16 %v9088_v53  ;;  %v9118_v29 = vpop.permute.xlu0 %5091  ;;  %v5089_v42 = vunpack.i.h.bf16 %v5087_v58  ;;  %v10114_v5 = vunpack.i.h.bf16 %v9088_v53  ;;  %v5088_v9 = vunpack.i.l.bf16 %v5087_v58  ;;  %v10634_v58 = vld [vmem:[#allocation78_spill] sm:$0xff] }
 0x730   : > { %v10128_v61 = vunpack.i.l.bf16 %v9118_v29  ;;  %v10129_v1 = vunpack.i.h.bf16 %v9118_v29 }
 0x731   : > { %v9116_v8 = vsel %vm746_vm8, %v10112_v14, %v10113_v37  ;;  %v9150_v41 = vsel %vm746_vm8, %v10114_v5, %v5088_v9 }
 0x732   : > { %10605 = vst [vmem:[#allocation100_spill] sm:$0xff] %v9116_v8  ;;  %v9130_v2 = vsel %vm746_vm8, %v5089_v42, %v10128_v61  ;;  %v10639_v42 = vld [vmem:[#allocation94_spill] sm:$0xff] }
 0x733   : > { %10607 = vst [vmem:[#allocation106_spill] sm:$0xff] %v9130_v2 }
 0x734   : > { %5161 = vrot.lane.b32.xlu2 %v5160_v23, %s5426_s23  ;;  %5186 = vrot.lane.b32.xlu1 %v10584_v34, %s5426_s23  ;;  %v10612_v23 = vld [vmem:[#allocation103_spill] sm:$0xff]  ;;  %10615 = vst [vmem:[#allocation91_spill] sm:$0xff] %v9150_v41 }
 0x735   : > { %5166 = vrot.lane.b32.xlu0 %v10585_v43, %s5426_s23  ;;  %v10613_v34 = vpack.i.bf16 %v10611_v39, %v10612_v23  ;;  %v10641_v23 = vld [vmem:[#allocation90_spill] sm:$0xff] }
 0x736   : > { %v9122_v60 = vpop.permute.xlu1 %5096  ;;  %v9154_v36 = vpop.permute.xlu2 %5101 }
 0x737   : > { %10606 = vst [vmem:[#allocation98_spill] sm:$0xff] %v9122_v60  ;;  %v10116_v7 = vunpack.i.l.bf16 %v9122_v60  ;;  %v10117_v4 = vunpack.i.h.bf16 %v9122_v60  ;;  %v10110_v25 = vunpack.i.l.bf16 %v9154_v36  ;;  %v9214_v24 = vpop.permute.xlu0 %5106 }
 0x738   : > { %10617 = vst [vmem:[#allocation92_spill] sm:$0xff] %v9154_v36 }
 0x739   : > { %v9145_v43 = vsel %vm746_vm8, %v10129_v1, %v10116_v7  ;;  %v9163_v54 = vsel %vm746_vm8, %v10117_v4, %v10110_v25 }
 0x73a   : > { %10614 = vst [vmem:[#allocation107_spill] sm:$0xff] %v9145_v43 }
 0x73b   : > { %10618 = vst [vmem:[#allocation104_spill] sm:$0xff] %v9163_v54 }
 0x73c   : > { %5176 = vrot.lane.b32.xlu2 %v5175_v50, %s5426_s23  ;;  %5201 = vrot.lane.b32.xlu1 %v10590_v10, %s5426_s23  ;;  %v10621_v50 = vpack.i.bf16 %v10619_v35, %v10620_v30  ;;  %v10623_v10 = vld [vmem:[#allocation96_spill] sm:$0xff]  ;;  %v10645_v30 = vld [vmem:[#allocation82_spill] sm:$0xff] }
 0x73d   : > { %5181 = vrot.lane.b32.xlu0 %v5180_v63, %s5426_s23  ;;  %v10622_v63 = vld [vmem:[#allocation95_spill] sm:$0xff]  ;;  %v10644_v35 = vld [vmem:[#allocation80_spill] sm:$0xff] }
 0x73e   : > { %v9195_v31 = vpop.permute.xlu1 %5111 }
 0x73f   : > { %v10153_v60 = vunpack.i.l.bf16 %v9195_v31 }
 0x744   : > { %5191 = vrot.lane.b32.xlu2 %v5190_v16, %s5426_s23  ;;  %5216 = vrot.lane.b32.xlu1 %v10591_v26, %s5426_s23  ;;  %v10624_v16 = vld [vmem:[#allocation74_spill] sm:$0xff]  ;;  %v10625_v26 = vld [vmem:[#allocation75_spill] sm:$0xff] }
 0x745   : > { %5196 = vrot.lane.b32.xlu0 %v10592_v15, %s5426_s23  ;;  %v10626_v15 = vpack.i.bf16 %v10624_v16, %v10625_v26 }
 0x74c   : > { %5206 = vrot.lane.b32.xlu2 %v5205_v59, %s5426_s23  ;;  %5231 = vrot.lane.b32.xlu1 %v10594_v27, %s5426_s23  ;;  %v10627_v59 = vld [vmem:[#allocation84_spill] sm:$0xff]  ;;  %v10628_v27 = vld [vmem:[#allocation79_spill] sm:$0xff] }
 0x74d   : > { %5211 = vrot.lane.b32.xlu0 %v10595_v13, %s5426_s23  ;;  %v10629_v13 = vpack.i.bf16 %v10627_v59, %v10628_v27 }
 0x754   : > { %5221 = vrot.lane.b32.xlu2 %v5220_v11, %s5426_s23  ;;  %5246 = vrot.lane.b32.xlu1 %v10597_v47, %s5426_s23  ;;  %v10631_v47 = vld [vmem:[#allocation101_spill] sm:$0xff] }
 0x755   : > { %5226 = vrot.lane.b32.xlu0 %v10599_v32, %s5426_s23  ;;  %v10632_v32 = vpack.i.bf16 %v10630_v44, %v10631_v47 }
 0x75c   : > { %5236 = vrot.lane.b32.xlu2 %v10601_v20, %s5426_s23  ;;  %5261 = vrot.lane.b32.xlu1 %v10604_v52, %s5426_s23  ;;  %v10635_v20 = vld [vmem:[#allocation76_spill] sm:$0xff]  ;;  %v10638_v52 = vld [vmem:[#allocation93_spill] sm:$0xff] }
 0x75d   : > { %5241 = vrot.lane.b32.xlu0 %v5240_v12, %s5426_s23  ;;  %v10636_v38 = vpack.i.bf16 %v10634_v58, %v10635_v20 }
 0x764   : > { %5251 = vrot.lane.b32.xlu2 %v10610_v46, %s5426_s23  ;;  %5276 = vrot.lane.b32.xlu1 %v10613_v34, %s5426_s23  ;;  %v10642_v34 = vld [vmem:[#allocation88_spill] sm:$0xff] }
 0x765   : > { %5256 = vrot.lane.b32.xlu0 %v10616_v40, %s5426_s23  ;;  %v10643_v40 = vpack.i.bf16 %v10641_v23, %v10642_v34  ;;  %v10651_v23 = vld [vmem:[#allocation85_spill] sm:$0xff] }
 0x76c   : > { %5266 = vrot.lane.b32.xlu2 %v10621_v50, %s5426_s23  ;;  %5291 = vrot.lane.b32.xlu1 %v10622_v63, %s5426_s23  ;;  %v10646_v50 = vld [vmem:[#allocation99_spill] sm:$0xff] }
 0x76d   : > { %5271 = vrot.lane.b32.xlu0 %v10623_v10, %s5426_s23  ;;  %v10647_v63 = vpack.i.bf16 %v10645_v30, %v10646_v50 }
 0x774   : > { %5281 = vrot.lane.b32.xlu2 %v5280_v51, %s5426_s23  ;;  %5306 = vrot.lane.b32.xlu1 %v10626_v15, %s5426_s23 }
 0x775   : > { %5286 = vrot.lane.b32.xlu0 %v10629_v13, %s5426_s23 }
 0x776   : > { %v9185_v11 = vpop.permute.xlu2 %5116 }
 0x77c   : > { %5296 = vrot.lane.b32.xlu2 %v10632_v32, %s5426_s23  ;;  %5321 = vrot.lane.b32.xlu1 %v10633_v57, %s5426_s23  ;;  %v10127_v32 = vunpack.i.h.bf16 %v9185_v11 }
 0x77d   : > { %5301 = vrot.lane.b32.xlu0 %v8961_v28, %s5426_s23  ;;  %v10640_v28 = vpack.i.bf16 %v10638_v52, %v10639_v42  ;;  %v10648_v52 = vld [vmem:[#allocation83_spill] sm:$0xff]  ;;  %v10649_v42 = vld [vmem:[#allocation81_spill] sm:$0xff] }
 0x77e   : > { %v5132_v51 = vpop.permute.xlu2 %5131 }
 0x77f   : > { %v5134_v49 = vunpack.i.h.bf16 %v5132_v51  ;;  %v5133_v18 = vunpack.i.l.bf16 %v5132_v51 }
 0x781   : > { %v9198_v12 = vsel %vm746_vm8, %v5133_v18, %v5134_v49 }
 0x784   : > { %5311 = vrot.lane.b32.xlu2 %v10636_v38, %s5426_s23  ;;  %5336 = vrot.lane.b32.xlu1 %v10637_v17, %s5426_s23  ;;  %v5068_v17 = vunpack.i.h.bf16 %v8980_v21 }
 0x785   : > { %5316 = vrot.lane.b32.xlu0 %v10640_v28, %s5426_s23  ;;  %v10650_v28 = vpack.i.bf16 %v10648_v52, %v10649_v42 }
 0x786   : > { %v9210_v9 = vpop.permute.xlu2 %5146  ;;  %v9212_v48 = vpop.permute.xlu1 %5126 }
 0x787   : > { %v5129_v46 = vunpack.i.h.bf16 %v9212_v48  ;;  %v10123_v10 = vunpack.i.l.bf16 %v9210_v9  ;;  %v10126_v20 = vunpack.i.l.bf16 %v9212_v48 }
 0x789   : > { %v3070_v39 = vsel %vm746_vm8, %v5129_v46, %v5133_v18 }
 0x78a   : > { %3238 = vmatpush.msra.mxu2 %v3070_v39 }
 0x78c   : > { %5326 = vrot.lane.b32.xlu2 %v10643_v40, %s5426_s23  ;;  %5351 = vrot.lane.b32.xlu1 %v10644_v35, %s5426_s23  ;;  %v2721_v35 = vsel %vm476_vm7, %v5067_v6, %v5068_v17  ;;  %v10652_v6 = vld [vmem:[#allocation77_spill] sm:$0xff]  ;;  %v10653_v17 = vld [vmem:[#allocation108_spill] sm:$0xff] }
 0x78d   : > { %5331 = vrot.lane.b32.xlu0 %v10647_v63, %s5426_s23 }
 0x78e   : > { %v9229_v16 = vpop.permute.xlu2 %5161  ;;  %v5142_v26 = vpop.permute.xlu1 %5141 }
 0x78f   : > { %v5164_v15 = vunpack.i.h.bf16 %v9229_v16  ;;  %v5163_v59 = vunpack.i.l.bf16 %v9229_v16  ;;  %v5144_v27 = vunpack.i.h.bf16 %v5142_v26  ;;  %v5143_v13 = vunpack.i.l.bf16 %v5142_v26  ;;  %v9233_v44 = vpop.permute.xlu0 %5121 }
 0x790   : > { %v10125_v47 = vunpack.i.h.bf16 %v9233_v44  ;;  %v10132_v57 = vunpack.i.l.bf16 %v9233_v44 }
 0x791   : > { %v9241_v51 = vsel %vm746_vm8, %v5144_v27, %v10123_v10  ;;  %v9244_v18 = vsel %vm746_vm8, %v5143_v13, %v5144_v27  ;;  %v9249_v58 = vsel %vm746_vm8, %v5163_v59, %v5164_v15 }
 0x792   : > { %v3082_v38 = vsel %vm746_vm8, %v10127_v32, %v10132_v57  ;;  %v3076_v39 = vsel %vm746_vm8, %v10125_v47, %v10126_v20 }
 0x793   : > { %3272 = vmatpush.msra.mxu3 %v3082_v38  ;;  %v5380_v38 = vpack.i.bf16 %v8966_v19, %v2721_v35 }
 0x794   : > { %5341 = vrot.lane.b32.xlu2 %v10650_v28, %s5426_s23  ;;  %5366 = vrot.lane.b32.xlu1 %v8949_v22, %s5426_s23 }
 0x795   : > { %5346 = vrot.lane.b32.xlu0 %v10651_v23, %s5426_s23  ;;  %3273 = vmatpush.msra.mxu3 %v3076_v39 }
 0x796   : > { %v9271_v34 = vpop.permute.xlu2 %5176  ;;  %v9273_v40 = vpop.permute.xlu1 %5156 }
 0x797   : > { %v9278_v30 = vpop.permute.xlu0 %5136  ;;  %v5179_v22 = vunpack.i.h.bf16 %v9271_v34  ;;  %v10120_v19 = vunpack.i.l.bf16 %v9271_v34  ;;  %v5159_v23 = vunpack.i.h.bf16 %v9273_v40  ;;  %v10122_v35 = vunpack.i.l.bf16 %v9273_v40 }
 0x798   : > { %v5139_v50 = vunpack.i.h.bf16 %v9278_v30  ;;  %v5138_v63 = vunpack.i.l.bf16 %v9278_v30 }
 0x799   : > { %v3069_v26 = vsel %vm746_vm8, %v5179_v22, %v5129_v46  ;;  %v5149_v46 = vunpack.i.h.bf16 %v9210_v9 }
 0x79a   : > { %3198 = vmatpush.msra.mxu0 %v3069_v26  ;;  %v3064_v27 = vsel %vm746_vm8, %v5139_v50, %v5143_v13  ;;  %v9289_v21 = vsel %vm746_vm8, %v5134_v49, %v5138_v63 }
 0x79b   : > { %3239 = vmatpush.msra.mxu2 %v3064_v27 }
 0x79c   : > { %5356 = vrot.lane.b32.xlu2 %v10652_v6, %s5426_s23  ;;  %5381 = vrot.lane.b32.xlu1 %v5380_v38, %s5426_s23 }
 0x79d   : > { %5361 = vrot.lane.b32.xlu0 %v10653_v17, %s5426_s23 }
 0x79e   : > { %v9297_v52 = vpop.permute.xlu2 %5191  ;;  %v5172_v13 = vpop.permute.xlu1 %5171 }
 0x79f   : > { %v5194_v42 = vunpack.i.h.bf16 %v9297_v52  ;;  %v5174_v49 = vunpack.i.h.bf16 %v5172_v13  ;;  %v5173_v28 = vunpack.i.l.bf16 %v5172_v13  ;;  %v5152_v39 = vpop.permute.xlu0 %5151  ;;  %v10118_v25 = vunpack.i.l.bf16 %v9297_v52 }
 0x7a0   : > { %v5154_v22 = vunpack.i.h.bf16 %v5152_v39  ;;  %v5153_v26 = vunpack.i.l.bf16 %v5152_v39 }
 0x7a1   : > { %v3063_v27 = vsel %vm746_vm8, %v5194_v42, %v5139_v50  ;;  %v9307_v38 = vsel %vm746_vm8, %v5174_v49, %v10120_v19  ;;  %v9310_v6 = vsel %vm746_vm8, %v5173_v28, %v5174_v49  ;;  %v3052_v50 = vsel %vm746_vm8, %v5159_v23, %v5163_v59  ;;  %v10654_v42 = vld [vmem:[#allocation105_spill] sm:$0xff] }
 0x7a2   : > { %3199 = vmatpush.msra.mxu0 %v3063_v27  ;;  %v3058_v17 = vsel %vm746_vm8, %v5149_v46, %v5153_v26  ;;  %v9316_v13 = vsel %vm746_vm8, %v5154_v22, %v10122_v35  ;;  %v9319_v39 = vsel %vm746_vm8, %v5153_v26, %v5154_v22 }
 0x7a3   : > { %3240 = vmatpush.msra.mxu2 %v3058_v17 }
 0x7a4   : > { %5371 = vrot.lane.b32.xlu2 %v8998_v62, %s5426_s23 }
 0x7a5   : > { %5376 = vrot.lane.b32.xlu0 %v10654_v42, %s5426_s23  ;;  %3241 = vmatpush.msra.mxu2 %v3052_v50 }
 0x7a6   : > { %v9326_v49 = vpop.permute.xlu2 %5206  ;;  %v5187_v27 = vpop.permute.xlu1 %5186 }
 0x7a7   : > { %v5209_v55 = vunpack.i.h.bf16 %v9326_v49  ;;  %v5189_v14 = vunpack.i.h.bf16 %v5187_v27  ;;  %v5188_v22 = vunpack.i.l.bf16 %v5187_v27  ;;  %v9330_v26 = vpop.permute.xlu0 %5166  ;;  %v10119_v5 = vunpack.i.l.bf16 %v9326_v49 }
 0x7a8   : > { %v5169_v17 = vunpack.i.h.bf16 %v9330_v26  ;;  %v10121_v62 = vunpack.i.l.bf16 %v9330_v26 }
 0x7a9   : > { %v3057_v59 = vsel %vm746_vm8, %v5209_v55, %v5149_v46  ;;  %v9338_v50 = vsel %vm746_vm8, %v5189_v14, %v10118_v25  ;;  %v9341_v42 = vsel %vm746_vm8, %v5188_v22, %v5189_v14 }
 0x7aa   : > { %3200 = vmatpush.msra.mxu0 %v3057_v59  ;;  %v3046_v37 = vsel %vm746_vm8, %v5169_v17, %v5173_v28  ;;  %v9349_v27 = vsel %vm746_vm8, %v5164_v15, %v10121_v62 }
 0x7ab   : > { %3242 = vmatpush.msra.mxu2 %v3046_v37 }
 0x7ae   : > { %v9351_v55 = vpop.permute.xlu2 %5221  ;;  %v5202_v46 = vpop.permute.xlu1 %5201 }
 0x7af   : > { %v5224_v56 = vunpack.i.h.bf16 %v9351_v55  ;;  %v5204_v14 = vunpack.i.h.bf16 %v5202_v46  ;;  %v5203_v7 = vunpack.i.l.bf16 %v5202_v46  ;;  %v9355_v59 = vpop.permute.xlu0 %5181 }
 0x7b0   : > { %v5184_v28 = vunpack.i.h.bf16 %v9355_v59  ;;  %v5183_v4 = vunpack.i.l.bf16 %v9355_v59 }
 0x7b1   : > { %v3051_v16 = vsel %vm746_vm8, %v5224_v56, %v5159_v23  ;;  %v9363_v37 = vsel %vm746_vm8, %v5204_v14, %v10119_v5  ;;  %v9366_v15 = vsel %vm746_vm8, %v5203_v7, %v5204_v14  ;;  %v10124_v23 = vunpack.i.l.bf16 %v9351_v55 }
 0x7b2   : > { %3201 = vmatpush.msra.mxu0 %v3051_v16  ;;  %v3040_v25 = vsel %vm746_vm8, %v5184_v28, %v5188_v22  ;;  %v9372_v46 = vsel %vm746_vm8, %v5138_v63, %v5183_v4 }
 0x7b3   : > { %3243 = vmatpush.msra.mxu2 %v3040_v25 }
 0x7b6   : > { %v9374_v59 = vpop.permute.xlu2 %5236  ;;  %v5217_v56 = vpop.permute.xlu1 %5216 }
 0x7b7   : > { %v5239_v5 = vunpack.i.h.bf16 %v9374_v59  ;;  %v5219_v19 = vunpack.i.h.bf16 %v5217_v56  ;;  %v5218_v62 = vunpack.i.l.bf16 %v5217_v56  ;;  %v9378_v14 = vpop.permute.xlu0 %5196  ;;  %v10131_v10 = vunpack.i.l.bf16 %v9374_v59 }
 0x7b8   : > { %v5199_v16 = vunpack.i.h.bf16 %v9378_v14 }
 0x7b9   : > { %v3045_v22 = vsel %vm746_vm8, %v5239_v5, %v5169_v17  ;;  %v9385_v30 = vsel %vm746_vm8, %v5219_v19, %v10124_v23  ;;  %v9388_v25 = vsel %vm746_vm8, %v5218_v62, %v5219_v19 }
 0x7ba   : > { %3202 = vmatpush.msra.mxu0 %v3045_v22  ;;  %v3034_v63 = vsel %vm746_vm8, %v5199_v16, %v5203_v7 }
 0x7bb   : > { %3244 = vmatpush.msra.mxu2 %v3034_v63 }
 0x7be   : > { %v9391_v35 = vpop.permute.xlu2 %5251  ;;  %v9393_v56 = vpop.permute.xlu1 %5231 }
 0x7bf   : > { %v10130_v5 = vunpack.i.h.bf16 %v9393_v56  ;;  %v9397_v17 = vpop.permute.xlu0 %5211  ;;  %v10137_v20 = vunpack.i.l.bf16 %v9393_v56 }
 0x7c0   : > { %v5214_v23 = vunpack.i.h.bf16 %v9397_v17 }
 0x7c1   : > { %v9405_v19 = vsel %vm746_vm8, %v10130_v5, %v10131_v10 }
 0x7c2   : > { %v3028_v7 = vsel %vm746_vm8, %v5214_v23, %v5218_v62 }
 0x7c3   : > { %3245 = vmatpush.msra.mxu2 %v3028_v7 }
 0x7c6   : > { %v9408_v22 = vpop.permute.xlu2 %5266  ;;  %v9410_v63 = vpop.permute.xlu1 %5246 }
 0x7c7   : > { %v9412_v47 = vpop.permute.xlu0 %5226  ;;  %v10136_v32 = vunpack.i.h.bf16 %v9410_v63  ;;  %v10138_v61 = vunpack.i.l.bf16 %v9410_v63  ;;  %v10140_v57 = vunpack.i.l.bf16 %v9408_v22 }
 0x7c8   : > { %v10139_v1 = vunpack.i.h.bf16 %v9412_v47 }
 0x7c9   : > { %v3016_v7 = vsel %vm746_vm8, %v10138_v61, %v10136_v32  ;;  %v10655_v32 = vunpack.i.l.bf16 %v9233_v44 }
 0x7ca   : > { %v3022_v62 = vsel %vm746_vm8, %v10139_v1, %v10137_v20  ;;  %v9454_v1 = vld [vmem:[%s9859_s2 + $0x8] sm:$0xff] }
 0x7cb   : > { %3246 = vmatpush.msra.mxu2 %v3022_v62  ;;  %3557 = vmatmul.msk.f32.vlgmr.msra.gmra.mxu3 %vm963_vm9, %v9454_v1 }
 0x7cd   : > { %3247 = vmatpush.msra.mxu2 %v3016_v7 }
 0x7ce   : > { %v9428_v5 = vpop.permute.xlu2 %5281  ;;  %v9430_v10 = vpop.permute.xlu1 %5261 }
 0x7cf   : > { %v10144_v0 = vunpack.i.l.bf16 %v9428_v5  ;;  %v10141_v41 = vunpack.i.h.bf16 %v9430_v10  ;;  %v9435_v36 = vpop.permute.xlu0 %5241 }
 0x7d0   : > { %v5244_v62 = vunpack.i.h.bf16 %v9435_v36 }
 0x7d1   : > { %v3010_v7 = vsel %vm746_vm8, %v10141_v41, %v10140_v57  ;;  %v3083_v20 = vsel %vm746_vm8, %v10655_v32, %v10144_v0 }
 0x7d2   : > { %3248 = vmatpush.msra.mxu2 %v3010_v7  ;;  %3312 = vmatpush.msrb.mxu3 %v3083_v20  ;;  %v9449_v61 = vsel %vm746_vm8, %v5183_v4, %v5244_v62 }
 0x7d3   : > { %10656 = vst [vmem:[#allocation103_spill] sm:$0xff] %v9449_v61 }
 0x7d6   : > { %v9458_v57 = vpop.permute.xlu1 %5276  ;;  %v9468_v62 = vpop.permute.xlu2 %5296 }
 0x7d7   : > { %v9460_v41 = vpop.permute.xlu0 %5256 }
 0x7d8   : > { %v5258_v33 = vunpack.i.l.bf16 %v9460_v41 }
 0x7da   : > { %v3039_v32 = vsel %vm746_vm8, %v5258_v33, %v5184_v28  ;;  %v10150_v28 = vunpack.i.h.bf16 %v9428_v5 }
 0x7db   : > { %3203 = vmatpush.msra.mxu0 %v3039_v32 }
 0x7de   : > { %v9464_v20 = vpop.permute.xlu1 %5291 }
 0x7df   : > { %v9466_v4 = vpop.permute.xlu0 %5271  ;;  %v5294_v7 = vunpack.i.h.bf16 %v9464_v20 }
 0x7e0   : > { %v5274_v0 = vunpack.i.h.bf16 %v9466_v4 }
 0x7e1   : > { %v3027_v8 = vsel %vm746_vm8, %v5294_v7, %v5214_v23 }
 0x7e2   : > { %v3033_v61 = vsel %vm746_vm8, %v5274_v0, %v5199_v16  ;;  %v10154_v0 = vunpack.i.h.bf16 %v9214_v24 }
 0x7e3   : > { %3204 = vmatpush.msra.mxu0 %v3033_v61  ;;  %v9484_v61 = vpop.permute.xlu2 %5311 }
 0x7e4   : > { %v2992_v7 = vsel %vm746_vm8, %v10154_v0, %v10153_v60  ;;  %v9516_v60 = vld [vmem:[%s9859_s2] sm:$0xff] }
 0x7e5   : > { %3205 = vmatpush.msra.mxu0 %v3027_v8 }
 0x7e6   : > { %v9474_v53 = vpop.permute.xlu1 %5306 }
 0x7e7   : > { %v9476_v33 = vpop.permute.xlu0 %5286  ;;  %v10151_v32 = vunpack.i.h.bf16 %v9474_v53  ;;  %v10152_v43 = vunpack.i.l.bf16 %v9474_v53 }
 0x7e8   : > { %v10149_v54 = vunpack.i.l.bf16 %v9476_v33 }
 0x7e9   : > { %v2998_v23 = vsel %vm746_vm8, %v10152_v43, %v10151_v32 }
 0x7ea   : > { %v3004_v8 = vsel %vm746_vm8, %v10150_v28, %v10149_v54  ;;  %v10658_v54 = vunpack.i.h.bf16 %v9118_v29  ;;  %v10659_v28 = vunpack.i.l.bf16 %v9118_v29  ;;  %v10661_v29 = vunpack.i.l.bf16 %v9212_v48 }
 0x7eb   : > { %3249 = vmatpush.msra.mxu2 %v3004_v8  ;;  %v10662_v48 = vunpack.i.h.bf16 %v9233_v44 }
 0x7ec   : > { %v2986_v32 = vsel %vm746_vm8, %v10659_v28, %v10658_v54  ;;  %v5198_v28 = vunpack.i.l.bf16 %v9378_v14 }
 0x7ed   : > { %3250 = vmatpush.msra.mxu2 %v2998_v23 }
 0x7ee   : > { %v9496_v16 = vpop.permute.xlu1 %5321 }
 0x7ef   : > { %10657 = vst [vmem:[#allocation97_spill] sm:$0xff] %v9496_v16  ;;  %v9503_v2 = vpop.permute.xlu0 %5301  ;;  %3251 = vmatpush.msra.mxu2 %v2992_v7  ;;  %v5324_v43 = vunpack.i.h.bf16 %v9496_v16  ;;  %v10660_v7 = vunpack.i.h.bf16 %v9185_v11  ;;  %v5213_v16 = vunpack.i.l.bf16 %v9397_v17 }
 0x7f0   : > { %v5303_v8 = vunpack.i.l.bf16 %v9503_v2  ;;  %v5304_v23 = vunpack.i.h.bf16 %v9503_v2 }
 0x7f1   : > { %3252 = vmatpush.msra.mxu2 %v2986_v32  ;;  %v9528_v32 = vpop.permute.xlu2 %5326 }
 0x7f2   : > { %v3081_v0 = vsel %vm746_vm8, %v5304_v23, %v10660_v7  ;;  %v3077_v54 = vsel %vm746_vm8, %v10661_v29, %v5303_v8  ;;  %v3075_v23 = vsel %vm746_vm8, %v5324_v43, %v10662_v48  ;;  %v10665_v29 = vunpack.i.h.bf16 %v9412_v47 }
 0x7f3   : > { %3232 = vmatpush.msra.mxu1 %v3081_v0  ;;  %3253 = vmatpush.msra.mxu2 %v9102_v45  ;;  %v5228_v45 = vunpack.i.l.bf16 %v9412_v47  ;;  %v5243_v0 = vunpack.i.l.bf16 %v9435_v36  ;;  %v5259_v48 = vunpack.i.h.bf16 %v9460_v41 }
 0x7f4   : > { %3313 = vmatpush.msrb.mxu3 %v3077_v54  ;;  %3254 = vmatmul.f32.vlgmr.msra.gmra.mxu2 %v9516_v60 }
 0x7f5   : > { %3358 = vmatpush.msrb.mxu2 %v9372_v46  ;;  %3233 = vmatpush.msra.mxu1 %v3075_v23  ;;  %v10668_v23 = vunpack.i.l.bf16 %v9410_v63 }
 0x7f6   : > { %3318 = vmatpush.msra.mxu3 %v9289_v21  ;;  %v9537_v7 = vpop.permute.xlu1 %5336  ;;  %v10663_v21 = vunpack.i.l.bf16 %v9210_v9  ;;  %3556 = vmatmul.msk.f32.vlgmr.msra.gmra.mxu1 %vm963_vm9, %v9454_v1  ;;  %v10664_v9 = vunpack.i.l.bf16 %v9273_v40  ;;  %v5278_v40 = vunpack.i.l.bf16 %v9458_v57 }
 0x7f7   : > { %3558 = vmatmul.msk.f32.vlgmr.msrb.gmra.mxu3 %vm963_vm9, %v9454_v1  ;;  %3278 = vmatpush.msrb.mxu1 %v9198_v12  ;;  %v9549_v46 = vpop.permute.xlu0 %5316  ;;  %v5328_v12 = vunpack.i.l.bf16 %v9528_v32  ;;  %v5339_v17 = vunpack.i.h.bf16 %v9537_v7 }
 0x7f8   : > { %3319 = vmatpush.msra.mxu3 %v9241_v51  ;;  %v3067_v44 = vsel %vm746_vm8, %v10663_v21, %v5198_v28  ;;  %v5318_v43 = vunpack.i.l.bf16 %v9549_v46  ;;  %v3061_v51 = vsel %vm746_vm8, %v10664_v9, %v5213_v16 }
 0x7f9   : > { %3359 = vmatpush.msrb.mxu2 %v3067_v44  ;;  %3279 = vmatpush.msrb.mxu1 %v9244_v18  ;;  %v10666_v18 = vunpack.i.l.bf16 %v9330_v26  ;;  %v3015_v26 = vsel %vm746_vm8, %v5328_v12, %v10668_v23  ;;  %v9585_v21 = vpop.permute.xlu2 %5341  ;;  %v5298_v44 = vunpack.i.l.bf16 %v9468_v62  ;;  %v3038_v36 = vsel %vm746_vm8, %v5278_v40, %v5339_v17 }
 0x7fa   : > { %3320 = vmatpush.msra.mxu3 %v9316_v13  ;;  %v3021_v54 = vsel %vm746_vm8, %v5318_v43, %v10665_v29  ;;  %v5343_v9 = vunpack.i.l.bf16 %v9585_v21  ;;  %v5253_v29 = vunpack.i.l.bf16 %v9391_v35 }
 0x7fb   : > { %3360 = vmatpush.msrb.mxu2 %v3061_v51  ;;  %3280 = vmatpush.msrb.mxu1 %v9319_v39  ;;  %v3055_v13 = vsel %vm746_vm8, %v10666_v18, %v5228_v45  ;;  %v10667_v39 = vunpack.i.l.bf16 %v9271_v34  ;;  %v5319_v51 = vunpack.i.h.bf16 %v9549_v46 }
 0x7fc   : > { %3321 = vmatpush.msra.mxu3 %v9349_v27  ;;  %3206 = vmatpush.msra.mxu0 %v3021_v54  ;;  %v10671_v54 = vunpack.i.h.bf16 %v9430_v10 }
 0x7fd   : > { %3361 = vmatpush.msrb.mxu2 %v3055_v13  ;;  %3281 = vmatpush.msrb.mxu1 %v9249_v58  ;;  %v3049_v27 = vsel %vm746_vm8, %v10667_v39, %v5243_v0  ;;  %v10669_v58 = vunpack.i.l.bf16 %v9297_v52  ;;  %v10670_v52 = vunpack.i.l.bf16 %v9326_v49  ;;  %v5329_v13 = vunpack.i.h.bf16 %v9528_v32  ;;  %v10701_v32 = vld [vmem:[#allocation92_spill] sm:$0xff] }
 0x7fe   : > { %3322 = vmatpush.msra.mxu3 %v9307_v38  ;;  %3207 = vmatpush.msra.mxu0 %v3015_v26  ;;  %v9597_v43 = vpop.permute.xlu1 %5351  ;;  %v10672_v49 = vunpack.i.l.bf16 %v9351_v55  ;;  %v10674_v55 = vunpack.i.h.bf16 %v9428_v5  ;;  %v5314_v26 = vunpack.i.h.bf16 %v9484_v61 }
 0x7ff   : > { %3362 = vmatpush.msrb.mxu2 %v3049_v27  ;;  %3282 = vmatpush.msrb.mxu1 %v9310_v6  ;;  %v3043_v34 = vsel %vm746_vm8, %v10669_v58, %v5259_v48  ;;  %v9595_v38 = vpop.permute.xlu0 %5331  ;;  %v3037_v6 = vsel %vm746_vm8, %v10670_v52, %v5278_v40  ;;  %v5289_v27 = vunpack.i.h.bf16 %v9476_v33  ;;  %v5344_v58 = vunpack.i.h.bf16 %v9585_v21  ;;  %v10703_v21 = vld [vmem:[#allocation91_spill] sm:$0xff] }
 0x800   : > { %3323 = vmatpush.msra.mxu3 %v9338_v50  ;;  %v5334_v12 = vunpack.i.h.bf16 %v9595_v38  ;;  %v5254_v50 = vunpack.i.h.bf16 %v9391_v35  ;;  %v5338_v35 = vunpack.i.l.bf16 %v9537_v7  ;;  %v3003_v39 = vsel %vm746_vm8, %v5343_v9, %v10674_v55 }
 0x801   : > { %3363 = vmatpush.msrb.mxu2 %v3043_v34  ;;  %3283 = vmatpush.msrb.mxu1 %v9341_v42  ;;  %v3031_v42 = vsel %vm746_vm8, %v10672_v49, %v5298_v44  ;;  %v10677_v9 = vunpack.i.h.bf16 %v9410_v63  ;;  %v5313_v52 = vunpack.i.l.bf16 %v9484_v61  ;;  %v5118_v61 = vunpack.i.l.bf16 %v9185_v11 }
 0x802   : > { %3324 = vmatpush.msra.mxu3 %v9363_v37  ;;  %v3009_v18 = vsel %vm746_vm8, %v5334_v12, %v10671_v54  ;;  %v5273_v37 = vunpack.i.l.bf16 %v9466_v4  ;;  %v5269_v4 = vunpack.i.h.bf16 %v9408_v22  ;;  %v3019_v34 = vsel %vm746_vm8, %v5254_v50, %v5329_v13  ;;  %v9654_v54 = vpop.permute.xlu2 %5356 }
 0x803   : > { %3364 = vmatpush.msrb.mxu2 %v3037_v6  ;;  %3284 = vmatpush.msrb.mxu1 %v9366_v15  ;;  %v10673_v15 = vunpack.i.l.bf16 %v9374_v59  ;;  %v3018_v59 = vsel %vm746_vm8, %v5253_v29, %v5254_v50  ;;  %v5293_v6 = vunpack.i.l.bf16 %v9464_v20  ;;  %v5353_v50 = vunpack.i.l.bf16 %v9597_v43 }
 0x804   : > { %3325 = vmatpush.msra.mxu3 %v9385_v30  ;;  %3208 = vmatpush.msra.mxu0 %v3009_v18  ;;  %v3012_v49 = vsel %vm746_vm8, %v5269_v4, %v5273_v37  ;;  %v3013_v63 = vsel %vm746_vm8, %v5273_v37, %v5338_v35  ;;  %v10679_v55 = vunpack.i.l.bf16 %v9474_v53  ;;  %v5114_v37 = vunpack.i.h.bf16 %v9195_v31 }
 0x805   : > { %3365 = vmatpush.msrb.mxu2 %v3031_v42  ;;  %3285 = vmatpush.msrb.mxu1 %v9388_v25  ;;  %v3025_v30 = vsel %vm746_vm8, %v10673_v15, %v5319_v51  ;;  %v10675_v25 = vunpack.i.h.bf16 %v9393_v56  ;;  %v5108_v42 = vunpack.i.l.bf16 %v9214_v24  ;;  %v3007_v11 = vsel %vm746_vm8, %v5293_v6, %v5344_v58 }
 0x806   : > { %3326 = vmatpush.msra.mxu3 %v9405_v19  ;;  %3209 = vmatpush.msra.mxu0 %v3003_v39  ;;  %v10676_v19 = vunpack.i.l.bf16 %v9393_v56  ;;  %v3017_v56 = vsel %vm746_vm8, %v10677_v9, %v5253_v29  ;;  %v9664_v20 = vpop.permute.xlu1 %5366  ;;  %v10678_v29 = vunpack.i.l.bf16 %v9408_v22  ;;  %v10680_v22 = vunpack.i.l.bf16 %v9476_v33 }
 0x807   : > { %3366 = vmatpush.msrb.mxu2 %v3025_v30  ;;  %v9647_v12 = vpop.permute.xlu0 %5346  ;;  %v3006_v30 = vsel %vm746_vm8, %v5289_v27, %v5293_v6  ;;  %v10682_v33 = vunpack.i.h.bf16 %v9474_v53 }
 0x808   : > { %v3023_v23 = vsel %vm746_vm8, %v10676_v19, %v10675_v25  ;;  %3327 = vmatpush.msra.mxu3 %v3018_v59  ;;  %v5349_v18 = vunpack.i.h.bf16 %v9647_v12  ;;  %v3011_v15 = vsel %vm746_vm8, %v10678_v29, %v5269_v4  ;;  %v5358_v25 = vunpack.i.l.bf16 %v9654_v54 }
 0x809   : > { %3286 = vmatpush.msrb.mxu1 %v3023_v23  ;;  %3367 = vmatpush.msrb.mxu2 %v3019_v34  ;;  %v3005_v4 = vsel %vm746_vm8, %v10680_v22, %v5289_v27  ;;  %v3000_v19 = vsel %vm746_vm8, %v5313_v52, %v5314_v26  ;;  %v5073_v23 = vunpack.i.l.bf16 %v9075_v3  ;;  %v3001_v59 = vsel %vm746_vm8, %v5314_v26, %v5353_v50  ;;  %v10683_v26 = vld [vmem:[#allocation106_spill] sm:$0xff] }
 0x80a   : > { %3328 = vmatpush.msra.mxu3 %v3012_v49  ;;  %v2997_v39 = vsel %vm746_vm8, %v5349_v18, %v10679_v55  ;;  %v10681_v34 = vunpack.i.h.bf16 %v9214_v24  ;;  %v2999_v27 = vsel %vm746_vm8, %v10682_v33, %v5313_v52  ;;  %v2995_v6 = vsel %vm746_vm8, %v5118_v61, %v5358_v25  ;;  %v10685_v52 = vld [vmem:[#allocation98_spill] sm:$0xff]  ;;  %v10689_v55 = vld [vmem:[#allocation104_spill] sm:$0xff] }
 0x80b   : > { %3287 = vmatpush.msrb.mxu1 %v3017_v56  ;;  %3368 = vmatpush.msrb.mxu2 %v3013_v63  ;;  %v2994_v56 = vsel %vm746_vm8, %v5114_v37, %v5118_v61  ;;  %v10684_v49 = vunpack.i.l.bf16 %v9195_v31  ;;  %v10687_v63 = vunpack.i.l.bf16 %v10685_v52  ;;  %v10688_v61 = vunpack.i.h.bf16 %v9075_v3  ;;  %v9713_v31 = vpop.permute.xlu2 %5371 }
 0x80c   : > { %3329 = vmatpush.msra.mxu3 %v3006_v30  ;;  %3210 = vmatpush.msra.mxu0 %v2997_v39  ;;  %v2991_v9 = vsel %vm746_vm8, %v5108_v42, %v10681_v34  ;;  %v10686_v42 = vunpack.i.h.bf16 %v10685_v52  ;;  %v5263_v30 = vunpack.i.l.bf16 %v9430_v10  ;;  %v5369_v39 = vunpack.i.h.bf16 %v9664_v20  ;;  %v10695_v34 = vld [vmem:[#allocation100_spill] sm:$0xff] }
 0x80d   : > { %3288 = vmatpush.msrb.mxu1 %v3011_v15  ;;  %3369 = vmatpush.msrb.mxu2 %v3007_v11  ;;  %v2993_v53 = vsel %vm746_vm8, %v10684_v49, %v5114_v37  ;;  %v2979_v15 = vsel %vm746_vm8, %v5073_v23, %v10688_v61  ;;  %v10690_v11 = vld [vmem:[#allocation107_spill] sm:$0xff]  ;;  %v10691_v37 = vld [vmem:[#allocation112_spill] sm:$0xff]  ;;  %v5279_v23 = vunpack.i.h.bf16 %v9458_v57  ;;  %v5299_v33 = vunpack.i.h.bf16 %v9468_v62 }
 0x80e   : > { %3330 = vmatpush.msra.mxu3 %v3000_v19  ;;  %3211 = vmatpush.msra.mxu0 %v2991_v9  ;;  %v2988_v29 = vsel %vm746_vm8, %v10687_v63, %v10686_v42  ;;  %v10692_v22 = vunpack.i.h.bf16 %v10691_v37  ;;  %v10694_v19 = vunpack.i.l.bf16 %v9428_v5  ;;  %v10696_v9 = vld [vmem:[#allocation103_spill] sm:$0xff]  ;;  %v3068_v49 = vsel %vm746_vm8, %v5198_v28, %v5263_v30  ;;  %v10700_v63 = vld [vmem:[#allocation97_spill] sm:$0xff] }
 0x80f   : > { %3289 = vmatpush.msrb.mxu1 %v3005_v4  ;;  %3370 = vmatpush.msrb.mxu2 %v3001_v59  ;;  %v9696_v18 = vpop.permute.xlu0 %5361  ;;  %v10693_v4 = vunpack.i.l.bf16 %v10691_v37  ;;  %v5382_v59 = vpop.permute.xlu1 %5381  ;;  %v10697_v5 = vld [vmem:[#allocation111_spill] sm:$0xff]  ;;  %v3078_v52 = vsel %vm746_vm8, %v5303_v8, %v5369_v39  ;;  %v3062_v14 = vsel %vm746_vm8, %v5213_v16, %v5279_v23  ;;  %v3056_v2 = vsel %vm746_vm8, %v5228_v45, %v5299_v33 }
 0x810   : > { %3331 = vmatpush.msra.mxu3 %v2994_v56  ;;  %v5364_v24 = vunpack.i.h.bf16 %v9696_v18  ;;  %3212 = vmatpush.msra.mxu0 %v10683_v26  ;;  %v10698_v56 = vunpack.i.h.bf16 %v10697_v5  ;;  %v5384_v30 = vunpack.i.h.bf16 %v5382_v59  ;;  %v5348_v45 = vunpack.i.l.bf16 %v9647_v12 }
 0x811   : > { %3290 = vmatpush.msrb.mxu1 %v2999_v27  ;;  %3371 = vmatpush.msrb.mxu2 %v2995_v6  ;;  %v2983_v3 = vsel %vm746_vm8, %v10693_v4, %v10692_v22  ;;  %v5373_v27 = vunpack.i.l.bf16 %v9713_v31  ;;  %v10699_v6 = vunpack.i.l.bf16 %v10697_v5  ;;  %v5374_v40 = vunpack.i.h.bf16 %v9713_v31  ;;  %v10705_v31 = vld [vmem:[#allocation13_spill] sm:$0xff] }
 0x812   : > { %3332 = vmatpush.msra.mxu3 %v2988_v29  ;;  %3213 = vmatpush.msra.mxu0 %v2979_v15  ;;  %v3084_v10 = vsel %vm746_vm8, %v10694_v19, %v5364_v24  ;;  %v5323_v29 = vunpack.i.l.bf16 %v10700_v63  ;;  %v5333_v15 = vunpack.i.l.bf16 %v9595_v38  ;;  %v3032_v41 = vsel %vm746_vm8, %v5298_v44, %v5348_v45  ;;  %v3448_v45 = vld [vmem:[#allocation2 + $0x90] sm:$0xff] }
 0x813   : > { %3291 = vmatpush.msrb.mxu1 %v2993_v53  ;;  %3372 = vmatpush.msrb.mxu2 %v10689_v55  ;;  %v2981_v26 = vsel %vm746_vm8, %v10699_v6, %v10698_v56  ;;  %v5383_v53 = vunpack.i.l.bf16 %v5382_v59  ;;  %v3085_v61 = vsel %vm746_vm8, %v5364_v24, %v5373_v27  ;;  %v5354_v24 = vunpack.i.h.bf16 %v9597_v43  ;;  %v10704_v43 = vld [vmem:[#allocation110_spill] sm:$0xff] }
 0x814   : > { %3214 = vmatmul.f32.vlgmr.msra.gmra.mxu0 %v9516_v60  ;;  %3333 = vmatpush.msra.mxu3 %v10695_v34  ;;  %v3050_v16 = vsel %vm746_vm8, %v5243_v0, %v5323_v29  ;;  %v3044_v38 = vsel %vm746_vm8, %v5259_v48, %v5333_v15  ;;  %v5359_v0 = vunpack.i.h.bf16 %v9654_v54  ;;  %v5363_v48 = vunpack.i.l.bf16 %v9696_v18  ;;  %v3444_v29 = vld [vmem:[#allocation2 + $0x58] sm:$0xff] }
 0x815   : > { %3292 = vmatpush.msrb.mxu1 %v10690_v11  ;;  %3373 = vmatpush.msrb.mxu2 %v2983_v3  ;;  %v3086_v55 = vsel %vm746_vm8, %v5373_v27, %v5383_v53  ;;  %v3026_v12 = vsel %vm746_vm8, %v5319_v51, %v5354_v24  ;;  %v5104_v51 = vunpack.i.h.bf16 %v10701_v32  ;;  %v10706_v3 = vld [vmem:[#allocation9_spill] sm:$0xff] }
 0x816   : > { %3398 = vmatpush.msrb.mxu0 %v10696_v9  ;;  %3334 = vmatmul.f32.vlgmr.msra.gmra.mxu3 %v9516_v60  ;;  %v3020_v57 = vsel %vm746_vm8, %v5329_v13, %v5359_v0  ;;  %v3014_v62 = vsel %vm746_vm8, %v5338_v35, %v5363_v48  ;;  %v3002_v13 = vsel %vm746_vm8, %v5353_v50, %v5374_v40  ;;  %v10707_v9 = vld [vmem:[#allocation6_spill] sm:$0xff] }
 0x817   : > { %3352 = vmatpush.msrb.mxu3 %v3084_v10  ;;  %3374 = vmatmul.f32.vlgmr.msrb.gmra.mxu2 %v9516_v60  ;;  %v5377_v42 = vpop.permute.xlu0 %5376 }
 0x818   : > { %3293 = vmatpush.msrb.mxu1 %v2981_v26  ;;  %3399 = vmatpush.msrb.mxu0 %v3068_v49  ;;  %v5378_v28 = vunpack.i.l.bf16 %v5377_v42  ;;  %v5379_v46 = vunpack.i.h.bf16 %v5377_v42  ;;  %v10708_v26 = vld [vmem:[#allocation5_spill] sm:$0xff]  ;;  %v10709_v42 = vld [vmem:[#allocation15_spill] sm:$0xff] }
 0x819   : > { %3294 = vmatmul.f32.vlgmr.msrb.gmra.mxu1 %v9516_v60  ;;  %3353 = vmatpush.msrb.mxu3 %v3078_v52 }
 0x81a   : > { %3392 = vmatpush.msra.mxu1 %v3085_v61  ;;  %3400 = vmatpush.msrb.mxu0 %v3062_v14  ;;  %v3079_v8 = vsel %vm746_vm8, %v5369_v39, %v5378_v28  ;;  %v3080_v47 = vsel %vm746_vm8, %v5378_v28, %v5384_v30  ;;  %v5368_v39 = vunpack.i.l.bf16 %v9664_v20  ;;  %v2996_v7 = vsel %vm746_vm8, %v5358_v25, %v5379_v46  ;;  %v3445_v61 = vld [vmem:[#allocation2 + $0x40] sm:$0xff]  ;;  %v3446_v28 = vld [vmem:[#allocation2 + $0xc8] sm:$0xff] }
 0x81c   : > { %3401 = vmatpush.msrb.mxu0 %v3056_v2  ;;  %3393 = vmatpush.msra.mxu1 %v3079_v8  ;;  %v3008_v44 = vsel %vm746_vm8, %v5344_v58, %v5368_v39  ;;  %v3447_v2 = vld [vmem:[#allocation2 + $0xe0] sm:$0xff]  ;;  %v3449_v39 = vld [vmem:[#allocation2 + $0x70] sm:$0xff] }
 0x81e   : > { %3432 = vmatpush.msrb.mxu1 %v3086_v55  ;;  %3402 = vmatpush.msrb.mxu0 %v3050_v16 }
 0x81f   : > { %3559 = vmatmul.msk.f32.vlgmr.msrb.gmra.mxu3 %vm963_vm9, %v9454_v1 }
 0x820   : > { %3433 = vmatpush.msrb.mxu1 %v3080_v47  ;;  %3403 = vmatpush.msrb.mxu0 %v3044_v38 }
 0x821   : > { %3560 = vmatmul.msk.f32.vlgmr.msra.gmra.mxu1 %vm963_vm9, %v9454_v1 }
 0x822   : > { %3404 = vmatpush.msrb.mxu0 %v3038_v36 }
 0x824   : > { %3405 = vmatpush.msrb.mxu0 %v3032_v41 }
 0x826   : > { %3406 = vmatpush.msrb.mxu0 %v3026_v12 }
 0x828   : > { %3407 = vmatpush.msrb.mxu0 %v3020_v57  ;;  %v10710_v57 = vld [vmem:[#allocation7_spill] sm:$0xff] }
 0x829   : > { %3561 = vmatmul.msk.f32.vlgmr.msrb.gmra.mxu1 %vm963_vm9, %v9454_v1  ;;  %v10702_v1 = vunpack.i.l.bf16 %v10701_v32 }
 0x82a   : > { %3408 = vmatpush.msrb.mxu0 %v3014_v62 }
 0x82b   : > { %v2990_v35 = vsel %vm746_vm8, %v10702_v1, %v5104_v51 }
 0x82c   : > { %3409 = vmatpush.msrb.mxu0 %v3008_v44 }
 0x82e   : > { %3410 = vmatpush.msrb.mxu0 %v3002_v13 }
 0x830   : > { %3411 = vmatpush.msrb.mxu0 %v2996_v7 }
 0x832   : > { %3412 = vmatpush.msrb.mxu0 %v2990_v35 }
 0x834   : > { %3413 = vmatpush.msrb.mxu0 %v10703_v21 }
 0x835   : > { %3414 = vmatmul.f32.vlgmr.msrb.gmra.mxu0 %v9516_v60 }
 0x84e   : > { %v3275_v20 = vpop.f32.mrf.mxu3 }
 0x873   : > { %v3235_v54 = vpop.f32.mrf.mxu1 }
 0x877   : > { %v3255_v58 = vpop.f32.mrf.mxu2 }
 0x878   : > { %v3256_v18 = vadd.f32 %v3255_v58, %v10704_v43 }
 0x87a   : > { %v3276_v50 = vadd.f32 %v3275_v20, %v3256_v18  ;;  %v3315_v25 = vpop.f32.mrf.mxu3 }
 0x87c   : > { %v3439_v11 = vmul.f32 %v3276_v50, %v10705_v31 }
 0x87e   : > { %3477 = vst [vmem:[#allocation2 + $0xd8] sm:$0xff] %v3439_v11  ;;  %v3451_v15 = vsub.f32 %v3439_v11, %v3445_v61 }
 0x880   : > { %v3457_v55 = vand.u32 2147483647, %v3451_v15 }
 0x891   : > { %v3215_v37 = vpop.f32.mrf.mxu0 }
 0x892   : > { %v3216_v22 = vadd.f32 %v3215_v37, %v10704_v43 }
 0x894   : > { %v3236_v4 = vadd.f32 %v3235_v54, %v3216_v22 }
 0x896   : > { %v3438_v19 = vmul.f32 %v3236_v4, %v10706_v3  ;;  %v3295_v10 = vpop.f32.mrf.mxu1 }
 0x897   : > { %v3296_v23 = vadd.f32 %v3295_v10, %v10704_v43 }
 0x898   : > { %3476 = vst [vmem:[#allocation2] sm:$0xff] %v3438_v19  ;;  %v3450_v14 = vsub.f32 %v3438_v19, %v3444_v29 }
 0x899   : > { %v3316_v60 = vadd.f32 %v3315_v25, %v3296_v23  ;;  %v3335_v59 = vpop.f32.mrf.mxu3 }
 0x89a   : > { %v3375_v34 = vpop.f32.mrf.mxu2  ;;  %v3336_v6 = vadd.f32 %v3335_v59, %v10704_v43  ;;  %v3456_v8 = vand.u32 2147483647, %v3450_v14 }
 0x89b   : > { %v3440_v33 = vmul.f32 %v3316_v60, %v10707_v9  ;;  %v3376_v27 = vadd.f32 %v3375_v34, %v10704_v43 }
 0x89c   : > { %v3462_v16 = vadd.f32 %v3457_v55, %v3456_v8 }
 0x89d   : > { %3478 = vst [vmem:[#allocation2 + $0x18] sm:$0xff] %v3440_v33  ;;  %v3452_v30 = vsub.f32 %v3440_v33, %v3446_v28 }
 0x89e   : > { %v3395_v5 = vpop.f32.mrf.mxu1 }
 0x89f   : > { %v3396_v56 = vadd.f32 %v3395_v5, %v3376_v27  ;;  %v3458_v47 = vand.u32 2147483647, %v3452_v30 }
 0x8a1   : > { %v3442_v49 = vmul.f32 %v3396_v56, %v10708_v26  ;;  %v3463_v12 = vadd.f32 %v3462_v16, %v3458_v47 }
 0x8a2   : > { %v3355_v53 = vpop.f32.mrf.mxu3 }
 0x8a3   : > { %v3356_v52 = vadd.f32 %v3355_v53, %v3336_v6  ;;  %3480 = vst [vmem:[#allocation2 + $0x68] sm:$0xff] %v3442_v49  ;;  %v3454_v41 = vsub.f32 %v3442_v49, %v3448_v45 }
 0x8a5   : > { %v3441_v63 = vmul.f32 %v3356_v52, %v10709_v42  ;;  %v3460_v46 = vand.u32 2147483647, %v3454_v41 }
 0x8a6   : > { %v3435_v24 = vpop.f32.mrf.mxu1 }
 0x8a7   : > { %3479 = vst [vmem:[#allocation2 + $0x50] sm:$0xff] %v3441_v63  ;;  %v3453_v17 = vsub.f32 %v3441_v63, %v3447_v2 }
 0x8a9   : > { %v3459_v36 = vand.u32 2147483647, %v3453_v17 }
 0x8ab   : > { %v3464_v62 = vadd.f32 %v3463_v12, %v3459_v36 }
 0x8ad   : > { %v3465_v51 = vadd.f32 %v3464_v62, %v3460_v46 }
 0x8b2   : > { %v3415_v38 = vpop.f32.mrf.mxu0 }
 0x8b3   : > { %v3416_v0 = vadd.f32 %v3415_v38, %v10704_v43 }
 0x8b5   : > { %v3436_v48 = vadd.f32 %v3435_v24, %v3416_v0 }
 0x8b7   : > { %v3443_v40 = vmul.f32 %v3436_v48, %v10710_v57 }
 0x8b9   : > { %v3455_v44 = vsub.f32 %v3443_v40, %v3449_v39  ;;  %3481 = vst [vmem:[#allocation2 + $0x30] sm:$0xff] %v3443_v40 }
 0x8bb   : > { %v3461_v32 = vand.u32 2147483647, %v3455_v44 }
 0x8bd   : > { %v3466_v13 = vadd.f32 %v3465_v51, %v3461_v32 }
 0x8bf   : > { %3467 = vadd.xlane.f32.xlu2 %v3466_v13 }
 0x932   : > { %v3468_v7 = vpop.xlane.xlu2 %3467 }
 0x933   : > { %v3469_v1 = vrot.slane %v3468_v7, 4 }
 0x935   : > { %v3470_v35 = vadd.f32 %v3469_v1, %v3468_v7 }
 0x937   : > { %v3471_v21 = vrot.slane %v3470_v35, 2 }
 0x939   : > { %v3472_v58 = vadd.f32 %v3471_v21, %v3470_v35 }
 0x93b   : > { %v3473_v20 = vrot.slane %v3472_v58, 1 }
 0x93d   : > { %v3474_v43 = vadd.f32 %v3473_v20, %v3472_v58 }
 0x93f   : > { %3566 = vpush %v3474_v43 }
 0x970   : > { %s3567_s29 = spop %3566 }
 0x971   : > { %p3483_p8 = scmp.lt.f32.partialorder %s3567_s29, 1.0 }
 0x973   : > { %s3484_s30 = scalar_select %p3483_p8, 1, 0 }
 0x975   : > { %3485 = sst [smem:[#allocation3]] %s3484_s30 }
 0x976 PF: > { %s1237_s5 = sadd.s32 1, %s5392_s5  }
 0x977   : > { %p1234_p9 = scmp.ge.s32.totalorder %s1237_s5, 10  }
 0x978   :  { %s3486_s0 = sld [smem:[#allocation4]] (%p1234_p9) }
 0x979   :  { %1236 = sbr.rel (!%p1234_p9) target bundleno = 670 (0x29e), region = 76 }
 0x97e   :  { %p3562_p10 = scmp.ne.s32.totalorder %s3486_s0, 0 }
 0x980   :  { %3490 = sbr.rel (%p3562_p10) target bundleno = 2446 (0x98e), region = 44 }
 0x985   :  { %v3491_v18 = vld [vmem:[#allocation2] sm:$0xff]  ;;  %v3492_v50 = vld [vmem:[#allocation2 + $0xd8] sm:$0xff]  ;;  %v3494_v37 = vld [vmem:[#allocation2 + $0x50] sm:$0xff] }
 0x986   :  { %v3493_v31 = vld [vmem:[#allocation2 + $0x18] sm:$0xff]  ;;  %v3497_v11 = vmax.f32 %v3491_v18, 0.0  ;;  %v3498_v54 = vmax.f32 %v3492_v50, 0.0  ;;  %v3495_v22 = vld [vmem:[#allocation2 + $0x68] sm:$0xff]  ;;  %v3496_v4 = vld [vmem:[#allocation2 + $0x30] sm:$0xff]  ;;  %v3500_v3 = vmax.f32 %v3494_v37, 0.0 }
 0x987   :  { %v3499_v25 = vmax.f32 %v3493_v31, 0.0  ;;  %v3501_v19 = vmax.f32 %v3495_v22, 0.0  ;;  %v3502_v10 = vmax.f32 %v3496_v4, 0.0 }
 0x988   :  { %3503 = vst [vmem:[%s9860_s6] sm:$0xff] %v3497_v11 }
 0x989   :  { %3504 = vst [vmem:[%s9860_s6 + $0x8] sm:$0xff] %v3498_v54 }
 0x98a   :  { %3505 = vst [vmem:[%s9860_s6 + $0x10] sm:$0xff] %v3499_v25 }
 0x98b   :  { %3506 = vst [vmem:[%s9860_s6 + $0x18] sm:$0xff] %v3500_v3 }
 0x98c   :  { %3507 = vst [vmem:[%s9860_s6 + $0x20] sm:$0xff] %v3501_v19 }
 0x98d   :  { %3508 = vst [vmem:[%s9860_s6 + $0x28] sm:$0xff] %v3502_v10 }
 0x98e PF:  { %s3509_s16 = sld [smem:[#allocation4]] }
 0x994   :  { %p3563_p11 = scmp.ne.s32.totalorder %s3509_s16, 1 }
 0x996   :  { %3513 = sbr.rel (%p3563_p11) target bundleno = 2468 (0x9a4), region = 48 }
 0x99b   :  { %v3514_v23 = vld [vmem:[#allocation2 + $0x58] sm:$0xff]  ;;  %v3515_v60 = vld [vmem:[#allocation2 + $0x40] sm:$0xff]  ;;  %v3516_v59 = vld [vmem:[#allocation2 + $0xc8] sm:$0xff] }
 0x99c   :  { %v3520_v34 = vmax.f32 %v3514_v23, 0.0  ;;  %v3521_v9 = vmax.f32 %v3515_v60, 0.0  ;;  %v3522_v33 = vmax.f32 %v3516_v59, 0.0  ;;  %v3517_v27 = vld [vmem:[#allocation2 + $0xe0] sm:$0xff]  ;;  %v3518_v5 = vld [vmem:[#allocation2 + $0x90] sm:$0xff] }
 0x99d   :  { %v3519_v56 = vld [vmem:[#allocation2 + $0x70] sm:$0xff]  ;;  %v3523_v6 = vmax.f32 %v3517_v27, 0.0  ;;  %v3524_v26 = vmax.f32 %v3518_v5, 0.0 }
 0x99e   :  { %3526 = vst [vmem:[%s9860_s6] sm:$0xff] %v3520_v34  ;;  %v3525_v49 = vmax.f32 %v3519_v56, 0.0 }
 0x99f   :  { %3527 = vst [vmem:[%s9860_s6 + $0x8] sm:$0xff] %v3521_v9 }
 0x9a0   :  { %3528 = vst [vmem:[%s9860_s6 + $0x10] sm:$0xff] %v3522_v33 }
 0x9a1   :  { %3529 = vst [vmem:[%s9860_s6 + $0x18] sm:$0xff] %v3523_v6 }
 0x9a2   :  { %3530 = vst [vmem:[%s9860_s6 + $0x20] sm:$0xff] %v3524_v26 }
 0x9a3   :  { %3531 = vst [vmem:[%s9860_s6 + $0x28] sm:$0xff] %v3525_v49 }
 0x9a4 PF:  {}

</bundles_post_ra>
